<compile_context>
chip_gen: v5e
topology: v5e:2x2
jax: 0.10.0
libtpu: 0.0.40
codegen_flags: <defaults>
</compile_context>

<pallas_src>
import functools

import jax
import jax.numpy as jnp
from jax import lax
from jax.experimental import pallas as pl
from jax.experimental.pallas import tpu as pltpu

_INV_SQRT2 = 0.7071067811865476
_BN_EPS = 1e-5
_VMEM_LIMIT = 48 * 1024 * 1024   # safe on v5e/v6e (128 MiB) and v7x (64 MiB)


def _round_up(x, m):
    return (x + m - 1) // m * m


# --------------------------------------------------------------------------
# Pass 1: tiled conv-as-GEMM (+ bias, optionally + per-tile BN statistics)
# --------------------------------------------------------------------------

def _gemm_bias_kernel(p_ref, w_ref, b_ref, y_ref, acc_ref):
    # program_id hoisted to top level (must not appear inside pl.when bodies).
    k_idx = pl.program_id(2)
    k_last = pl.num_programs(2) - 1

    @pl.when(k_idx == 0)
    def _():
        acc_ref[...] = jnp.zeros_like(acc_ref)

    acc_ref[...] += jnp.dot(p_ref[...], w_ref[...],
                            preferred_element_type=jnp.float32)

    @pl.when(k_idx == k_last)
    def _():
        y_ref[...] = acc_ref[...] + b_ref[...]


def _gemm_bias_stats_kernel(p_ref, w_ref, b_ref, y_ref, sum_ref, ssq_ref,
                            acc_ref, *, m_valid):
    # All program_id/num_programs hoisted out of the pl.when bodies.
    k_idx = pl.program_id(2)
    k_last = pl.num_programs(2) - 1
    tm = acc_ref.shape[0]
    row_start = pl.program_id(0) * tm

    @pl.when(k_idx == 0)
    def _():
        acc_ref[...] = jnp.zeros_like(acc_ref)

    acc_ref[...] += jnp.dot(p_ref[...], w_ref[...],
                            preferred_element_type=jnp.float32)

    @pl.when(k_idx == k_last)
    def _():
        y = acc_ref[...] + b_ref[...]
        y_ref[...] = y
        # Per-tile BN statistics (masked so padded rows don't bias the stats).
        rows = row_start + lax.broadcasted_iota(jnp.int32, y.shape, 0)
        ym = jnp.where(rows < m_valid, y, 0.0)
        s = jnp.sum(ym, axis=0, keepdims=True)
        q = jnp.sum(ym * ym, axis=0, keepdims=True)
        sum_ref[...] = s.reshape(1, 1, s.shape[-1])
        ssq_ref[...] = q.reshape(1, 1, q.shape[-1])


# --------------------------------------------------------------------------
# Pass 2: apply BatchNorm affine (precomputed scale/shift) + exact GELU
# --------------------------------------------------------------------------

def _bn_gelu_kernel(y_ref, scale_ref, shift_ref, o_ref):
    z = y_ref[...] * scale_ref[...] + shift_ref[...]
    o_ref[...] = 0.5 * z * (1.0 + lax.erf(z * _INV_SQRT2))


# --------------------------------------------------------------------------
# pallas_call wrappers
# --------------------------------------------------------------------------

def _conv_gemm(patches, w_mat, bias2d, *, with_stats, m_valid, tm, tn, tk):
    mp, kp = patches.shape
    coutp = w_mat.shape[1]
    gm, gn, gk = mp // tm, coutp // tn, kp // tk

    in_specs = [
        pl.BlockSpec((tm, tk), lambda i, j, k: (i, k)),
        pl.BlockSpec((tk, tn), lambda i, j, k: (k, j)),
        pl.BlockSpec((1, tn), lambda i, j, k: (0, j)),
    ]
    y_spec = pl.BlockSpec((tm, tn), lambda i, j, k: (i, j))

    flops = 2 * mp * kp * coutp
    bytes_accessed = (patches.size * patches.dtype.itemsize
                      + w_mat.size * w_mat.dtype.itemsize
                      + mp * coutp * 4)
    cparams = pltpu.CompilerParams(
        dimension_semantics=("parallel", "parallel", "arbitrary"),
        vmem_limit_bytes=_VMEM_LIMIT)

    if with_stats:
        kernel = functools.partial(_gemm_bias_stats_kernel, m_valid=m_valid)
        out_shape = (
            jax.ShapeDtypeStruct((mp, coutp), jnp.float32),
            jax.ShapeDtypeStruct((gm, 1, coutp), jnp.float32),
            jax.ShapeDtypeStruct((gm, 1, coutp), jnp.float32),
        )
        out_specs = (
            y_spec,
            pl.BlockSpec((1, 1, tn), lambda i, j, k: (i, 0, j)),
            pl.BlockSpec((1, 1, tn), lambda i, j, k: (i, 0, j)),
        )
    else:
        kernel = _gemm_bias_kernel
        out_shape = jax.ShapeDtypeStruct((mp, coutp), jnp.float32)
        out_specs = y_spec

    return pl.pallas_call(
        kernel,
        out_shape=out_shape,
        grid_spec=pltpu.PrefetchScalarGridSpec(
            num_scalar_prefetch=0,
            grid=(gm, gn, gk),
            in_specs=in_specs,
            out_specs=out_specs,
            scratch_shapes=[pltpu.VMEM((tm, tn), jnp.float32)]),
        compiler_params=cparams,
        cost_estimate=pl.CostEstimate(flops=flops, transcendentals=0,
                                      bytes_accessed=bytes_accessed),
    )(patches, w_mat, bias2d)


def _bn_gelu_apply(y, scale, shift, *, tm):
    mp, coutp = y.shape
    # Full-Coutp lane width (lane-dense stores), large row tiles; keep each f32
    # block <= ~2 MiB so double-buffered in+out stays inside scoped VMEM on
    # every generation.
    tm2 = tm
    while tm2 > 256 and tm2 % 2 == 0 and tm2 * coutp * 4 > (2 << 20):
        tm2 //= 2
    gm = mp // tm2
    return pl.pallas_call(
        _bn_gelu_kernel,
        out_shape=jax.ShapeDtypeStruct((mp, coutp), jnp.float32),
        grid_spec=pltpu.PrefetchScalarGridSpec(
            num_scalar_prefetch=0,
            grid=(gm,),
            in_specs=[pl.BlockSpec((tm2, coutp), lambda i: (i, 0)),
                      pl.BlockSpec((1, coutp), lambda i: (0, 0)),
                      pl.BlockSpec((1, coutp), lambda i: (0, 0))],
            out_specs=pl.BlockSpec((tm2, coutp), lambda i: (i, 0))),
        compiler_params=pltpu.CompilerParams(
            dimension_semantics=("parallel",),
            vmem_limit_bytes=_VMEM_LIMIT),
        input_output_aliases={0: 0},   # write back in place over y
        cost_estimate=pl.CostEstimate(flops=10 * mp * coutp,
                                      transcendentals=mp * coutp,
                                      bytes_accessed=2 * mp * coutp * 4),
    )(y, scale.reshape(1, coutp), shift.reshape(1, coutp))


# --------------------------------------------------------------------------
# im2col (layout plumbing in the XLA wrapper)
# --------------------------------------------------------------------------

def _im2col(x_nhwc, kh, kw, stride, padding, dilation):
    n, h, w, c = x_nhwc.shape
    sh, sw = stride
    ph, pw = padding
    dh, dw = dilation
    xp = jnp.pad(x_nhwc, ((0, 0), (ph, ph), (pw, pw), (0, 0)))
    oh = (h + 2 * ph - dh * (kh - 1) - 1) // sh + 1
    ow = (w + 2 * pw - dw * (kw - 1) - 1) // sw + 1
    cols = []
    for i in range(kh):
        for j in range(kw):
            patch = xp[:, i * dh: i * dh + sh * oh: sh,
                       j * dw: j * dw + sw * ow: sw, :]
            cols.append(patch)
    patches = jnp.concatenate(cols, axis=-1)          # [N, OH, OW, KH*KW*Cin]
    return patches.reshape(n * oh * ow, kh * kw * c), (n, oh, ow)


# --------------------------------------------------------------------------
# Module wrapper
# --------------------------------------------------------------------------

class ConvPallas:
    """Pallas equivalent of node/CONV.py::Conv (groups=1)."""

    def __init__(self, nIn, nOut, kSize, stride, padding=0, dilation=(1, 1),
                 groups=1, bn_act=False, bias=False, *, key,
                 compute_dtype=jnp.bfloat16):
        assert groups == 1  # TODO(synk): grouped conv not implemented in GEMM path
        self.nIn, self.nOut = nIn, nOut
        if isinstance(kSize, int):
            self.kh = self.kw = kSize
        else:
            self.kh, self.kw = kSize
        self.stride = (stride, stride) if isinstance(stride, int) else tuple(stride)
        self.padding = (padding, padding) if isinstance(padding, int) else tuple(padding)
        self.dilation = tuple(dilation)
        self.bn_act = bn_act
        self.compute_dtype = compute_dtype

        k_w, k_b = jax.random.split(key)
        # deterministic synthetic init (PyTorch layout: [Cout, Cin, KH, KW])
        self.weight = 0.1 * jax.random.normal(
            k_w, (nOut, nIn, self.kh, self.kw), dtype=jnp.float32)
        if bias:
            self.bias = 0.1 * jax.random.normal(k_b, (nOut,), dtype=jnp.float32)
        else:
            self.bias = jnp.zeros((nOut,), dtype=jnp.float32)
        # BatchNorm2d affine params (default torch init: weight=1, bias=0)
        self.gamma = jnp.ones((nOut,), dtype=jnp.float32)
        self.beta = jnp.zeros((nOut,), dtype=jnp.float32)

        # ---- K / Cout tiling (depends only on layer config) ----------------
        self._k = self.kh * self.kw * nIn
        kp = _round_up(self._k, 128)
        tk = 128
        for cand in (512, 384, 256):          # largest K tile that divides Kp
            if kp % cand == 0:
                tk = cand
                break
        if tk == 128 and kp > 2048:           # big K: force 512-wide K tiles
            kp = _round_up(kp, 512)
            tk = 512
        self._kp, self._tk = kp, tk

        coutp = _round_up(nOut, 128)
        tn = 128
        for cand in (512, 384, 256):          # >=256 fills the 256-wide MXU (v6e/v7x)
            if coutp % cand == 0:
                tn = cand
                break
        self._coutp, self._tn = coutp, tn

        # ---- precompute padded GEMM weights / bias / BN params once --------
        w_mat = jnp.transpose(self.weight, (2, 3, 1, 0)).reshape(self._k, nOut)
        self._w_mat_p = jnp.pad(
            w_mat, ((0, self._kp - self._k), (0, self._coutp - nOut))
        ).astype(compute_dtype)
        self._bias_p = jnp.pad(self.bias, (0, self._coutp - nOut)
                               ).reshape(1, self._coutp).astype(jnp.float32)
        self._gamma_p = jnp.pad(self.gamma, (0, self._coutp - nOut))
        self._beta_p = jnp.pad(self.beta, (0, self._coutp - nOut))

    def __call__(self, x_nchw):
        x = x_nchw.astype(jnp.float32)
        x_nhwc = jnp.transpose(x, (0, 2, 3, 1))
        patches, (n, oh, ow) = _im2col(
            x_nhwc, self.kh, self.kw, self.stride, self.padding, self.dilation)
        m, k = patches.shape
        cout = self.nOut
        tn, tk, kp = self._tn, self._tk, self._kp

        # ---- M tiling (depends on input spatial size) ----------------------
        if m >= 1024:
            tm = 1024
        elif m >= 512:
            tm = 512
        else:
            tm = _round_up(m, 8)
        mp = _round_up(m, tm)

        patches_p = jnp.pad(patches, ((0, mp - m), (0, kp - k))
                            ).astype(self.compute_dtype)

        # ---- pass 1: tiled GEMM (+ bias [+ BN stats]) ----------------------
        if self.bn_act:
            y, s_parts, q_parts = _conv_gemm(
                patches_p, self._w_mat_p, self._bias_p, with_stats=True,
                m_valid=m, tm=tm, tn=tn, tk=tk)
            # tiny cross-tile reduction -> per-channel batch statistics (fp32)
            total = jnp.sum(s_parts, axis=(0, 1))          # [Coutp]
            totsq = jnp.sum(q_parts, axis=(0, 1))          # [Coutp]
            mean = total / m
            # TODO(synk): E[y^2]-E[y]^2 in f32 can cancel for very large M;
            # a shifted/two-pass variance would be more robust at scale.
            var = jnp.maximum(totsq / m - mean * mean, 0.0)
            scale = self._gamma_p * lax.rsqrt(var + _BN_EPS)
            shift = self._beta_p - mean * scale
            # ---- pass 2: tiled BN-apply + GELU (in place over y) -----------
            y = _bn_gelu_apply(y, scale, shift, tm=tm)
        else:
            y = _conv_gemm(patches_p, self._w_mat_p, self._bias_p,
                           with_stats=False, m_valid=m, tm=tm, tn=tn, tk=tk)

        y = y[:m, :cout].reshape(n, oh, ow, cout)
        return jnp.transpose(y, (0, 3, 1, 2))  # back to NCHW


# --------------------------------------------------------------------------
# Pure-JAX reference (sanity check)
# --------------------------------------------------------------------------

def _reference(conv: ConvPallas, x_nchw):
    xx = x_nchw.astype(jnp.float32)
    w = conv.weight
    if conv.compute_dtype != jnp.float32:
        # Round inputs the same way the kernel does (bf16 operands, f32 acc).
        xx = xx.astype(conv.compute_dtype).astype(jnp.float32)
        w = w.astype(conv.compute_dtype).astype(jnp.float32)
    y = lax.conv_general_dilated(
        xx, w,
        window_strides=conv.stride,
        padding=[(conv.padding[0], conv.padding[0]),
                 (conv.padding[1], conv.padding[1])],
        rhs_dilation=conv.dilation,
        dimension_numbers=("NCHW", "OIHW", "NCHW"),
        precision=lax.Precision.HIGHEST)
    y = y + conv.bias.reshape(1, -1, 1, 1)
    if conv.bn_act:
        mean = jnp.mean(y, axis=(0, 2, 3), keepdims=True)
        var = jnp.mean((y - mean) ** 2, axis=(0, 2, 3), keepdims=True)
        z = (y - mean) / jnp.sqrt(var + _BN_EPS)
        z = z * conv.gamma.reshape(1, -1, 1, 1) + conv.beta.reshape(1, -1, 1, 1)
        y = 0.5 * z * (1.0 + lax.erf(z * _INV_SQRT2))
    return y


if __name__ == "__main__":
    key = jax.random.PRNGKey(0)
    k_x, k_p1, k_p2, k_p3 = jax.random.split(key, 4)

    # small shapes consistent with the module: NCHW input
    N, C_IN, H, W = 2, 4, 16, 16
    C_OUT = 8

    x = jax.random.normal(k_x, (N, C_IN, H, W), dtype=jnp.float32)

    # Test A: conv(3x3, s=1, p=1) + BatchNorm + GELU (bn_act=True), no bias.
    conv_a = ConvPallas(C_IN, C_OUT, 3, 1, padding=1, dilation=(1, 1),
                        groups=1, bn_act=True, bias=False, key=k_p1)
    out_a = jax.jit(conv_a.__call__)(x)
    out_a = jax.block_until_ready(out_a)
    assert out_a.shape == (N, C_OUT, H, W), out_a.shape
    ref_a = _reference(conv_a, x)
    err_a = float(jnp.max(jnp.abs(out_a - ref_a)))
    assert err_a < 2e-3, err_a

    # Test B: plain conv(3x3, s=2, p=1) with bias, no BN/GELU.
    conv_b = ConvPallas(C_IN, C_OUT, 3, 2, padding=1, dilation=(1, 1),
                        groups=1, bn_act=False, bias=True, key=k_p2)
    out_b = jax.jit(conv_b.__call__)(x)
    out_b = jax.block_until_ready(out_b)
    assert out_b.shape == (N, C_OUT, H // 2, W // 2), out_b.shape
    ref_b = _reference(conv_b, x)
    err_b = float(jnp.max(jnp.abs(out_b - ref_b)))
    assert err_b < 2e-3, err_b

    # Test C: non-square kernel (3x2) with dilation (2,2), bias, no BN/GELU.
    conv_c = ConvPallas(C_IN, C_OUT, (3, 2), 1, padding=(2, 1), dilation=(2, 2),
                        groups=1, bn_act=False, bias=True, key=k_p3)
    out_c = jax.jit(conv_c.__call__)(x)
    out_c = jax.block_until_ready(out_c)
    assert out_c.shape == (N, C_OUT, H, W), out_c.shape
    ref_c = _reference(conv_c, x)
    err_c = float(jnp.max(jnp.abs(out_c - ref_c)))
    assert err_c < 2e-3, err_c

    print("KERNEL_OK")
</pallas_src>

<mosaic_0001>
module attributes {stable_mosaic.version = 11 : i64} {
  func.func @_gemm_bias_stats_kernel(%arg0: i32, %arg1: i32, %arg2: i32, %arg3: memref<512x128xbf16, #tpu.memory_space<vmem>>, %arg4: memref<128x128xbf16, #tpu.memory_space<vmem>>, %arg5: memref<1x128xf32, #tpu.memory_space<vmem>>, %arg6: memref<512x128xf32, #tpu.memory_space<vmem>>, %arg7: memref<1x1x128xf32, #tpu.memory_space<vmem>>, %arg8: memref<1x1x128xf32, #tpu.memory_space<vmem>>, %arg9: memref<512x128xf32, #tpu.memory_space<vmem>>) attributes {dimension_semantics = [#tpu.dimension_semantics<parallel>, #tpu.dimension_semantics<parallel>, #tpu.dimension_semantics<arbitrary>], iteration_bounds = array<i64: 1, 1, 1>, scalar_prefetch = 0 : i64, scratch_operands = 1 : i64, tpu.core_type = #tpu.core_type<tc>, window_params = [{transform_indices = @transform_0, window_bounds = array<i64: 512, 128>}, {transform_indices = @transform_1, window_bounds = array<i64: 128, 128>}, {transform_indices = @transform_2, window_bounds = array<i64: 1, 128>}, {transform_indices = @transform_3, window_bounds = array<i64: 512, 128>}, {transform_indices = @transform_4, window_bounds = array<i64: 1, 1, 128>}, {transform_indices = @transform_5, window_bounds = array<i64: 1, 1, 128>}]} {
    %c512_i32 = arith.constant 512 : i32
    %0 = arith.muli %arg0, %c512_i32 : i32
    %c0_i32 = arith.constant 0 : i32
    %1 = arith.cmpi eq, %arg2, %c0_i32 : i32
    %2 = arith.extui %1 : i1 to i32
    %c0_i32_0 = arith.constant 0 : i32
    %3 = arith.cmpi ne, %2, %c0_i32_0 : i32
    scf.if %3 {
      %cst_10 = arith.constant 0.000000e+00 : f32
      %13 = vector.broadcast %cst_10 : f32 to vector<512x128xf32>
      %c0_11 = arith.constant 0 : index
      %c0_12 = arith.constant 0 : index
      %14 = vector.load %arg9[%c0_11, %c0_12] : memref<512x128xf32, #tpu.memory_space<vmem>>, vector<512x128xf32>
      tpu.vector_store %arg9[%c0_11, %c0_12], %13 {strides = array<i32>} : memref<512x128xf32, #tpu.memory_space<vmem>>, vector<512x128xf32>,
    } else {
    }
    %c0 = arith.constant 0 : index
    %c0_1 = arith.constant 0 : index
    %4 = vector.load %arg9[%c0, %c0_1] : memref<512x128xf32, #tpu.memory_space<vmem>>, vector<512x128xf32>
    %c0_2 = arith.constant 0 : index
    %c0_3 = arith.constant 0 : index
    %5 = vector.load %arg3[%c0_2, %c0_3] : memref<512x128xbf16, #tpu.memory_space<vmem>>, vector<512x128xbf16>
    %c0_4 = arith.constant 0 : index
    %c0_5 = arith.constant 0 : index
    %6 = vector.load %arg4[%c0_4, %c0_5] : memref<128x128xbf16, #tpu.memory_space<vmem>>, vector<128x128xbf16>
    %cst = arith.constant dense<0.000000e+00> : vector<512x128xf32>
    %7 = tpu.matmul %5, %6, %cst {dimension_numbers = #tpu.dot_dimension_numbers<[1], [0], [0], [1], [0, 0, 1, 1], [], []>} : vector<512x128xbf16>, vector<128x128xbf16>, vector<512x128xf32> -> vector<512x128xf32>
    %8 = arith.addf %4, %7 : vector<512x128xf32>
    %c0_6 = arith.constant 0 : index
    %c0_7 = arith.constant 0 : index
    %9 = vector.load %arg9[%c0_6, %c0_7] : memref<512x128xf32, #tpu.memory_space<vmem>>, vector<512x128xf32>
    tpu.vector_store %arg9[%c0_6, %c0_7], %8 {strides = array<i32>} : memref<512x128xf32, #tpu.memory_space<vmem>>, vector<512x128xf32>,
    %c0_i32_8 = arith.constant 0 : i32
    %10 = arith.cmpi eq, %arg2, %c0_i32_8 : i32
    %11 = arith.extui %10 : i1 to i32
    %c0_i32_9 = arith.constant 0 : i32
    %12 = arith.cmpi ne, %11, %c0_i32_9 : i32
    scf.if %12 {
      %c0_10 = arith.constant 0 : index
      %c0_11 = arith.constant 0 : index
      %13 = vector.load %arg9[%c0_10, %c0_11] : memref<512x128xf32, #tpu.memory_space<vmem>>, vector<512x128xf32>
      %c0_12 = arith.constant 0 : index
      %c0_13 = arith.constant 0 : index
      %14 = vector.load %arg5[%c0_12, %c0_13] : memref<1x128xf32, #tpu.memory_space<vmem>>, vector<1x128xf32>
      %15 = vector.broadcast %14 : vector<1x128xf32> to vector<512x128xf32>
      %16 = arith.addf %13, %15 : vector<512x128xf32>
      %c0_14 = arith.constant 0 : index
      %c0_15 = arith.constant 0 : index
      %17 = vector.load %arg6[%c0_14, %c0_15] : memref<512x128xf32, #tpu.memory_space<vmem>>, vector<512x128xf32>
      tpu.vector_store %arg6[%c0_14, %c0_15], %16 {strides = array<i32>} : memref<512x128xf32, #tpu.memory_space<vmem>>, vector<512x128xf32>,
      %18 = tpu.iota {dimensions = array<i32: 0>} : vector<512x128xi32>
      %19 = vector.broadcast %0 : i32 to vector<512x128xi32>
      %20 = arith.addi %19, %18 : vector<512x128xi32>
      %c512_i32_16 = arith.constant 512 : i32
      %21 = vector.broadcast %c512_i32_16 : i32 to vector<512x128xi32>
      %22 = arith.cmpi slt, %20, %21 : vector<512x128xi32>
      %cst_17 = arith.constant 0.000000e+00 : f32
      %23 = vector.broadcast %cst_17 : f32 to vector<512x128xf32>
      %24 = arith.select %22, %16, %23 : vector<512x128xi1>, vector<512x128xf32>
      %cst_18 = arith.constant dense<0.000000e+00> : vector<128xf32>
      %25 = vector.multi_reduction <add>, %24, %cst_18 [0] : vector<512x128xf32> to vector<128xf32>
      %26 = vector.shape_cast %25 : vector<128xf32> to vector<1x128xf32>
      %27 = arith.mulf %24, %24 : vector<512x128xf32>
      %cst_19 = arith.constant dense<0.000000e+00> : vector<128xf32>
      %28 = vector.multi_reduction <add>, %27, %cst_19 [0] : vector<512x128xf32> to vector<128xf32>
      %29 = vector.shape_cast %28 : vector<128xf32> to vector<1x128xf32>
      %30 = vector.shape_cast %26 : vector<1x128xf32> to vector<1x1x128xf32>
      %c0_20 = arith.constant 0 : index
      %c0_21 = arith.constant 0 : index
      %c0_22 = arith.constant 0 : index
      %31 = vector.load %arg7[%c0_20, %c0_21, %c0_22] : memref<1x1x128xf32, #tpu.memory_space<vmem>>, vector<1x1x128xf32>
      tpu.vector_store %arg7[%c0_20, %c0_21, %c0_22], %30 {strides = array<i32>} : memref<1x1x128xf32, #tpu.memory_space<vmem>>, vector<1x1x128xf32>,
      %32 = vector.shape_cast %29 : vector<1x128xf32> to vector<1x1x128xf32>
      %c0_23 = arith.constant 0 : index
      %c0_24 = arith.constant 0 : index
      %c0_25 = arith.constant 0 : index
      %33 = vector.load %arg8[%c0_23, %c0_24, %c0_25] : memref<1x1x128xf32, #tpu.memory_space<vmem>>, vector<1x1x128xf32>
      tpu.vector_store %arg8[%c0_23, %c0_24, %c0_25], %32 {strides = array<i32>} : memref<1x1x128xf32, #tpu.memory_space<vmem>>, vector<1x1x128xf32>,
    } else {
    }
    return
  }
  func.func @transform_0(%arg0: i32, %arg1: i32, %arg2: i32) -> (i32, i32) {
    %c0_i32 = arith.constant 0 : i32
    return %arg0, %arg2 : i32, i32
  }
  func.func @transform_1(%arg0: i32, %arg1: i32, %arg2: i32) -> (i32, i32) {
    %c0_i32 = arith.constant 0 : i32
    return %arg2, %arg1 : i32, i32
  }
  func.func @transform_2(%arg0: i32, %arg1: i32, %arg2: i32) -> (i32, i32) {
    %c0_i32 = arith.constant 0 : i32
    %c0_i32_0 = arith.constant 0 : i32
    return %c0_i32, %arg1 : i32, i32
  }
  func.func @transform_3(%arg0: i32, %arg1: i32, %arg2: i32) -> (i32, i32) {
    %c0_i32 = arith.constant 0 : i32
    return %arg0, %arg1 : i32, i32
  }
  func.func @transform_4(%arg0: i32, %arg1: i32, %arg2: i32) -> (i32, i32, i32) {
    %c0_i32 = arith.constant 0 : i32
    %c0_i32_0 = arith.constant 0 : i32
    return %arg0, %c0_i32, %arg1 : i32, i32, i32
  }
  func.func @transform_5(%arg0: i32, %arg1: i32, %arg2: i32) -> (i32, i32, i32) {
    %c0_i32 = arith.constant 0 : i32
    %c0_i32_0 = arith.constant 0 : i32
    return %arg0, %c0_i32, %arg1 : i32, i32, i32
  }
}

module attributes {stable_mosaic.version = 11 : i64} {
  func.func @_bn_gelu_kernel(%arg0: i32, %arg1: memref<512x128xf32, #tpu.memory_space<vmem>>, %arg2: memref<1x128xf32, #tpu.memory_space<vmem>>, %arg3: memref<1x128xf32, #tpu.memory_space<vmem>>, %arg4: memref<512x128xf32, #tpu.memory_space<vmem>>) attributes {dimension_semantics = [#tpu.dimension_semantics<parallel>], iteration_bounds = array<i64: 1>, scalar_prefetch = 0 : i64, scratch_operands = 0 : i64, tpu.core_type = #tpu.core_type<tc>, window_params = [{transform_indices = @transform_0, window_bounds = array<i64: 512, 128>}, {pipeline_mode = #tpu.pipeline_mode<synchronous>, transform_indices = @transform_1, window_bounds = array<i64: 1, 128>}, {pipeline_mode = #tpu.pipeline_mode<synchronous>, transform_indices = @transform_2, window_bounds = array<i64: 1, 128>}, {transform_indices = @transform_3, window_bounds = array<i64: 512, 128>}]} {
    %c0 = arith.constant 0 : index
    %c0_0 = arith.constant 0 : index
    %0 = vector.load %arg1[%c0, %c0_0] : memref<512x128xf32, #tpu.memory_space<vmem>>, vector<512x128xf32>
    %c0_1 = arith.constant 0 : index
    %c0_2 = arith.constant 0 : index
    %1 = vector.load %arg2[%c0_1, %c0_2] : memref<1x128xf32, #tpu.memory_space<vmem>>, vector<1x128xf32>
    %2 = vector.broadcast %1 : vector<1x128xf32> to vector<512x128xf32>
    %3 = arith.mulf %0, %2 : vector<512x128xf32>
    %c0_3 = arith.constant 0 : index
    %c0_4 = arith.constant 0 : index
    %4 = vector.load %arg3[%c0_3, %c0_4] : memref<1x128xf32, #tpu.memory_space<vmem>>, vector<1x128xf32>
    %5 = vector.broadcast %4 : vector<1x128xf32> to vector<512x128xf32>
    %6 = arith.addf %3, %5 : vector<512x128xf32>
    %cst = arith.constant 5.000000e-01 : f32
    %7 = vector.broadcast %cst : f32 to vector<512x128xf32>
    %8 = arith.mulf %7, %6 : vector<512x128xf32>
    %cst_5 = arith.constant 0.707106769 : f32
    %9 = vector.broadcast %cst_5 : f32 to vector<512x128xf32>
    %10 = arith.mulf %6, %9 : vector<512x128xf32>
    %11 = math.erf %10 : vector<512x128xf32>
    %cst_6 = arith.constant 1.000000e+00 : f32
    %12 = vector.broadcast %cst_6 : f32 to vector<512x128xf32>
    %13 = arith.addf %12, %11 : vector<512x128xf32>
    %14 = arith.mulf %8, %13 : vector<512x128xf32>
    %c0_7 = arith.constant 0 : index
    %c0_8 = arith.constant 0 : index
    %15 = vector.load %arg4[%c0_7, %c0_8] : memref<512x128xf32, #tpu.memory_space<vmem>>, vector<512x128xf32>
    tpu.vector_store %arg4[%c0_7, %c0_8], %14 {strides = array<i32>} : memref<512x128xf32, #tpu.memory_space<vmem>>, vector<512x128xf32>,
    return
  }
  func.func @transform_0(%arg0: i32) -> (i32, i32) {
    %c0_i32 = arith.constant 0 : i32
    %c0_i32_0 = arith.constant 0 : i32
    return %arg0, %c0_i32 : i32, i32
  }
  func.func @transform_1(%arg0: i32) -> (i32, i32) {
    %c0_i32 = arith.constant 0 : i32
    %c0_i32_0 = arith.constant 0 : i32
    %c0_i32_1 = arith.constant 0 : i32
    return %c0_i32, %c0_i32_0 : i32, i32
  }
  func.func @transform_2(%arg0: i32) -> (i32, i32) {
    %c0_i32 = arith.constant 0 : i32
    %c0_i32_0 = arith.constant 0 : i32
    %c0_i32_1 = arith.constant 0 : i32
    return %c0_i32, %c0_i32_0 : i32, i32
  }
  func.func @transform_3(%arg0: i32) -> (i32, i32) {
    %c0_i32 = arith.constant 0 : i32
    %c0_i32_0 = arith.constant 0 : i32
    return %arg0, %c0_i32 : i32, i32
  }
}

</mosaic_0001>

<bundles_post_ra>
// kernel: a_call__.3
= control target key start
LH: loop header
LB: loop body
LE: loop exit
PB: predicated region body
PF: predicated region fallthrough
CT: control target
= control target key end

     0   :  { %s6396_s0 = inlined_call_operand.vmem [shape: f32[512,128], index: 0, kind: input, shape index: {}, may-alias: {0,3}]   ;;  %s6397_s1 = inlined_call_operand.vmem [shape: f32[1,128], index: 1, kind: input, shape index: {}]   ;;  %s6398_s2 = inlined_call_operand.vmem [shape: f32[1,128], index: 2, kind: input, shape index: {}]   ;;  %s6399_s3 = inlined_call_operand.vmem [shape: f32[512,128], index: 3, kind: output, shape index: {}, may-alias: {0,3}]  }
   0x1   :  { %v14_v0 = vld [vmem:[%s6396_s0] sm:$0xff]  ;;  %v15_v3 = vld [vmem:[%s6396_s0 + $0x8] sm:$0xff]  ;;  %v16_v6 = vld [vmem:[%s6396_s0 + $0x10] sm:$0xff] }
   0x2   :  { %v3328_v1 = vld [vmem:[%s6397_s1] ss:$0 sm:$0xff]  ;;  %v17_v7 = vld [vmem:[%s6396_s0 + $0x18] sm:$0xff]  ;;  %v19_v18 = vld [vmem:[%s6396_s0 + $0x28] sm:$0xff] }
   0x3   :  { %v3333_v2 = vld [vmem:[%s6398_s2] ss:$0 sm:$0xff]  ;;  %v82_v4 = vmul.f32 %v3328_v1, %v14_v0  ;;  %v83_v5 = vmul.f32 %v3328_v1, %v15_v3  ;;  %v84_v9 = vmul.f32 %v3328_v1, %v16_v6  ;;  %v85_v10 = vmul.f32 %v3328_v1, %v17_v7  ;;  %v20_v0 = vld [vmem:[%s6396_s0 + $0x30] sm:$0xff] }
   0x4   :  { %v18_v8 = vld [vmem:[%s6396_s0 + $0x20] sm:$0xff]  ;;  %v87_v26 = vmul.f32 %v3328_v1, %v19_v18 }
   0x5   :  { %v86_v11 = vmul.f32 %v3328_v1, %v18_v8  ;;  %v150_v12 = vadd.f32 %v3333_v2, %v82_v4  ;;  %v3354_v13 = vadd.f32 %v3333_v2, %v83_v5  ;;  %v3357_v14 = vadd.f32 %v3333_v2, %v84_v9 }
   0x6   :  { %v3360_v15 = vadd.f32 %v3333_v2, %v85_v10  ;;  %v3408_v39 = vadd.f32 %v3333_v2, %v87_v26 }
   0x7   :  { %v3362_v16 = vmul.f32 0.70710677, %v150_v12  ;;  %v3365_v17 = vmul.f32 0.70710677, %v3354_v13  ;;  %v3371_v19 = vmul.f32 0.70710677, %v3357_v14  ;;  %v3377_v21 = vadd.f32 %v3333_v2, %v86_v11 }
   0x8   :  { %v3374_v20 = vmul.f32 0.70710677, %v3360_v15  ;;  %v3392_v29 = vmul.f32 0.5, %v150_v12  ;;  %v3418_v53 = vmul.f32 0.70710677, %v3408_v39 }
   0x9   :  { %v342_v22 = vmul.f32 %v3362_v16, %v3362_v16  ;;  %v382_v23 = vmul.f32 %v3365_v17, %v3365_v17  ;;  %v422_v24 = vmul.f32 %v3371_v19, %v3371_v19  ;;  %v3399_v32 = vmul.f32 0.70710677, %v3377_v21 }
   0xa   :  { %v462_v25 = vmul.f32 %v3374_v20, %v3374_v20 }
   0xb   :  { %v3388_v27 = vmin.f32 %v342_v22, 16.0  ;;  %v3390_v28 = vmin.f32 %v382_v23, 16.0  ;;  %v3394_v30 = vmin.f32 %v422_v24, 16.0  ;;  %v502_v18 = vmul.f32 %v3399_v32, %v3399_v32 }
   0xc   :  { %v3396_v31 = vmin.f32 %v462_v25, 16.0  ;;  %v88_v22 = vmul.f32 %v3328_v1, %v20_v0 }
   0xd   :  { %v344_v33 = vmul.f32 2.1237322e-06, %v3388_v27  ;;  %v355_v34 = vmul.f32 3.8918573e-05, %v3388_v27  ;;  %v384_v35 = vmul.f32 2.1237322e-06, %v3390_v28 }
   0xe   :  { %v395_v36 = vmul.f32 3.8918573e-05, %v3390_v28  ;;  %v424_v37 = vmul.f32 2.1237322e-06, %v3394_v30  ;;  %v435_v38 = vmul.f32 3.8918573e-05, %v3394_v30 }
   0xf   :  { %v345_v40 = vadd.f32 0.00028619796, %v344_v33  ;;  %v356_v41 = vadd.f32 0.001143296, %v355_v34  ;;  %v385_v42 = vadd.f32 0.00028619796, %v384_v35 }
  0x10   :  { %v396_v43 = vadd.f32 0.001143296, %v395_v36  ;;  %v425_v44 = vadd.f32 0.00028619796, %v424_v37  ;;  %v436_v45 = vadd.f32 0.001143296, %v435_v38 }
  0x11   :  { %v346_v46 = vmul.f32 %v345_v40, %v3388_v27  ;;  %v357_v47 = vmul.f32 %v356_v41, %v3388_v27  ;;  %v386_v48 = vmul.f32 %v385_v42, %v3390_v28  ;;  %v464_v49 = vmul.f32 2.1237322e-06, %v3396_v31 }
  0x12   :  { %v397_v50 = vmul.f32 %v396_v43, %v3390_v28  ;;  %v426_v51 = vmul.f32 %v425_v44, %v3394_v30  ;;  %v437_v52 = vmul.f32 %v436_v45, %v3394_v30  ;;  %v475_v6 = vmul.f32 3.8918573e-05, %v3396_v31 }
  0x13   :  { %v347_v54 = vadd.f32 0.0036580483, %v346_v46  ;;  %v358_v55 = vadd.f32 0.014752088, %v357_v47  ;;  %v387_v56 = vadd.f32 0.0036580483, %v386_v48  ;;  %v542_v45 = vmul.f32 %v3418_v53, %v3418_v53 }
  0x14   :  { %v398_v57 = vadd.f32 0.014752088, %v397_v50  ;;  %v427_v58 = vadd.f32 0.0036580483, %v426_v51  ;;  %v438_v59 = vadd.f32 0.014752088, %v437_v52 }
  0x15   :  { %v348_v60 = vmul.f32 %v347_v54, %v3388_v27  ;;  %v359_v61 = vmul.f32 %v358_v55, %v3388_v27  ;;  %v388_v62 = vmul.f32 %v387_v56, %v3390_v28  ;;  %v465_v63 = vadd.f32 0.00028619796, %v464_v49 }
  0x16   :  { %v399_v3 = vmul.f32 %v398_v57, %v3390_v28  ;;  %v428_v4 = vmul.f32 %v427_v58, %v3394_v30  ;;  %v439_v5 = vmul.f32 %v438_v59, %v3394_v30  ;;  %v476_v36 = vadd.f32 0.001143296, %v475_v6 }
  0x17   :  { %v349_v7 = vadd.f32 0.05243302, %v348_v60  ;;  %v360_v8 = vadd.f32 0.112945676, %v359_v61  ;;  %v389_v9 = vadd.f32 0.05243302, %v388_v62  ;;  %v466_v10 = vmul.f32 %v465_v63, %v3396_v31 }
  0x18   :  { %v400_v11 = vadd.f32 0.112945676, %v399_v3  ;;  %v429_v12 = vadd.f32 0.05243302, %v428_v4  ;;  %v440_v26 = vadd.f32 0.112945676, %v439_v5  ;;  %v477_v52 = vmul.f32 %v476_v36, %v3396_v31 }
  0x19   :  { %v350_v23 = vmul.f32 %v349_v7, %v3388_v27  ;;  %v361_v24 = vmul.f32 %v360_v8, %v3388_v27  ;;  %v390_v25 = vmul.f32 %v389_v9, %v3390_v28  ;;  %v467_v35 = vadd.f32 0.0036580483, %v466_v10 }
  0x1a   :  { %v401_v33 = vmul.f32 %v400_v11, %v3390_v28  ;;  %v430_v34 = vmul.f32 %v429_v12, %v3394_v30  ;;  %v441_v41 = vmul.f32 %v440_v26, %v3394_v30  ;;  %v3448_v54 = vmin.f32 %v502_v18, 16.0 }
  0x1b   :  { %v351_v37 = vadd.f32 0.18741608, %v350_v23  ;;  %v362_v38 = vadd.f32 0.4994258, %v361_v24  ;;  %v391_v40 = vadd.f32 0.18741608, %v390_v25  ;;  %v468_v44 = vmul.f32 %v467_v35, %v3396_v31 }
  0x1c   :  { %v402_v42 = vadd.f32 0.4994258, %v401_v33  ;;  %v431_v43 = vadd.f32 0.18741608, %v430_v34  ;;  %v442_v49 = vadd.f32 0.4994258, %v441_v41  ;;  %v3452_v58 = vadd.f32 %v3333_v2, %v88_v22 }
  0x1d   :  { %v352_v46 = vmul.f32 %v351_v37, %v3388_v27  ;;  %v363_v47 = vmul.f32 %v362_v38, %v3388_v27  ;;  %v392_v48 = vmul.f32 %v391_v40, %v3390_v28  ;;  %v469_v51 = vadd.f32 0.05243302, %v468_v44 }
  0x1e   :  { %v403_v50 = vmul.f32 %v402_v42, %v3390_v28  ;;  %v432_v57 = vmul.f32 %v431_v43, %v3394_v30  ;;  %v443_v27 = vmul.f32 %v442_v49, %v3394_v30  ;;  %v478_v61 = vadd.f32 0.014752088, %v477_v52 }
  0x1f   :  { %v353_v55 = vadd.f32 1.1283791, %v352_v46  ;;  %v364_v56 = vadd.f32 1.0, %v363_v47  ;;  %v470_v60 = vmul.f32 %v469_v51, %v3396_v31  ;;  %v3459_v28 = vmul.f32 0.5, %v3354_v13 }
  0x20   :  { %v3454_v59 = vadd.f32 1.0, %v403_v50  ;;  %v393_v62 = vadd.f32 1.1283791, %v392_v48  ;;  %v3462_v63 = vmul.f32 0.5, %v3357_v14  ;;  %v3465_v4 = vmin.f32 %v542_v45, 16.0 }
  0x21   :  { %3164 = vrcp.f32 %v364_v56  ;;  %v374_v0 = vand.u32 2147483647, %v364_v56  ;;  %v376_v3 = vand.u32 2147483648, %v364_v56  ;;  %v433_v6 = vadd.f32 1.1283791, %v432_v57 }
  0x22   :  { %3166 = vrcp.f32 %v3454_v59  ;;  %v414_v5 = vand.u32 2147483647, %v3454_v59  ;;  %v416_v30 = vand.u32 2147483648, %v3454_v59  ;;  %v3470_v7 = vmul.f32 0.5, %v3360_v15 }
  0x23   :  { %v3473_v13 = vmul.f32 %v353_v55, %v3362_v16  ;;  %v3475_v8 = vadd.f32 1.0, %v443_v27  ;;  %v471_v14 = vadd.f32 0.18741608, %v470_v60  ;;  %v479_v9 = vmul.f32 %v478_v61, %v3396_v31 }
  0x24   :  { %vm370_vm0 = vweird.f32 %v364_v56  ;;  %v3479_v10 = vmul.f32 %v393_v62, %v3365_v17  ;;  %vm410_vm1 = vweird.f32 %v3454_v59  ;;  %v504_v11 = vmul.f32 2.1237322e-06, %v3448_v54 }
  0x25   :  { %vm3483_vm2 = vcmp.eq.f32.partialorder %v374_v0, 8.507059e+37  ;;  %v377_v15 = vor.u32 1.1754944e-38, %v376_v3  ;;  %v417_v16 = vor.u32 1.1754944e-38, %v416_v30  ;;  %3168 = vrcp.f32 %v3475_v8 }
  0x26   :  { %v515_v18 = vmul.f32 3.8918573e-05, %v3448_v54  ;;  %vm3489_vm3 = vcmp.eq.f32.partialorder %v414_v5, 8.507059e+37  ;;  %v3494_v17 = vmul.f32 %v433_v6, %v3371_v19  ;;  %v454_v24 = vand.u32 2147483647, %v3475_v8 }
  0x27   :  { %v3165_v22 = vpop.eup %3164  ;;  %v480_v25 = vadd.f32 0.112945676, %v479_v9  ;;  %v505_v26 = vadd.f32 0.00028619796, %v504_v11  ;;  %vm450_vm4 = vweird.f32 %v3475_v8  ;;  %v456_v35 = vand.u32 2147483648, %v3475_v8 }
  0x28   :  { %v3167_v33 = vpop.eup %3166  ;;  %v366_v34 = vmul.f32 %v3165_v22, %v364_v56  ;;  %v472_v36 = vmul.f32 %v471_v14, %v3396_v31  ;;  %vm371_vm5 = vweird.f32 %v3165_v22  ;;  %v3503_v19 = vmul.f32 0.5, %v3377_v21 }
  0x29   :  { %v406_v37 = vmul.f32 %v3167_v33, %v3454_v59  ;;  %v481_v38 = vmul.f32 %v480_v25, %v3396_v31  ;;  %v506_v41 = vmul.f32 %v505_v26, %v3448_v54  ;;  %v516_v42 = vadd.f32 0.001143296, %v515_v18  ;;  %vm3514_vm8 = vmor %vm370_vm0, %vm371_vm5 }
  0x2a   :  { %v367_v40 = vsub.f32 1.0, %v366_v34  ;;  %v544_v43 = vmul.f32 2.1237322e-06, %v3465_v4  ;;  %vm411_vm6 = vweird.f32 %v3167_v33  ;;  %vm3507_vm7 = vcmp.eq.f32.partialorder %v454_v24, 8.507059e+37 }
  0x2b   :  { %v407_v44 = vsub.f32 1.0, %v406_v37  ;;  %v482_v46 = vadd.f32 0.4994258, %v481_v38  ;;  %v3169_v47 = vpop.eup %3168  ;;  %v507_v49 = vadd.f32 0.0036580483, %v506_v41  ;;  %v517_v50 = vmul.f32 %v516_v42, %v3448_v54  ;;  %vm3523_vm9 = vmor %vm410_vm1, %vm411_vm6 }
  0x2c   :  { %v368_v48 = vmul.f32 %v3165_v22, %v367_v40  ;;  %v545_v21 = vadd.f32 0.00028619796, %v544_v43  ;;  %v446_v55 = vmul.f32 %v3169_v47, %v3475_v8  ;;  %v555_v27 = vmul.f32 3.8918573e-05, %v3465_v4 }
  0x2d   :  { %v408_v52 = vmul.f32 %v3167_v33, %v407_v44  ;;  %v483_v57 = vmul.f32 %v482_v46, %v3396_v31  ;;  %v508_v56 = vmul.f32 %v507_v49, %v3448_v54  ;;  %v518_v62 = vadd.f32 0.014752088, %v517_v50 }
  0x2e   :  { %v369_v60 = vadd.f32 %v3165_v22, %v368_v48  ;;  %v546_v0 = vmul.f32 %v545_v21, %v3465_v4  ;;  %v447_v5 = vsub.f32 1.0, %v446_v55  ;;  %vm451_vm10 = vweird.f32 %v3169_v47  ;;  %v21_v21 = vld [vmem:[%s6396_s0 + $0x38] sm:$0xff] }
  0x2f   :  { %v409_v3 = vadd.f32 %v3167_v33, %v408_v52  ;;  %v3529_v30 = vadd.f32 1.0, %v483_v57  ;;  %v473_v6 = vadd.f32 1.1283791, %v472_v36  ;;  %v509_v14 = vadd.f32 0.05243302, %v508_v56  ;;  %vm3544_vm11 = vmor %vm450_vm4, %vm451_vm10 }
  0x30   :  { %v373_v31 = vsel %vm3514_vm8, %v3165_v22, %v369_v60  ;;  %v519_v59 = vmul.f32 %v518_v62, %v3448_v54  ;;  %v448_v18 = vmul.f32 %v3169_v47, %v447_v5  ;;  %v457_v26 = vor.u32 1.1754944e-38, %v456_v35 }
  0x31   :  { %v378_v9 = vsel %vm3483_vm2, %v377_v15, %v373_v31  ;;  %v413_v11 = vsel %vm3523_vm9, %v3167_v33, %v409_v3  ;;  %3170 = vrcp.f32 %v3529_v30  ;;  %v547_v12 = vadd.f32 0.0036580483, %v546_v0 }
  0x32   :  { %v379_v24 = vmul.f32 %v378_v9, %v3473_v13  ;;  %v418_v25 = vsel %vm3489_vm3, %v417_v16, %v413_v11  ;;  %v449_v34 = vadd.f32 %v3169_v47, %v448_v18  ;;  %v510_v33 = vmul.f32 %v509_v14, %v3448_v54 }
  0x33   :  { %v419_v15 = vmul.f32 %v418_v25, %v3479_v10  ;;  %v556_v36 = vadd.f32 0.001143296, %v555_v27  ;;  %v3551_v13 = vmul.f32 %v473_v6, %v3374_v20  ;;  %vm490_vm12 = vweird.f32 %v3529_v30 }
  0x34   :  { %v3098_v37 = vclamps-f32 %v379_v24, 1.0  ;;  %v520_v16 = vadd.f32 0.112945676, %v519_v59  ;;  %v453_v23 = vsel %vm3544_vm11, %v3169_v47, %v449_v34  ;;  %v494_v35 = vand.u32 2147483647, %v3529_v30 }
  0x35   :  { %v3099_v8 = vclamps-f32 %v419_v15, 1.0  ;;  %v511_v38 = vadd.f32 0.18741608, %v510_v33  ;;  %v458_v10 = vsel %vm3507_vm7, %v457_v26, %v453_v23  ;;  %v548_v42 = vmul.f32 %v547_v12, %v3465_v4 }
  0x36   :  { %v2902_v40 = vadd.f32 1.0, %v3098_v37  ;;  %v521_v41 = vmul.f32 %v520_v16, %v3448_v54  ;;  %v459_v44 = vmul.f32 %v458_v10, %v3494_v17  ;;  %v557_v48 = vmul.f32 %v556_v36, %v3465_v4 }
  0x37   :  { %v3171_v20 = vpop.eup %3170  ;;  %v2903_v43 = vadd.f32 1.0, %v3099_v8  ;;  %v512_v46 = vmul.f32 %v511_v38, %v3448_v54  ;;  %v496_v50 = vand.u32 2147483648, %v3529_v30  ;;  %v549_v17 = vadd.f32 0.05243302, %v548_v42 }
  0x38   :  { %v2966_v47 = vmul.f32 %v2902_v40, %v3392_v29  ;;  %v486_v49 = vmul.f32 %v3171_v20, %v3529_v30  ;;  %v522_v45 = vadd.f32 0.4994258, %v521_v41  ;;  %v3100_v52 = vclamps-f32 %v459_v44, 1.0 }
  0x39   :  { %v2967_v51 = vmul.f32 %v2903_v43, %v3459_v28  ;;  %vm491_vm13 = vweird.f32 %v3171_v20  ;;  %v558_v57 = vadd.f32 0.014752088, %v557_v48  ;;  %v3576_v27 = vmul.f32 0.70710677, %v3452_v58 }
  0x3a   :  { %3030 = vst [vmem:[%s6399_s3] sm:$0xff] %v2966_v47  ;;  %v487_v55 = vsub.f32 1.0, %v486_v49  ;;  %v523_v29 = vmul.f32 %v522_v45, %v3448_v54  ;;  %v2904_v60 = vadd.f32 1.0, %v3100_v52  ;;  %v513_v28 = vadd.f32 1.1283791, %v512_v46  ;;  %vm3593_vm14 = vmor %vm490_vm12, %vm491_vm13 }
  0x3b   :  { %3031 = vst [vmem:[%s6399_s3 + $0x8] sm:$0xff] %v2967_v51  ;;  %v550_v61 = vmul.f32 %v549_v17, %v3465_v4  ;;  %v89_v56 = vmul.f32 %v3328_v1, %v21_v21  ;;  %v559_v3 = vmul.f32 %v558_v57, %v3465_v4  ;;  %v582_v54 = vmul.f32 %v3576_v27, %v3576_v27 }
  0x3c   :  { %v488_v62 = vmul.f32 %v3171_v20, %v487_v55  ;;  %v524_v0 = vadd.f32 1.0, %v523_v29  ;;  %v2968_v31 = vmul.f32 %v2904_v60, %v3462_v63  ;;  %v497_v14 = vor.u32 1.1754944e-38, %v496_v50 }
  0x3d   :  { %v551_v59 = vadd.f32 0.18741608, %v550_v61  ;;  %v3598_v9 = vadd.f32 %v3333_v2, %v89_v56  ;;  %vm495_vm15 = vcmp.eq.f32.partialorder %v494_v35, 8.507059e+37  ;;  %v3601_v18 = vmul.f32 0.5, %v3408_v39 }
  0x3e   :  { %v489_v11 = vadd.f32 %v3171_v20, %v488_v62  ;;  %3172 = vrcp.f32 %v524_v0  ;;  %v3607_v63 = vmul.f32 %v513_v28, %v3399_v32  ;;  %v534_v30 = vand.u32 2147483647, %v524_v0 }
  0x3f   :  { %v560_v24 = vadd.f32 0.112945676, %v559_v3  ;;  %vm530_vm0 = vweird.f32 %v524_v0  ;;  %v3612_v26 = vmin.f32 %v582_v54, 16.0  ;;  %v3615_v39 = vmul.f32 0.70710677, %v3598_v9 }
  0x40   :  { %v493_v22 = vsel %vm3593_vm14, %v3171_v20, %v489_v11  ;;  %v536_v15 = vand.u32 2147483648, %v524_v0  ;;  %v552_v34 = vmul.f32 %v551_v59, %v3465_v4  ;;  %vm3624_vm1 = vcmp.eq.f32.partialorder %v534_v30, 8.507059e+37 }
  0x41   :  { %v498_v12 = vsel %vm495_vm15, %v497_v14, %v493_v22  ;;  %v561_v32 = vmul.f32 %v560_v24, %v3465_v4  ;;  %v584_v36 = vmul.f32 2.1237322e-06, %v3612_v26  ;;  %v595_v37 = vmul.f32 3.8918573e-05, %v3612_v26 }
  0x42   :  { %v22_v5 = vld [vmem:[%s6396_s0 + $0x40] sm:$0xff]  ;;  %v499_v33 = vmul.f32 %v498_v12, %v3551_v13  ;;  %v622_v16 = vmul.f32 %v3615_v39, %v3615_v39  ;;  %v3629_v35 = vmul.f32 0.5, %v3452_v58  ;;  %v537_v57 = vor.u32 1.1754944e-38, %v536_v15 }
  0x43   :  { %3032 = vst [vmem:[%s6399_s3 + $0x10] sm:$0xff] %v2968_v31  ;;  %v90_v25 = vmul.f32 %v3328_v1, %v22_v5  ;;  %v562_v23 = vadd.f32 0.4994258, %v561_v32  ;;  %v585_v10 = vadd.f32 0.00028619796, %v584_v36 }
  0x44   :  { %v3173_v40 = vpop.eup %3172  ;;  %v3101_v13 = vclamps-f32 %v499_v33, 1.0  ;;  %v596_v41 = vadd.f32 0.001143296, %v595_v37  ;;  %v3634_v42 = vmin.f32 %v622_v16, 16.0  ;;  %v553_v60 = vadd.f32 1.1283791, %v552_v34 }
  0x45   :  { %v3632_v38 = vadd.f32 %v3333_v2, %v90_v25  ;;  %v526_v20 = vmul.f32 %v3173_v40, %v524_v0  ;;  %vm531_vm2 = vweird.f32 %v3173_v40  ;;  %v563_v43 = vmul.f32 %v562_v23, %v3465_v4 }
  0x46   :  { %v2905_v46 = vadd.f32 1.0, %v3101_v13  ;;  %v586_v58 = vmul.f32 %v585_v10, %v3612_v26  ;;  %v597_v48 = vmul.f32 %v596_v41, %v3612_v26  ;;  %v624_v47 = vmul.f32 2.1237322e-06, %v3634_v42  ;;  %vm3658_vm3 = vmor %vm530_vm0, %vm531_vm2 }
  0x47   :  { %v3638_v44 = vmul.f32 0.70710677, %v3632_v38  ;;  %v527_v49 = vsub.f32 1.0, %v526_v20  ;;  %v3643_v50 = vadd.f32 1.0, %v563_v43  ;;  %v635_v45 = vmul.f32 3.8918573e-05, %v3634_v42 }
  0x48   :  { %v2969_v51 = vmul.f32 %v2905_v46, %v3470_v7  ;;  %v587_v52 = vadd.f32 0.0036580483, %v586_v58  ;;  %v598_v17 = vadd.f32 0.014752088, %v597_v48  ;;  %v625_v55 = vadd.f32 0.00028619796, %v624_v47 }
  0x49   :  { %v662_v21 = vmul.f32 %v3638_v44, %v3638_v44  ;;  %v528_v29 = vmul.f32 %v3173_v40, %v527_v49  ;;  %3174 = vrcp.f32 %v3643_v50  ;;  %v576_v7 = vand.u32 2147483648, %v3643_v50 }
  0x4a   :  { %v23_v4 = vld [vmem:[%s6396_s0 + $0x48] sm:$0xff]  ;;  %v588_v61 = vmul.f32 %v587_v52, %v3612_v26  ;;  %v599_v56 = vmul.f32 %v598_v17, %v3612_v26  ;;  %v626_v62 = vmul.f32 %v625_v55, %v3634_v42  ;;  %v636_v54 = vadd.f32 0.001143296, %v635_v45 }
  0x4b   :  { %3033 = vst [vmem:[%s6399_s3 + $0x18] sm:$0xff] %v2969_v51  ;;  %v529_v3 = vadd.f32 %v3173_v40, %v528_v29  ;;  %v3666_v5 = vmin.f32 %v662_v21, 16.0  ;;  %v91_v31 = vmul.f32 %v3328_v1, %v23_v4  ;;  %vm570_vm4 = vweird.f32 %v3643_v50 }
  0x4c   :  { %v574_v0 = vand.u32 2147483647, %v3643_v50  ;;  %v589_v6 = vadd.f32 0.05243302, %v588_v61  ;;  %v600_v14 = vadd.f32 0.112945676, %v599_v56  ;;  %v637_v30 = vmul.f32 %v636_v54, %v3634_v42 }
  0x4d   :  { %v533_v59 = vsel %vm3658_vm3, %v3173_v40, %v529_v3  ;;  %v627_v11 = vadd.f32 0.0036580483, %v626_v62  ;;  %v664_v24 = vmul.f32 2.1237322e-06, %v3666_v5  ;;  %v577_v22 = vor.u32 1.1754944e-38, %v576_v7 }
  0x4e   :  { %v538_v25 = vsel %vm3624_vm1, %v537_v57, %v533_v59  ;;  %v590_v12 = vmul.f32 %v589_v6, %v3612_v26  ;;  %v601_v15 = vmul.f32 %v600_v14, %v3612_v26  ;;  %v638_v36 = vadd.f32 0.014752088, %v637_v30 }
  0x4f   :  { %v3175_v34 = vpop.eup %3174  ;;  %v539_v32 = vmul.f32 %v538_v25, %v3607_v63  ;;  %v628_v33 = vmul.f32 %v627_v11, %v3634_v42  ;;  %v665_v37 = vadd.f32 0.00028619796, %v664_v24  ;;  %v3683_v13 = vadd.f32 %v3333_v2, %v91_v31 }
  0x50   :  { %v566_v16 = vmul.f32 %v3175_v34, %v3643_v50  ;;  %v591_v23 = vadd.f32 0.18741608, %v590_v12  ;;  %v602_v40 = vadd.f32 0.4994258, %v601_v15  ;;  %v639_v41 = vmul.f32 %v638_v36, %v3634_v42 }
  0x51   :  { %v3102_v8 = vclamps-f32 %v539_v32, 1.0  ;;  %v629_v10 = vadd.f32 0.05243302, %v628_v33  ;;  %v666_v20 = vmul.f32 %v665_v37, %v3666_v5  ;;  %vm571_vm5 = vweird.f32 %v3175_v34 }
  0x52   :  { %v567_v43 = vsub.f32 1.0, %v566_v16  ;;  %v592_v63 = vmul.f32 %v591_v23, %v3612_v26  ;;  %v603_v46 = vmul.f32 %v602_v40, %v3612_v26  ;;  %v640_v47 = vadd.f32 0.112945676, %v639_v41  ;;  %vm3694_vm6 = vmor %vm570_vm4, %vm571_vm5 }
  0x53   :  { %v2906_v58 = vadd.f32 1.0, %v3102_v8  ;;  %v630_v48 = vmul.f32 %v629_v10, %v3634_v42  ;;  %v667_v49 = vadd.f32 0.0036580483, %v666_v20  ;;  %v675_v51 = vmul.f32 3.8918573e-05, %v3666_v5 }
  0x54   :  { %v568_v45 = vmul.f32 %v3175_v34, %v567_v43  ;;  %v593_v21 = vadd.f32 1.1283791, %v592_v63  ;;  %v604_v4 = vadd.f32 1.0, %v603_v46  ;;  %v641_v26 = vmul.f32 %v640_v47, %v3634_v42 }
  0x55   :  { %v2970_v52 = vmul.f32 %v2906_v58, %v3503_v19  ;;  %v631_v55 = vadd.f32 0.18741608, %v630_v48  ;;  %v668_v29 = vmul.f32 %v667_v49, %v3666_v5  ;;  %v554_v57 = vmul.f32 %v553_v60, %v3418_v53  ;;  %v24_v19 = vld [vmem:[%s6396_s0 + $0x50] sm:$0xff] }
  0x56   :  { %v569_v28 = vadd.f32 %v3175_v34, %v568_v45  ;;  %vm575_vm7 = vcmp.eq.f32.partialorder %v574_v0, 8.507059e+37  ;;  %3176 = vrcp.f32 %v604_v4  ;;  %v614_v50 = vand.u32 2147483647, %v604_v4 }
  0x57   :  { %3034 = vst [vmem:[%s6399_s3 + $0x20] sm:$0xff] %v2970_v52  ;;  %v3708_v7 = vmul.f32 0.5, %v3598_v9  ;;  %v642_v61 = vadd.f32 0.4994258, %v641_v26  ;;  %v669_v53 = vadd.f32 0.05243302, %v668_v29  ;;  %v594_v54 = vmul.f32 %v593_v21, %v3576_v27 }
  0x58   :  { %v573_v56 = vsel %vm3694_vm6, %v3175_v34, %v569_v28  ;;  %v676_v60 = vadd.f32 0.001143296, %v675_v51  ;;  %v3713_v62 = vmul.f32 0.70710677, %v3683_v13  ;;  %v632_v31 = vmul.f32 %v631_v55, %v3634_v42 }
  0x59   :  { %v578_v3 = vsel %vm575_vm7, %v577_v22, %v573_v56  ;;  %v3718_v0 = vmul.f32 0.5, %v3632_v38  ;;  %v643_v9 = vmul.f32 %v642_v61, %v3634_v42  ;;  %v670_v14 = vmul.f32 %v669_v53, %v3666_v5 }
  0x5a   :  { %v579_v6 = vmul.f32 %v578_v3, %v554_v57  ;;  %v677_v59 = vmul.f32 %v676_v60, %v3666_v5  ;;  %vm610_vm8 = vweird.f32 %v604_v4  ;;  %v616_v30 = vand.u32 2147483648, %v604_v4 }
  0x5b   :  { %v702_v27 = vmul.f32 %v3713_v62, %v3713_v62  ;;  %v92_v24 = vmul.f32 %v3328_v1, %v24_v19  ;;  %vm3729_vm9 = vcmp.eq.f32.partialorder %v614_v50, 8.507059e+37  ;;  %v644_v42 = vadd.f32 1.0, %v643_v9 }
  0x5c   :  { %v3177_v38 = vpop.eup %3176  ;;  %v3103_v25 = vclamps-f32 %v579_v6, 1.0  ;;  %v678_v12 = vadd.f32 0.014752088, %v677_v59  ;;  %v633_v34 = vadd.f32 1.1283791, %v632_v31  ;;  %v617_v41 = vor.u32 1.1754944e-38, %v616_v30 }
  0x5d   :  { %v606_v15 = vmul.f32 %v3177_v38, %v604_v4  ;;  %v671_v32 = vadd.f32 0.18741608, %v670_v14  ;;  %vm611_vm10 = vweird.f32 %v3177_v38  ;;  %3178 = vrcp.f32 %v644_v42 }
  0x5e   :  { %v25_v11 = vld [vmem:[%s6396_s0 + $0x58] sm:$0xff]  ;;  %v2907_v36 = vadd.f32 1.0, %v3103_v25  ;;  %v3734_v37 = vmin.f32 %v702_v27, 16.0  ;;  %v654_v23 = vand.u32 2147483647, %v644_v42  ;;  %v679_v40 = vmul.f32 %v678_v12, %v3666_v5  ;;  %vm3748_vm12 = vmor %vm610_vm8, %vm611_vm10 }
  0x5f   :  { %v93_v33 = vmul.f32 %v3328_v1, %v25_v11  ;;  %v607_v16 = vsub.f32 1.0, %v606_v15  ;;  %v3738_v8 = vadd.f32 %v3333_v2, %v92_v24  ;;  %v656_v20 = vand.u32 2147483648, %v644_v42 }
  0x60   :  { %v2971_v10 = vmul.f32 %v2907_v36, %v3601_v18  ;;  %v704_v43 = vmul.f32 2.1237322e-06, %v3734_v37  ;;  %v634_v46 = vmul.f32 %v633_v34, %v3615_v39  ;;  %vm650_vm11 = vweird.f32 %v644_v42 }
  0x61   :  { %v608_v63 = vmul.f32 %v3177_v38, %v607_v16  ;;  %v680_v58 = vadd.f32 0.112945676, %v679_v40  ;;  %v672_v18 = vmul.f32 %v671_v32, %v3666_v5  ;;  %v715_v49 = vmul.f32 3.8918573e-05, %v3734_v37 }
  0x62   :  { %3035 = vst [vmem:[%s6399_s3 + $0x28] sm:$0xff] %v2971_v10  ;;  %v705_v47 = vadd.f32 0.00028619796, %v704_v43  ;;  %v3755_v45 = vadd.f32 %v3333_v2, %v93_v33  ;;  %vm3760_vm13 = vcmp.eq.f32.partialorder %v654_v23, 8.507059e+37  ;;  %v3766_v52 = vmul.f32 0.70710677, %v3738_v8 }
  0x63   :  { %v609_v21 = vadd.f32 %v3177_v38, %v608_v63  ;;  %v681_v4 = vmul.f32 %v680_v58, %v3666_v5  ;;  %v3179_v17 = vpop.eup %3178  ;;  %v657_v55 = vor.u32 1.1754944e-38, %v656_v20  ;;  %v716_v29 = vadd.f32 0.001143296, %v715_v49 }
  0x64   :  { %v706_v26 = vmul.f32 %v705_v47, %v3734_v37  ;;  %v3770_v57 = vmul.f32 0.70710677, %v3755_v45  ;;  %v646_v19 = vmul.f32 %v3179_v17, %v644_v42  ;;  %v742_v3 = vmul.f32 %v3766_v52, %v3766_v52 }
  0x65   :  { %v613_v28 = vsel %vm3748_vm12, %v3177_v38, %v609_v21  ;;  %v682_v50 = vadd.f32 0.4994258, %v681_v4  ;;  %v717_v60 = vmul.f32 %v716_v29, %v3734_v37  ;;  %vm651_vm14 = vweird.f32 %v3179_v17 }
  0x66   :  { %v618_v56 = vsel %vm3729_vm9, %v617_v41, %v613_v28  ;;  %v707_v53 = vadd.f32 0.0036580483, %v706_v26  ;;  %v647_v6 = vsub.f32 1.0, %v646_v19  ;;  %v3782_v11 = vmin.f32 %v742_v3, 16.0  ;;  %vm3790_vm15 = vmor %vm650_vm11, %vm651_vm14 }
  0x67   :  { %v619_v31 = vmul.f32 %v618_v56, %v594_v54  ;;  %v683_v9 = vmul.f32 %v682_v50, %v3666_v5  ;;  %v718_v59 = vadd.f32 0.014752088, %v717_v60  ;;  %v3798_v32 = vmul.f32 0.5, %v3683_v13 }
  0x68   :  { %v708_v14 = vmul.f32 %v707_v53, %v3734_v37  ;;  %v648_v27 = vmul.f32 %v3179_v17, %v647_v6  ;;  %v744_v22 = vmul.f32 2.1237322e-06, %v3782_v11  ;;  %v755_v12 = vmul.f32 3.8918573e-05, %v3782_v11 }
  0x69   :  { %v26_v39 = vld [vmem:[%s6396_s0 + $0x60] sm:$0xff]  ;;  %v3104_v30 = vclamps-f32 %v619_v31, 1.0  ;;  %v684_v24 = vadd.f32 1.0, %v683_v9  ;;  %v719_v25 = vmul.f32 %v718_v59, %v3734_v37 }
  0x6a   :  { %v94_v61 = vmul.f32 %v3328_v1, %v26_v39  ;;  %v782_v1 = vmul.f32 %v3770_v57, %v3770_v57  ;;  %v709_v5 = vadd.f32 0.05243302, %v708_v14  ;;  %v649_v34 = vadd.f32 %v3179_v17, %v648_v27 }
  0x6b   :  { %v2908_v15 = vadd.f32 1.0, %v3104_v30  ;;  %3180 = vrcp.f32 %v684_v24  ;;  %v720_v33 = vadd.f32 0.112945676, %v719_v25  ;;  %v745_v40 = vadd.f32 0.00028619796, %v744_v22 }
  0x6c   :  { %v3787_v38 = vadd.f32 %v3333_v2, %v94_v61  ;;  %v673_v2 = vadd.f32 1.1283791, %v672_v18  ;;  %v710_v42 = vmul.f32 %v709_v5, %v3734_v37  ;;  %v3801_v36 = vmin.f32 %v782_v1, 16.0 }
  0x6d   :  { %v2972_v16 = vmul.f32 %v2908_v15, %v3629_v35  ;;  %v653_v23 = vsel %vm3790_vm15, %v3179_v17, %v649_v34  ;;  %v756_v10 = vadd.f32 0.001143296, %v755_v12  ;;  %vm690_vm0 = vweird.f32 %v684_v24 }
  0x6e   :  { %v658_v41 = vsel %vm3760_vm13, %v657_v55, %v653_v23  ;;  %v711_v20 = vadd.f32 0.18741608, %v710_v42  ;;  %v3809_v13 = vmul.f32 0.70710677, %v3787_v38  ;;  %v694_v63 = vand.u32 2147483647, %v684_v24 }
  0x6f   :  { %3036 = vst [vmem:[%s6399_s3 + $0x30] sm:$0xff] %v2972_v16  ;;  %v659_v43 = vmul.f32 %v658_v41, %v634_v46  ;;  %v721_v35 = vmul.f32 %v720_v33, %v3734_v37  ;;  %v746_v58 = vmul.f32 %v745_v40, %v3782_v11  ;;  %v757_v18 = vmul.f32 %v756_v10, %v3782_v11 }
  0x70   :  { %v712_v48 = vmul.f32 %v711_v20, %v3734_v37  ;;  %v784_v47 = vmul.f32 2.1237322e-06, %v3801_v36  ;;  %v795_v49 = vmul.f32 3.8918573e-05, %v3801_v36  ;;  %v696_v51 = vand.u32 2147483648, %v684_v24 }
  0x71   :  { %v3181_v39 = vpop.eup %3180  ;;  %v3105_v21 = vclamps-f32 %v659_v43, 1.0  ;;  %v722_v4 = vadd.f32 0.4994258, %v721_v35  ;;  %v747_v17 = vadd.f32 0.0036580483, %v746_v58  ;;  %v822_v26 = vmul.f32 %v3809_v13, %v3809_v13 }
  0x72   :  { %v686_v55 = vmul.f32 %v3181_v39, %v684_v24  ;;  %vm691_vm1 = vweird.f32 %v3181_v39  ;;  %v758_v46 = vadd.f32 0.014752088, %v757_v18  ;;  %v785_v50 = vadd.f32 0.00028619796, %v784_v47 }
  0x73   :  { %v2909_v29 = vadd.f32 1.0, %v3105_v21  ;;  %v723_v28 = vmul.f32 %v722_v4, %v3734_v37  ;;  %v748_v19 = vmul.f32 %v747_v17, %v3782_v11  ;;  %v713_v56 = vadd.f32 1.1283791, %v712_v48  ;;  %vm3834_vm2 = vmor %vm690_vm0, %vm691_vm1  ;;  %v3868_v21 = vld [vmem:[%s6397_s1] ss:$0 sm:$0xff] }
  0x74   :  { %v687_v61 = vsub.f32 1.0, %v686_v55  ;;  %v759_v53 = vmul.f32 %v758_v46, %v3782_v11  ;;  %v796_v60 = vadd.f32 0.001143296, %v795_v49  ;;  %v786_v9 = vmul.f32 %v785_v50, %v3801_v36 }
  0x75   :  { %v2973_v3 = vmul.f32 %v2909_v29, %v3708_v7  ;;  %v724_v31 = vadd.f32 1.0, %v723_v28  ;;  %v749_v6 = vadd.f32 0.05243302, %v748_v19  ;;  %v674_v14 = vmul.f32 %v673_v2, %v3638_v44 }
  0x76   :  { %v688_v59 = vmul.f32 %v3181_v39, %v687_v61  ;;  %v760_v1 = vadd.f32 0.112945676, %v759_v53  ;;  %v797_v37 = vmul.f32 %v796_v60, %v3801_v36  ;;  %vm3838_vm3 = vcmp.eq.f32.partialorder %v694_v63, 8.507059e+37 }
  0x77   :  { %3037 = vst [vmem:[%s6399_s3 + $0x38] sm:$0xff] %v2973_v3  ;;  %v697_v27 = vor.u32 1.1754944e-38, %v696_v51  ;;  %3182 = vrcp.f32 %v724_v31  ;;  %v3843_v44 = vmul.f32 0.5, %v3738_v8  ;;  %v750_v5 = vmul.f32 %v749_v6, %v3782_v11 }
  0x78   :  { %v689_v54 = vadd.f32 %v3181_v39, %v688_v59  ;;  %v761_v25 = vmul.f32 %v760_v1, %v3782_v11  ;;  %v787_v22 = vadd.f32 0.0036580483, %v786_v9  ;;  %v3848_v24 = vmul.f32 %v713_v56, %v3713_v62 }
  0x79   :  { %v734_v12 = vand.u32 2147483647, %v724_v31  ;;  %v798_v15 = vadd.f32 0.014752088, %v797_v37  ;;  %v3850_v34 = vmin.f32 %v822_v26, 16.0  ;;  %vm730_vm4 = vweird.f32 %v724_v31 }
  0x7a   :  { %v693_v2 = vsel %vm3834_vm2, %v3181_v39, %v689_v54  ;;  %v751_v42 = vadd.f32 0.18741608, %v750_v5  ;;  %v762_v33 = vadd.f32 0.4994258, %v761_v25  ;;  %v788_v8 = vmul.f32 %v787_v22, %v3801_v36  ;;  %v3902_v37 = vld [vmem:[%s6398_s2] ss:$0 sm:$0xff] }
  0x7b   :  { %v698_v16 = vsel %vm3838_vm3, %v697_v27, %v693_v2  ;;  %v799_v23 = vmul.f32 %v798_v15, %v3801_v36  ;;  %v824_v40 = vmul.f32 2.1237322e-06, %v3850_v34  ;;  %v835_v62 = vmul.f32 3.8918573e-05, %v3850_v34 }
  0x7c   :  { %v699_v41 = vmul.f32 %v698_v16, %v674_v14  ;;  %v752_v20 = vmul.f32 %v751_v42, %v3782_v11  ;;  %v763_v43 = vmul.f32 %v762_v33, %v3782_v11  ;;  %v789_v63 = vadd.f32 0.05243302, %v788_v8 }
  0x7d   :  { %v3183_v35 = vpop.eup %3182  ;;  %v736_v58 = vand.u32 2147483648, %v724_v31  ;;  %v800_v48 = vadd.f32 0.112945676, %v799_v23  ;;  %v825_v18 = vadd.f32 0.00028619796, %v824_v40  ;;  %vm3874_vm6 = vcmp.eq.f32.partialorder %v734_v12, 8.507059e+37 }
  0x7e   :  { %v27_v10 = vld [vmem:[%s6396_s0 + $0x68] sm:$0xff]  ;;  %v3106_v47 = vclamps-f32 %v699_v41, 1.0  ;;  %v726_v49 = vmul.f32 %v3183_v35, %v724_v31  ;;  %v836_v39 = vadd.f32 0.001143296, %v835_v62  ;;  %v753_v4 = vadd.f32 1.1283791, %v752_v20 }
  0x7f   :  { %v95_v51 = vmul.f32 %v3868_v21, %v27_v10  ;;  %v764_v17 = vadd.f32 1.0, %v763_v43  ;;  %v790_v11 = vmul.f32 %v789_v63, %v3801_v36  ;;  %v801_v55 = vmul.f32 %v800_v48, %v3801_v36  ;;  %v28_v3 = vld [vmem:[%s6396_s0 + $0x70] sm:$0xff] }
  0x80   :  { %v2910_v46 = vadd.f32 1.0, %v3106_v47  ;;  %v727_v26 = vsub.f32 1.0, %v726_v49  ;;  %vm731_vm5 = vweird.f32 %v3183_v35  ;;  %v826_v29 = vmul.f32 %v825_v18, %v3850_v34 }
  0x81   :  { %v737_v19 = vor.u32 1.1754944e-38, %v736_v58  ;;  %3184 = vrcp.f32 %v764_v17  ;;  %v3879_v50 = vmul.f32 0.5, %v3755_v45  ;;  %v791_v53 = vadd.f32 0.18741608, %v790_v11  ;;  %vm3886_vm7 = vmor %vm730_vm4, %vm731_vm5 }
  0x82   :  { %v2974_v61 = vmul.f32 %v2910_v46, %v3718_v0  ;;  %v728_v56 = vmul.f32 %v3183_v35, %v727_v26  ;;  %v802_v60 = vadd.f32 0.4994258, %v801_v55  ;;  %v3891_v9 = vmul.f32 %v753_v4, %v3766_v52 }
  0x83   :  { %v774_v14 = vand.u32 2147483647, %v764_v17  ;;  %v827_v45 = vadd.f32 0.0036580483, %v826_v29  ;;  %v837_v59 = vmul.f32 %v836_v39, %v3850_v34  ;;  %v792_v1 = vmul.f32 %v791_v53, %v3801_v36 }
  0x84   :  { %3038 = vst [vmem:[%s6399_s3 + $0x40] sm:$0xff] %v2974_v61  ;;  %v729_v0 = vadd.f32 %v3183_v35, %v728_v56  ;;  %v803_v31 = vmul.f32 %v802_v60, %v3801_v36  ;;  %v3905_v52 = vadd.f32 %v3902_v37, %v95_v51  ;;  %v776_v30 = vand.u32 2147483648, %v764_v17 }
  0x85   :  { %v828_v7 = vmul.f32 %v827_v45, %v3850_v34  ;;  %v838_v27 = vadd.f32 0.014752088, %v837_v59  ;;  %v96_v54 = vmul.f32 %v3868_v21, %v28_v3  ;;  %v793_v25 = vadd.f32 1.1283791, %v792_v1 }
  0x86   :  { %v733_v5 = vsel %vm3886_vm7, %v3183_v35, %v729_v0  ;;  %v3911_v22 = vadd.f32 1.0, %v803_v31  ;;  %v3914_v36 = vmul.f32 0.70710677, %v3905_v52  ;;  %vm770_vm8 = vweird.f32 %v764_v17 }
  0x87   :  { %v3185_v15 = vpop.eup %3184  ;;  %v738_v2 = vsel %vm3874_vm6, %v737_v19, %v733_v5  ;;  %v829_v42 = vadd.f32 0.05243302, %v828_v7  ;;  %v839_v33 = vmul.f32 %v838_v27, %v3850_v34  ;;  %v3923_v8 = vadd.f32 %v3902_v37, %v96_v54 }
  0x88   :  { %v739_v16 = vmul.f32 %v738_v2, %v3848_v24  ;;  %v766_v23 = vmul.f32 %v3185_v15, %v764_v17  ;;  %vm3926_vm9 = vcmp.eq.f32.partialorder %v774_v14, 8.507059e+37  ;;  %vm771_vm10 = vweird.f32 %v3185_v15 }
  0x89   :  { %v777_v62 = vor.u32 1.1754944e-38, %v776_v30  ;;  %3186 = vrcp.f32 %v3911_v22  ;;  %v830_v43 = vmul.f32 %v829_v42, %v3850_v34  ;;  %v840_v63 = vadd.f32 0.112945676, %v839_v33  ;;  %vm3945_vm11 = vmor %vm770_vm8, %vm771_vm10 }
  0x8a   :  { %v3107_v41 = vclamps-f32 %v739_v16, 1.0  ;;  %v767_v20 = vsub.f32 1.0, %v766_v23  ;;  %v3934_v35 = vmul.f32 %v793_v25, %v3770_v57  ;;  %v814_v24 = vand.u32 2147483647, %v3911_v22 }
  0x8b   :  { %v29_v12 = vld [vmem:[%s6396_s0 + $0x78] sm:$0xff]  ;;  %v862_v58 = vmul.f32 %v3914_v36, %v3914_v36  ;;  %v3940_v48 = vmul.f32 0.70710677, %v3923_v8  ;;  %v831_v49 = vadd.f32 0.18741608, %v830_v43  ;;  %v841_v39 = vmul.f32 %v840_v63, %v3850_v34 }
  0x8c   :  { %v97_v10 = vmul.f32 %v3868_v21, %v29_v12  ;;  %v2911_v18 = vadd.f32 1.0, %v3107_v41  ;;  %v768_v47 = vmul.f32 %v3185_v15, %v767_v20  ;;  %vm810_vm12 = vweird.f32 %v3911_v22 }
  0x8d   :  { %v816_v57 = vand.u32 2147483648, %v3911_v22  ;;  %v3951_v4 = vmin.f32 %v862_v58, 16.0  ;;  %v902_v11 = vmul.f32 %v3940_v48, %v3940_v48  ;;  %v832_v26 = vmul.f32 %v831_v49, %v3850_v34 }
  0x8e   :  { %v2975_v55 = vmul.f32 %v2911_v18, %v3798_v32  ;;  %v769_v46 = vadd.f32 %v3185_v15, %v768_v47  ;;  %v842_v29 = vadd.f32 0.4994258, %v841_v39  ;;  %vm3957_vm13 = vcmp.eq.f32.partialorder %v814_v24, 8.507059e+37 }
  0x8f   :  { %v3187_v17 = vpop.eup %3186  ;;  %v864_v19 = vmul.f32 2.1237322e-06, %v3951_v4  ;;  %v875_v61 = vmul.f32 3.8918573e-05, %v3951_v4  ;;  %v3963_v56 = vmin.f32 %v902_v11, 16.0  ;;  %v3972_v3 = vadd.f32 %v3902_v37, %v97_v10 }
  0x90   :  { %3039 = vst [vmem:[%s6399_s3 + $0x48] sm:$0xff] %v2975_v55  ;;  %v773_v32 = vsel %vm3945_vm11, %v3185_v15, %v769_v46  ;;  %v806_v53 = vmul.f32 %v3187_v17, %v3911_v22  ;;  %v833_v60 = vadd.f32 1.1283791, %v832_v26  ;;  %v843_v14 = vmul.f32 %v842_v29, %v3850_v34 }
  0x91   :  { %v778_v6 = vsel %vm3926_vm9, %v777_v62, %v773_v32  ;;  %v865_v45 = vadd.f32 0.00028619796, %v864_v19  ;;  %v876_v59 = vadd.f32 0.001143296, %v875_v61  ;;  %vm811_vm14 = vweird.f32 %v3187_v17 }
  0x92   :  { %v779_v0 = vmul.f32 %v778_v6, %v3891_v9  ;;  %v807_v1 = vsub.f32 1.0, %v806_v53  ;;  %v904_v31 = vmul.f32 2.1237322e-06, %v3963_v56  ;;  %v3982_v7 = vadd.f32 1.0, %v843_v14  ;;  %vm3989_vm15 = vmor %vm810_vm12, %vm811_vm14 }
  0x93   :  { %v866_v27 = vmul.f32 %v865_v45, %v3951_v4  ;;  %v877_v54 = vmul.f32 %v876_v59, %v3951_v4  ;;  %v915_v34 = vmul.f32 3.8918573e-05, %v3963_v56  ;;  %v817_v12 = vor.u32 1.1754944e-38, %v816_v57 }
  0x94   :  { %v3108_v5 = vclamps-f32 %v779_v0, 1.0  ;;  %v808_v25 = vmul.f32 %v3187_v17, %v807_v1  ;;  %v905_v9 = vadd.f32 0.00028619796, %v904_v31  ;;  %v3994_v2 = vmul.f32 %v833_v60, %v3809_v13 }
  0x95   :  { %3188 = vrcp.f32 %v3982_v7  ;;  %v3998_v42 = vmul.f32 0.70710677, %v3972_v3  ;;  %v867_v40 = vadd.f32 0.0036580483, %v866_v27  ;;  %v878_v62 = vadd.f32 0.014752088, %v877_v54 }
  0x96   :  { %v2912_v16 = vadd.f32 1.0, %v3108_v5  ;;  %v809_v23 = vadd.f32 %v3187_v17, %v808_v25  ;;  %vm850_vm0 = vweird.f32 %v3982_v7  ;;  %v854_v22 = vand.u32 2147483647, %v3982_v7 }
  0x97   :  { %v30_v30 = vld [vmem:[%s6396_s0 + $0x80] sm:$0xff]  ;;  %v906_v10 = vmul.f32 %v905_v9, %v3963_v56  ;;  %v916_v41 = vadd.f32 0.001143296, %v915_v34  ;;  %v868_v43 = vmul.f32 %v867_v40, %v3951_v4  ;;  %v879_v63 = vmul.f32 %v878_v62, %v3951_v4 }
  0x98   :  { %v98_v33 = vmul.f32 %v3868_v21, %v30_v30  ;;  %v2976_v13 = vmul.f32 %v2912_v16, %v3843_v44  ;;  %v813_v20 = vsel %vm3989_vm15, %v3187_v17, %v809_v23  ;;  %v942_v47 = vmul.f32 %v3998_v42, %v3998_v42 }
  0x99   :  { %v818_v24 = vsel %vm3957_vm13, %v817_v12, %v813_v20  ;;  %v907_v58 = vadd.f32 0.0036580483, %v906_v10  ;;  %v917_v18 = vmul.f32 %v916_v41, %v3963_v56  ;;  %v856_v49 = vand.u32 2147483648, %v3982_v7 }
  0x9a   :  { %3040 = vst [vmem:[%s6399_s3 + $0x50] sm:$0xff] %v2976_v13  ;;  %v819_v44 = vmul.f32 %v818_v24, %v3934_v35  ;;  %v869_v39 = vadd.f32 0.05243302, %v868_v43  ;;  %v880_v51 = vadd.f32 0.112945676, %v879_v63  ;;  %v4020_v46 = vmin.f32 %v942_v47, 16.0 }
  0x9b   :  { %v3189_v57 = vpop.eup %3188  ;;  %v908_v11 = vmul.f32 %v907_v58, %v3963_v56  ;;  %v918_v55 = vadd.f32 0.014752088, %v917_v18  ;;  %v4023_v26 = vadd.f32 %v3902_v37, %v98_v33  ;;  %v857_v45 = vor.u32 1.1754944e-38, %v856_v49 }
  0x9c   :  { %v3109_v29 = vclamps-f32 %v819_v44, 1.0  ;;  %v846_v17 = vmul.f32 %v3189_v57, %v3982_v7  ;;  %vm851_vm1 = vweird.f32 %v3189_v57  ;;  %v870_v28 = vmul.f32 %v869_v39, %v3951_v4 }
  0x9d   :  { %v881_v35 = vmul.f32 %v880_v51, %v3951_v4  ;;  %v909_v19 = vadd.f32 0.05243302, %v908_v11  ;;  %v919_v61 = vmul.f32 %v918_v55, %v3963_v56  ;;  %v944_v32 = vmul.f32 2.1237322e-06, %v4020_v46  ;;  %vm4037_vm2 = vmor %vm850_vm0, %vm851_vm1 }
  0x9e   :  { %v2913_v53 = vadd.f32 1.0, %v3109_v29  ;;  %v847_v60 = vsub.f32 1.0, %v846_v17  ;;  %v871_v6 = vadd.f32 0.18741608, %v870_v28  ;;  %v955_v14 = vmul.f32 3.8918573e-05, %v4020_v46 }
  0x9f   :  { %v882_v59 = vadd.f32 0.4994258, %v881_v35  ;;  %v910_v0 = vmul.f32 %v909_v19, %v3963_v56  ;;  %v920_v1 = vadd.f32 0.112945676, %v919_v61  ;;  %v945_v54 = vadd.f32 0.00028619796, %v944_v32 }
  0xa0   :  { %v2977_v31 = vmul.f32 %v2913_v53, %v3879_v50  ;;  %v848_v30 = vmul.f32 %v3189_v57, %v847_v60  ;;  %v872_v27 = vmul.f32 %v871_v6, %v3951_v4  ;;  %v956_v9 = vadd.f32 0.001143296, %v955_v14 }
  0xa1   :  { %v883_v5 = vmul.f32 %v882_v59, %v3951_v4  ;;  %v911_v25 = vadd.f32 0.18741608, %v910_v0  ;;  %v921_v12 = vmul.f32 %v920_v1, %v3963_v56  ;;  %vm855_vm3 = vcmp.eq.f32.partialorder %v854_v22, 8.507059e+37 }
  0xa2   :  { %3041 = vst [vmem:[%s6399_s3 + $0x58] sm:$0xff] %v2977_v31  ;;  %v849_v50 = vadd.f32 %v3189_v57, %v848_v30  ;;  %v946_v15 = vmul.f32 %v945_v54, %v4020_v46  ;;  %v4048_v7 = vmul.f32 0.70710677, %v4023_v26  ;;  %v873_v33 = vadd.f32 1.1283791, %v872_v27 }
  0xa3   :  { %v884_v16 = vadd.f32 1.0, %v883_v5  ;;  %v922_v23 = vadd.f32 0.4994258, %v921_v12  ;;  %v957_v4 = vmul.f32 %v956_v9, %v4020_v46  ;;  %v226_v40 = vmul.f32 0.5, %v3787_v38 }
  0xa4   :  { %v853_v62 = vsel %vm4037_vm2, %v3189_v57, %v849_v50  ;;  %v947_v10 = vadd.f32 0.0036580483, %v946_v15  ;;  %v982_v41 = vmul.f32 %v4048_v7, %v4048_v7  ;;  %v4057_v13 = vmul.f32 0.5, %v3905_v52 }
  0xa5   :  { %v858_v22 = vsel %vm855_vm3, %v857_v45, %v853_v62  ;;  %3190 = vrcp.f32 %v884_v16  ;;  %v912_v20 = vmul.f32 %v911_v25, %v3963_v56  ;;  %v4062_v63 = vmul.f32 0.5, %v3923_v8 }
  0xa6   :  { %v859_v43 = vmul.f32 %v858_v22, %v3994_v2  ;;  %v923_v38 = vmul.f32 %v922_v23, %v3963_v56  ;;  %v4066_v24 = vmul.f32 0.5, %v3972_v3  ;;  %v4069_v58 = vmul.f32 %v873_v33, %v3914_v36 }
  0xa7   :  { %v948_v18 = vmul.f32 %v947_v10, %v4020_v46  ;;  %v958_v52 = vadd.f32 0.014752088, %v957_v4  ;;  %v4072_v47 = vmin.f32 %v982_v41, 16.0  ;;  %v894_v49 = vand.u32 2147483647, %v884_v16 }
  0xa8   :  { %v3110_v44 = vclamps-f32 %v859_v43, 1.0  ;;  %v896_v39 = vand.u32 2147483648, %v884_v16  ;;  %v924_v2 = vadd.f32 1.0, %v923_v38  ;;  %v913_v51 = vadd.f32 1.1283791, %v912_v20 }
  0xa9   :  { %v949_v8 = vadd.f32 0.05243302, %v948_v18  ;;  %v959_v57 = vmul.f32 %v958_v52, %v4020_v46  ;;  %v984_v56 = vmul.f32 2.1237322e-06, %v4072_v47  ;;  %vm890_vm4 = vweird.f32 %v884_v16  ;;  %v31_v11 = vld [vmem:[%s6396_s0 + $0x88] sm:$0xff] }
  0xaa   :  { %v2914_v3 = vadd.f32 1.0, %v3110_v44  ;;  %3192 = vrcp.f32 %v924_v2  ;;  %v995_v36 = vmul.f32 3.8918573e-05, %v4072_v47  ;;  %v934_v29 = vand.u32 2147483647, %v924_v2 }
  0xab   :  { %v3191_v55 = vpop.eup %3190  ;;  %v950_v17 = vmul.f32 %v949_v8, %v4020_v46  ;;  %v960_v28 = vadd.f32 0.112945676, %v959_v57  ;;  %v985_v35 = vadd.f32 0.00028619796, %v984_v56  ;;  %vm4081_vm5 = vcmp.eq.f32.partialorder %v894_v49, 8.507059e+37 }
  0xac   :  { %v2978_v19 = vmul.f32 %v2914_v3, %v226_v40  ;;  %v886_v61 = vmul.f32 %v3191_v55, %v884_v16  ;;  %v897_v53 = vor.u32 1.1754944e-38, %v896_v39  ;;  %vm891_vm6 = vweird.f32 %v3191_v55 }
  0xad   :  { %v914_v60 = vmul.f32 %v913_v51, %v3940_v48  ;;  %v936_v6 = vand.u32 2147483648, %v924_v2  ;;  %v961_v14 = vmul.f32 %v960_v28, %v4020_v46  ;;  %v986_v59 = vmul.f32 %v985_v35, %v4072_v47  ;;  %vm4105_vm9 = vmor %vm890_vm4, %vm891_vm6 }
  0xae   :  { %3042 = vst [vmem:[%s6399_s3 + $0x60] sm:$0xff] %v2978_v19  ;;  %v887_v45 = vsub.f32 1.0, %v886_v61  ;;  %v996_v0 = vadd.f32 0.001143296, %v995_v36  ;;  %v99_v1 = vmul.f32 %v3868_v21, %v31_v11  ;;  %vm930_vm7 = vweird.f32 %v924_v2 }
  0xaf   :  { %vm4095_vm8 = vcmp.eq.f32.partialorder %v934_v29, 8.507059e+37  ;;  %v951_v30 = vadd.f32 0.18741608, %v950_v17  ;;  %v962_v27 = vadd.f32 0.4994258, %v961_v14  ;;  %v937_v15 = vor.u32 1.1754944e-38, %v936_v6 }
  0xb0   :  { %v3193_v54 = vpop.eup %3192  ;;  %v888_v34 = vmul.f32 %v3191_v55, %v887_v45  ;;  %v987_v5 = vadd.f32 0.0036580483, %v986_v59  ;;  %v997_v25 = vmul.f32 %v996_v0, %v4072_v47  ;;  %v4101_v12 = vadd.f32 %v3902_v37, %v99_v1 }
  0xb1   :  { %v926_v50 = vmul.f32 %v3193_v54, %v924_v2  ;;  %v963_v33 = vmul.f32 %v962_v27, %v4020_v46  ;;  %vm931_vm10 = vweird.f32 %v3193_v54  ;;  %v952_v16 = vmul.f32 %v951_v30, %v4020_v46 }
  0xb2   :  { %v889_v4 = vadd.f32 %v3191_v55, %v888_v34  ;;  %v988_v40 = vmul.f32 %v987_v5, %v4072_v47  ;;  %v998_v62 = vadd.f32 0.014752088, %v997_v25  ;;  %v4113_v10 = vmul.f32 0.70710677, %v4101_v12  ;;  %vm4131_vm11 = vmor %vm930_vm7, %vm931_vm10 }
  0xb3   :  { %v927_v41 = vsub.f32 1.0, %v926_v50  ;;  %v964_v22 = vadd.f32 1.0, %v963_v33  ;;  %v4127_v46 = vmul.f32 0.5, %v4023_v26  ;;  %v953_v36 = vadd.f32 1.1283791, %v952_v16 }
  0xb4   :  { %v893_v43 = vsel %vm4105_vm9, %v3191_v55, %v889_v4  ;;  %v989_v38 = vadd.f32 0.05243302, %v988_v40  ;;  %v999_v18 = vmul.f32 %v998_v62, %v4072_v47  ;;  %v1022_v52 = vmul.f32 %v4113_v10, %v4113_v10 }
  0xb5   :  { %v32_v31 = vld [vmem:[%s6396_s0 + $0x90] sm:$0xff]  ;;  %v33_v20 = vld [vmem:[%s6396_s0 + $0x98] sm:$0xff]  ;;  %v898_v44 = vsel %vm4081_vm5, %v897_v53, %v893_v43  ;;  %v928_v49 = vmul.f32 %v3193_v54, %v927_v41  ;;  %3194 = vrcp.f32 %v964_v22  ;;  %vm970_vm12 = vweird.f32 %v964_v22 }
  0xb6   :  { %v100_v23 = vmul.f32 %v3868_v21, %v32_v31  ;;  %v899_v39 = vmul.f32 %v898_v44, %v4069_v58  ;;  %v990_v8 = vmul.f32 %v989_v38, %v4072_v47  ;;  %v101_v56 = vmul.f32 %v3868_v21, %v33_v20 }
  0xb7   :  { %v929_v3 = vadd.f32 %v3193_v54, %v928_v49  ;;  %v1000_v11 = vadd.f32 0.112945676, %v999_v18  ;;  %v4140_v55 = vmin.f32 %v1022_v52, 16.0  ;;  %v974_v58 = vand.u32 2147483647, %v964_v22 }
  0xb8   :  { %v4137_v57 = vadd.f32 %v3902_v37, %v100_v23  ;;  %v3111_v26 = vclamps-f32 %v899_v39, 1.0  ;;  %v991_v2 = vadd.f32 0.18741608, %v990_v8  ;;  %v976_v30 = vand.u32 2147483648, %v964_v22 }
  0xb9   :  { %v933_v29 = vsel %vm4131_vm11, %v3193_v54, %v929_v3  ;;  %v1001_v17 = vmul.f32 %v1000_v11, %v4072_v47  ;;  %v1024_v28 = vmul.f32 2.1237322e-06, %v4140_v55  ;;  %v1035_v35 = vmul.f32 3.8918573e-05, %v4140_v55 }
  0xba   :  { %v2915_v19 = vadd.f32 1.0, %v3111_v26  ;;  %v938_v61 = vsel %vm4095_vm8, %v937_v15, %v933_v29  ;;  %v992_v32 = vmul.f32 %v991_v2, %v4072_v47  ;;  %v4151_v53 = vmul.f32 0.70710677, %v4137_v57 }
  0xbb   :  { %v3195_v6 = vpop.eup %3194  ;;  %v939_v14 = vmul.f32 %v938_v61, %v914_v60  ;;  %v1002_v45 = vadd.f32 0.4994258, %v1001_v17  ;;  %v1025_v59 = vadd.f32 0.00028619796, %v1024_v28  ;;  %v1036_v0 = vadd.f32 0.001143296, %v1035_v35 }
  0xbc   :  { %v2979_v1 = vmul.f32 %v2915_v19, %v4057_v13  ;;  %v966_v31 = vmul.f32 %v3195_v6, %v964_v22  ;;  %vm971_vm13 = vweird.f32 %v3195_v6  ;;  %v993_v5 = vadd.f32 1.1283791, %v992_v32 }
  0xbd   :  { %v3112_v27 = vclamps-f32 %v939_v14, 1.0  ;;  %v1003_v54 = vmul.f32 %v1002_v45, %v4072_v47  ;;  %v1026_v48 = vmul.f32 %v1025_v59, %v4140_v55  ;;  %v1037_v34 = vmul.f32 %v1036_v0, %v4140_v55  ;;  %vm4176_vm14 = vmor %vm970_vm12, %vm971_vm13 }
  0xbe   :  { %3043 = vst [vmem:[%s6399_s3 + $0x68] sm:$0xff] %v2979_v1  ;;  %v967_v60 = vsub.f32 1.0, %v966_v31  ;;  %v1062_v25 = vmul.f32 %v4151_v53, %v4151_v53  ;;  %v4163_v13 = vadd.f32 %v3902_v37, %v101_v56  ;;  %v954_v33 = vmul.f32 %v953_v36, %v3998_v42 }
  0xbf   :  { %v2916_v9 = vadd.f32 1.0, %v3112_v27  ;;  %v4165_v50 = vadd.f32 1.0, %v1003_v54  ;;  %v1027_v47 = vadd.f32 0.0036580483, %v1026_v48  ;;  %v1038_v15 = vadd.f32 0.014752088, %v1037_v34 }
  0xc0   :  { %v968_v23 = vmul.f32 %v3195_v6, %v967_v60  ;;  %v4168_v4 = vmin.f32 %v1062_v25, 16.0  ;;  %v4171_v40 = vmul.f32 0.70710677, %v4163_v13  ;;  %vm4180_vm15 = vcmp.eq.f32.partialorder %v974_v58, 8.507059e+37 }
  0xc1   :  { %v2980_v62 = vmul.f32 %v2916_v9, %v4062_v63  ;;  %v977_v20 = vor.u32 1.1754944e-38, %v976_v30  ;;  %3196 = vrcp.f32 %v4165_v50  ;;  %v4189_v63 = vmul.f32 0.5, %v4101_v12 }
  0xc2   :  { %v969_v43 = vadd.f32 %v3195_v6, %v968_v23  ;;  %v1028_v22 = vmul.f32 %v1027_v47, %v4140_v55  ;;  %v1039_v38 = vmul.f32 %v1038_v15, %v4140_v55  ;;  %v4197_v18 = vmul.f32 %v993_v5, %v4048_v7 }
  0xc3   :  { %v1064_v52 = vmul.f32 2.1237322e-06, %v4168_v4  ;;  %v1075_v44 = vmul.f32 3.8918573e-05, %v4168_v4  ;;  %v1102_v49 = vmul.f32 %v4171_v40, %v4171_v40  ;;  %vm1010_vm0 = vweird.f32 %v4165_v50 }
  0xc4   :  { %v973_v12 = vsel %vm4176_vm14, %v3195_v6, %v969_v43  ;;  %v1029_v39 = vadd.f32 0.05243302, %v1028_v22  ;;  %v1040_v51 = vadd.f32 0.112945676, %v1039_v38  ;;  %v1014_v26 = vand.u32 2147483647, %v4165_v50 }
  0xc5   :  { %v34_v42 = vld [vmem:[%s6396_s0 + $0xa0] sm:$0xff]  ;;  %v978_v56 = vsel %vm4180_vm15, %v977_v20, %v973_v12  ;;  %v1065_v7 = vadd.f32 0.00028619796, %v1064_v52  ;;  %v1076_v3 = vadd.f32 0.001143296, %v1075_v44  ;;  %v1016_v17 = vand.u32 2147483648, %v4165_v50 }
  0xc6   :  { %3044 = vst [vmem:[%s6399_s3 + $0x70] sm:$0xff] %v2980_v62  ;;  %v102_v8 = vmul.f32 %v3868_v21, %v34_v42  ;;  %v979_v11 = vmul.f32 %v978_v56, %v954_v33  ;;  %v1030_v58 = vmul.f32 %v1029_v39, %v4140_v55  ;;  %v1041_v2 = vmul.f32 %v1040_v51, %v4140_v55 }
  0xc7   :  { %v3197_v29 = vpop.eup %3196  ;;  %v1066_v28 = vmul.f32 %v1065_v7, %v4168_v4  ;;  %v1077_v35 = vmul.f32 %v1076_v3, %v4168_v4  ;;  %v4218_v19 = vmin.f32 %v1102_v49, 16.0  ;;  %v1017_v33 = vor.u32 1.1754944e-38, %v1016_v17 }
  0xc8   :  { %v3113_v61 = vclamps-f32 %v979_v11, 1.0  ;;  %v1006_v32 = vmul.f32 %v3197_v29, %v4165_v50  ;;  %v1031_v6 = vadd.f32 0.18741608, %v1030_v58  ;;  %vm1011_vm1 = vweird.f32 %v3197_v29 }
  0xc9   :  { %v1042_v45 = vadd.f32 0.4994258, %v1041_v2  ;;  %v1067_v59 = vadd.f32 0.0036580483, %v1066_v28  ;;  %v1078_v0 = vadd.f32 0.014752088, %v1077_v35  ;;  %vm4235_vm2 = vmor %vm1010_vm0, %vm1011_vm1  ;;  %v4247_v42 = vadd.f32 %v3902_v37, %v102_v8 }
  0xca   :  { %v2917_v1 = vadd.f32 1.0, %v3113_v61  ;;  %v1007_v31 = vsub.f32 1.0, %v1006_v32  ;;  %v1032_v30 = vmul.f32 %v1031_v6, %v4140_v55  ;;  %v1104_v27 = vmul.f32 2.1237322e-06, %v4218_v19 }
  0xcb   :  { %v1043_v54 = vmul.f32 %v1042_v45, %v4140_v55  ;;  %v1068_v48 = vmul.f32 %v1067_v59, %v4168_v4  ;;  %v1079_v34 = vmul.f32 %v1078_v0, %v4168_v4  ;;  %v1115_v60 = vmul.f32 3.8918573e-05, %v4218_v19 }
  0xcc   :  { %v2981_v5 = vmul.f32 %v2917_v1, %v4066_v24  ;;  %v1008_v25 = vmul.f32 %v3197_v29, %v1007_v31  ;;  %v1033_v9 = vadd.f32 1.1283791, %v1032_v30  ;;  %v1105_v47 = vadd.f32 0.00028619796, %v1104_v27 }
  0xcd   :  { %v35_v36 = vld [vmem:[%s6396_s0 + $0xa8] sm:$0xff]  ;;  %v36_v15 = vld [vmem:[%s6396_s0 + $0xb0] sm:$0xff]  ;;  %v1044_v23 = vadd.f32 1.0, %v1043_v54  ;;  %v1069_v62 = vadd.f32 0.05243302, %v1068_v48  ;;  %vm1015_vm3 = vcmp.eq.f32.partialorder %v1014_v26, 8.507059e+37 }
  0xce   :  { %v103_v14 = vmul.f32 %v3868_v21, %v35_v36  ;;  %v1080_v41 = vadd.f32 0.112945676, %v1079_v34  ;;  %3045 = vst [vmem:[%s6399_s3 + $0x78] sm:$0xff] %v2981_v5  ;;  %v1009_v24 = vadd.f32 %v3197_v29, %v1008_v25  ;;  %v1106_v16 = vmul.f32 %v1105_v47, %v4218_v19 }
  0xcf   :  { %v1116_v20 = vadd.f32 0.001143296, %v1115_v60  ;;  %3198 = vrcp.f32 %v1044_v23  ;;  %v4244_v50 = vmul.f32 0.5, %v4137_v57  ;;  %v1070_v38 = vmul.f32 %v1069_v62, %v4168_v4 }
  0xd0   :  { %v4250_v43 = vadd.f32 %v3902_v37, %v103_v14  ;;  %v1013_v22 = vsel %vm4235_vm2, %v3197_v29, %v1009_v24  ;;  %v1081_v52 = vmul.f32 %v1080_v41, %v4168_v4  ;;  %v104_v44 = vmul.f32 %v3868_v21, %v36_v15 }
  0xd1   :  { %v1018_v49 = vsel %vm1015_vm3, %v1017_v33, %v1013_v22  ;;  %v4258_v12 = vmul.f32 %v1033_v9, %v4113_v10  ;;  %vm1050_vm4 = vweird.f32 %v1044_v23  ;;  %v1107_v57 = vadd.f32 0.0036580483, %v1106_v16 }
  0xd2   :  { %v1019_v39 = vmul.f32 %v1018_v49, %v4197_v18  ;;  %v1071_v51 = vadd.f32 0.18741608, %v1070_v38  ;;  %v1082_v8 = vadd.f32 0.4994258, %v1081_v52  ;;  %v1117_v56 = vmul.f32 %v1116_v20, %v4218_v19 }
  0xd3   :  { %v1054_v7 = vand.u32 2147483647, %v1044_v23  ;;  %v1108_v3 = vmul.f32 %v1107_v57, %v4218_v19  ;;  %v4264_v36 = vmul.f32 0.70710677, %v4247_v42  ;;  %v4267_v11 = vmul.f32 0.70710677, %v4250_v43 }
  0xd4   :  { %v3114_v26 = vclamps-f32 %v1019_v39, 1.0  ;;  %v1083_v10 = vmul.f32 %v1082_v8, %v4168_v4  ;;  %v1118_v58 = vadd.f32 0.014752088, %v1117_v56  ;;  %v4271_v2 = vadd.f32 %v3902_v37, %v104_v44 }
  0xd5   :  { %v3199_v18 = vpop.eup %3198  ;;  %v1072_v29 = vmul.f32 %v1071_v51, %v4168_v4  ;;  %v1109_v17 = vadd.f32 0.05243302, %v1108_v3  ;;  %v1142_v28 = vmul.f32 %v4264_v36, %v4264_v36  ;;  %v1182_v35 = vmul.f32 %v4267_v11, %v4267_v11 }
  0xd6   :  { %v2918_v61 = vadd.f32 1.0, %v3114_v26  ;;  %v1046_v32 = vmul.f32 %v3199_v18, %v1044_v23  ;;  %v1056_v6 = vand.u32 2147483648, %v1044_v23  ;;  %v4279_v14 = vmul.f32 0.5, %v4163_v13 }
  0xd7   :  { %v1084_v45 = vadd.f32 1.0, %v1083_v10  ;;  %v1110_v59 = vmul.f32 %v1109_v17, %v4218_v19  ;;  %v1119_v0 = vmul.f32 %v1118_v58, %v4218_v19  ;;  %v4283_v1 = vmin.f32 %v1142_v28, 16.0 }
  0xd8   :  { %v2982_v4 = vmul.f32 %v2918_v61, %v4127_v46  ;;  %v1047_v31 = vsub.f32 1.0, %v1046_v32  ;;  %vm1051_vm5 = vweird.f32 %v3199_v18  ;;  %v4287_v30 = vmul.f32 0.70710677, %v4271_v2 }
  0xd9   :  { %v1073_v27 = vadd.f32 1.1283791, %v1072_v29  ;;  %3200 = vrcp.f32 %v1084_v45  ;;  %v1094_v54 = vand.u32 2147483647, %v1084_v45  ;;  %v4289_v48 = vmin.f32 %v1182_v35, 16.0  ;;  %vm4299_vm7 = vmor %vm1050_vm4, %vm1051_vm5 }
  0xda   :  { %3046 = vst [vmem:[%s6399_s3 + $0x80] sm:$0xff] %v2982_v4  ;;  %v1048_v13 = vmul.f32 %v3199_v18, %v1047_v31  ;;  %vm4294_vm6 = vcmp.eq.f32.partialorder %v1054_v7, 8.507059e+37  ;;  %v1111_v46 = vadd.f32 0.18741608, %v1110_v59  ;;  %v1120_v60 = vadd.f32 0.112945676, %v1119_v0 }
  0xdb   :  { %v1057_v25 = vor.u32 1.1754944e-38, %v1056_v6  ;;  %v1096_v9 = vand.u32 2147483648, %v1084_v45  ;;  %v1144_v47 = vmul.f32 2.1237322e-06, %v4283_v1  ;;  %v1155_v15 = vmul.f32 3.8918573e-05, %v4283_v1 }
  0xdc   :  { %v1049_v55 = vadd.f32 %v3199_v18, %v1048_v13  ;;  %v1112_v33 = vmul.f32 %v1111_v46, %v4218_v19  ;;  %v1121_v62 = vmul.f32 %v1120_v60, %v4218_v19  ;;  %v1184_v41 = vmul.f32 2.1237322e-06, %v4289_v48 }
  0xdd   :  { %vm1090_vm8 = vweird.f32 %v1084_v45  ;;  %v1145_v24 = vadd.f32 0.00028619796, %v1144_v47  ;;  %v1156_v23 = vadd.f32 0.001143296, %v1155_v15  ;;  %v1195_v16 = vmul.f32 3.8918573e-05, %v4289_v48 }
  0xde   :  { %v1053_v20 = vsel %vm4299_vm7, %v3199_v18, %v1049_v55  ;;  %v1122_v22 = vadd.f32 0.4994258, %v1121_v62  ;;  %v1185_v38 = vadd.f32 0.00028619796, %v1184_v41  ;;  %v1222_v52 = vmul.f32 %v4287_v30, %v4287_v30 }
  0xdf   :  { %v3201_v44 = vpop.eup %3200  ;;  %v1058_v49 = vsel %vm4294_vm6, %v1057_v25, %v1053_v20  ;;  %v1146_v57 = vmul.f32 %v1145_v24, %v4283_v1  ;;  %v1157_v39 = vmul.f32 %v1156_v23, %v4283_v1  ;;  %v1196_v51 = vadd.f32 0.001143296, %v1195_v16 }
  0xe0   :  { %v1059_v8 = vmul.f32 %v1058_v49, %v4258_v12  ;;  %v1086_v56 = vmul.f32 %v3201_v44, %v1084_v45  ;;  %vm1091_vm9 = vweird.f32 %v3201_v44  ;;  %v1113_v7 = vadd.f32 1.1283791, %v1112_v33 }
  0xe1   :  { %v1123_v3 = vmul.f32 %v1122_v22, %v4218_v19  ;;  %v1147_v26 = vadd.f32 0.0036580483, %v1146_v57  ;;  %v1158_v10 = vadd.f32 0.014752088, %v1157_v39  ;;  %v1186_v58 = vmul.f32 %v1185_v38, %v4289_v48  ;;  %vm4328_vm10 = vmor %vm1090_vm8, %vm1091_vm9 }
  0xe2   :  { %v3115_v18 = vclamps-f32 %v1059_v8, 1.0  ;;  %v1087_v29 = vsub.f32 1.0, %v1086_v56  ;;  %v1197_v17 = vmul.f32 %v1196_v51, %v4289_v48  ;;  %v4321_v28 = vmin.f32 %v1222_v52, 16.0 }
  0xe3   :  { %v1124_v35 = vadd.f32 1.0, %v1123_v3  ;;  %v1148_v61 = vmul.f32 %v1147_v26, %v4283_v1  ;;  %v1159_v12 = vmul.f32 %v1158_v10, %v4283_v1  ;;  %v1187_v32 = vadd.f32 0.0036580483, %v1186_v58 }
  0xe4   :  { %v2919_v6 = vadd.f32 1.0, %v3115_v18  ;;  %v1074_v59 = vmul.f32 %v1073_v27, %v4151_v53  ;;  %v1088_v19 = vmul.f32 %v3201_v44, %v1087_v29  ;;  %v1198_v0 = vadd.f32 0.014752088, %v1197_v17 }
  0xe5   :  { %vm4332_vm11 = vcmp.eq.f32.partialorder %v1094_v54, 8.507059e+37  ;;  %v1097_v13 = vor.u32 1.1754944e-38, %v1096_v9  ;;  %3202 = vrcp.f32 %v1124_v35  ;;  %v1224_v34 = vmul.f32 2.1237322e-06, %v4321_v28 }
  0xe6   :  { %v2983_v46 = vmul.f32 %v2919_v6, %v4189_v63  ;;  %v1089_v60 = vadd.f32 %v3201_v44, %v1088_v19  ;;  %v1149_v53 = vadd.f32 0.05243302, %v1148_v61  ;;  %v1160_v27 = vadd.f32 0.112945676, %v1159_v12 }
  0xe7   :  { %v4339_v5 = vmul.f32 %v1113_v7, %v4171_v40  ;;  %vm1130_vm12 = vweird.f32 %v1124_v35  ;;  %v4342_v45 = vmul.f32 0.5, %v4247_v42  ;;  %v1188_v54 = vmul.f32 %v1187_v32, %v4289_v48 }
  0xe8   :  { %3047 = vst [vmem:[%s6399_s3 + $0x88] sm:$0xff] %v2983_v46  ;;  %v1093_v25 = vsel %vm4328_vm10, %v3201_v44, %v1089_v60  ;;  %v1150_v63 = vmul.f32 %v1149_v53, %v4283_v1  ;;  %v1161_v9 = vmul.f32 %v1160_v27, %v4283_v1  ;;  %v1199_v40 = vmul.f32 %v1198_v0, %v4289_v48 }
  0xe9   :  { %v1098_v47 = vsel %vm4332_vm11, %v1097_v13, %v1093_v25  ;;  %v1189_v42 = vadd.f32 0.05243302, %v1188_v54  ;;  %v1225_v15 = vadd.f32 0.00028619796, %v1224_v34  ;;  %v1235_v55 = vmul.f32 3.8918573e-05, %v4321_v28 }
  0xea   :  { %v1099_v33 = vmul.f32 %v1098_v47, %v1074_v59  ;;  %v1151_v62 = vadd.f32 0.18741608, %v1150_v63  ;;  %v1162_v41 = vadd.f32 0.4994258, %v1161_v9  ;;  %v1200_v24 = vadd.f32 0.112945676, %v1199_v40 }
  0xeb   :  { %v3203_v23 = vpop.eup %3202  ;;  %v1134_v16 = vand.u32 2147483647, %v1124_v35  ;;  %v1190_v20 = vmul.f32 %v1189_v42, %v4289_v48  ;;  %v1226_v22 = vmul.f32 %v1225_v15, %v4321_v28  ;;  %v1236_v38 = vadd.f32 0.001143296, %v1235_v55  ;;  %v4418_v47 = vld [vmem:[%s6397_s1] ss:$0 sm:$0xff] }
  0xec   :  { %v3116_v52 = vclamps-f32 %v1099_v33, 1.0  ;;  %v1126_v44 = vmul.f32 %v3203_v23, %v1124_v35  ;;  %v1136_v49 = vand.u32 2147483648, %v1124_v35  ;;  %v1152_v57 = vmul.f32 %v1151_v62, %v4283_v1 }
  0xed   :  { %v1163_v39 = vmul.f32 %v1162_v41, %v4283_v1  ;;  %v1191_v51 = vadd.f32 0.18741608, %v1190_v20  ;;  %v1201_v8 = vmul.f32 %v1200_v24, %v4289_v48  ;;  %v1227_v56 = vadd.f32 0.0036580483, %v1226_v22 }
  0xee   :  { %v2920_v7 = vadd.f32 1.0, %v3116_v52  ;;  %v1127_v3 = vsub.f32 1.0, %v1126_v44  ;;  %vm1131_vm13 = vweird.f32 %v3203_v23  ;;  %v1237_v26 = vmul.f32 %v1236_v38, %v4321_v28  ;;  %v4437_v44 = vld [vmem:[%s6398_s2] ss:$0 sm:$0xff] }
  0xef   :  { %v1153_v10 = vadd.f32 1.1283791, %v1152_v57  ;;  %v4362_v58 = vadd.f32 1.0, %v1163_v39  ;;  %v1202_v18 = vadd.f32 0.4994258, %v1201_v8  ;;  %v1228_v29 = vmul.f32 %v1227_v56, %v4321_v28  ;;  %v37_v32 = vld [vmem:[%s6396_s0 + $0xb8] sm:$0xff]  ;;  %vm4371_vm14 = vmor %vm1130_vm12, %vm1131_vm13 }
  0xf0   :  { %v2984_v17 = vmul.f32 %v2920_v7, %v4244_v50  ;;  %v1128_v61 = vmul.f32 %v3203_v23, %v1127_v3  ;;  %v1192_v1 = vmul.f32 %v1191_v51, %v4289_v48  ;;  %v1238_v12 = vadd.f32 0.014752088, %v1237_v26 }
  0xf1   :  { %vm4375_vm15 = vcmp.eq.f32.partialorder %v1134_v16, 8.507059e+37  ;;  %v1137_v19 = vor.u32 1.1754944e-38, %v1136_v49  ;;  %3204 = vrcp.f32 %v4362_v58  ;;  %v4381_v50 = vmul.f32 0.5, %v4250_v43 }
  0xf2   :  { %3048 = vst [vmem:[%s6399_s3 + $0x90] sm:$0xff] %v2984_v17  ;;  %v1129_v0 = vadd.f32 %v3203_v23, %v1128_v61  ;;  %v1174_v35 = vand.u32 2147483647, %v4362_v58  ;;  %v1203_v4 = vmul.f32 %v1202_v18, %v4289_v48  ;;  %v1229_v31 = vadd.f32 0.05243302, %v1228_v29 }
  0xf3   :  { %v4389_v13 = vmul.f32 %v1153_v10, %v4264_v36  ;;  %v1176_v34 = vand.u32 2147483648, %v4362_v58  ;;  %v1239_v46 = vmul.f32 %v1238_v12, %v4321_v28  ;;  %v105_v43 = vmul.f32 %v3868_v21, %v37_v32 }
  0xf4   :  { %v1133_v53 = vsel %vm4371_vm14, %v3203_v23, %v1129_v0  ;;  %v1193_v27 = vadd.f32 1.1283791, %v1192_v1  ;;  %v4399_v54 = vadd.f32 1.0, %v1203_v4  ;;  %v1230_v48 = vmul.f32 %v1229_v31, %v4321_v28 }
  0xf5   :  { %v1138_v36 = vsel %vm4375_vm15, %v1137_v19, %v1133_v53  ;;  %vm1170_vm0 = vweird.f32 %v4362_v58  ;;  %v1240_v25 = vadd.f32 0.112945676, %v1239_v46  ;;  %v4406_v21 = vadd.f32 %v3902_v37, %v105_v43 }
  0xf6   :  { %v1139_v63 = vmul.f32 %v1138_v36, %v4339_v5  ;;  %vm4409_vm1 = vcmp.eq.f32.partialorder %v1174_v35, 8.507059e+37  ;;  %3206 = vrcp.f32 %v4399_v54  ;;  %v1214_v40 = vand.u32 2147483647, %v4399_v54 }
  0xf7   :  { %v3205_v15 = vpop.eup %3204  ;;  %v1216_v37 = vand.u32 2147483648, %v4399_v54  ;;  %v1231_v55 = vadd.f32 0.18741608, %v1230_v48  ;;  %v1241_v5 = vmul.f32 %v1240_v25, %v4321_v28  ;;  %v4424_v33 = vmul.f32 0.70710677, %v4406_v21 }
  0xf8   :  { %v3117_v62 = vclamps-f32 %v1139_v63, 1.0  ;;  %v1166_v41 = vmul.f32 %v3205_v15, %v4362_v58  ;;  %v1177_v24 = vor.u32 1.1754944e-38, %v1176_v34  ;;  %v4428_v23 = vmul.f32 %v1193_v27, %v4267_v11 }
  0xf9   :  { %v38_v60 = vld [vmem:[%s6396_s0 + $0xc0] sm:$0xff]  ;;  %vm1171_vm2 = vweird.f32 %v3205_v15  ;;  %vm1210_vm3 = vweird.f32 %v4399_v54  ;;  %v1232_v16 = vmul.f32 %v1231_v55, %v4321_v28  ;;  %v1242_v20 = vadd.f32 0.4994258, %v1241_v5  ;;  %v39_v11 = vld [vmem:[%s6396_s0 + $0xc8] sm:$0xff]  ;;  %v40_v57 = vld [vmem:[%s6396_s0 + $0xd0] sm:$0xff] }
  0xfa   :  { %v106_v42 = vmul.f32 %v4418_v47, %v38_v60  ;;  %v2921_v22 = vadd.f32 1.0, %v3117_v62  ;;  %v1167_v38 = vsub.f32 1.0, %v1166_v41  ;;  %v1262_v52 = vmul.f32 %v4424_v33, %v4424_v33  ;;  %vm4462_vm5 = vmor %vm1170_vm0, %vm1171_vm2 }
  0xfb   :  { %vm4448_vm4 = vcmp.eq.f32.partialorder %v1214_v40, 8.507059e+37  ;;  %v1217_v51 = vor.u32 1.1754944e-38, %v1216_v37  ;;  %v1233_v8 = vadd.f32 1.1283791, %v1232_v16  ;;  %v1243_v56 = vmul.f32 %v1242_v20, %v4321_v28 }
  0xfc   :  { %v4440_v49 = vadd.f32 %v4437_v44, %v106_v42  ;;  %v3207_v7 = vpop.eup %3206  ;;  %v2985_v3 = vmul.f32 %v2921_v22, %v4279_v14  ;;  %v1168_v26 = vmul.f32 %v3205_v15, %v1167_v38  ;;  %v4454_v10 = vmin.f32 %v1262_v52, 16.0 }
  0xfd   :  { %v1206_v17 = vmul.f32 %v3207_v7, %v4399_v54  ;;  %v1244_v61 = vadd.f32 1.0, %v1243_v56  ;;  %v107_v28 = vmul.f32 %v4418_v47, %v39_v11  ;;  %v4469_v14 = vmul.f32 %v4418_v47, %v40_v57 }
  0xfe   :  { %v4457_v18 = vmul.f32 0.70710677, %v4440_v49  ;;  %3049 = vst [vmem:[%s6399_s3 + $0x98] sm:$0xff] %v2985_v3  ;;  %v1169_v1 = vadd.f32 %v3205_v15, %v1168_v26  ;;  %v1264_v12 = vmul.f32 2.1237322e-06, %v4454_v10  ;;  %vm1211_vm6 = vweird.f32 %v3207_v7 }
  0xff   :  { %v1275_v58 = vmul.f32 3.8918573e-05, %v4454_v10  ;;  %v1207_v6 = vsub.f32 1.0, %v1206_v17  ;;  %v4479_v59 = vmul.f32 %v1233_v8, %v4287_v30  ;;  %3208 = vrcp.f32 %v1244_v61  ;;  %vm4490_vm8 = vmor %vm1210_vm3, %vm1211_vm6 }
 0x100   :  { %v1302_v32 = vmul.f32 %v4457_v18, %v4457_v18  ;;  %v1173_v19 = vsel %vm4462_vm5, %v3205_v15, %v1169_v1  ;;  %v1254_v0 = vand.u32 2147483647, %v1244_v61  ;;  %v1265_v35 = vadd.f32 0.00028619796, %v1264_v12 }
 0x101   :  { %v1276_v4 = vadd.f32 0.001143296, %v1275_v58  ;;  %v1178_v31 = vsel %vm4409_vm1, %v1177_v24, %v1173_v19  ;;  %v1208_v34 = vmul.f32 %v3207_v7, %v1207_v6  ;;  %vm1250_vm7 = vweird.f32 %v1244_v61 }
 0x102   :  { %v4485_v46 = vmin.f32 %v1302_v32, 16.0  ;;  %v1179_v43 = vmul.f32 %v1178_v31, %v4389_v13  ;;  %v1256_v60 = vand.u32 2147483648, %v1244_v61  ;;  %v1266_v53 = vmul.f32 %v1265_v35, %v4454_v10 }
 0x103   :  { %v1277_v27 = vmul.f32 %v1276_v4, %v4454_v10  ;;  %v1209_v48 = vadd.f32 %v3207_v7, %v1208_v34  ;;  %v4499_v63 = vadd.f32 %v4437_v44, %v107_v28  ;;  %vm4501_vm9 = vcmp.eq.f32.partialorder %v1254_v0, 8.507059e+37 }
 0x104   :  { %v1304_v36 = vmul.f32 2.1237322e-06, %v4485_v46  ;;  %v1315_v25 = vmul.f32 3.8918573e-05, %v4485_v46  ;;  %v3118_v13 = vclamps-f32 %v1179_v43, 1.0 }
 0x105   :  { %v1267_v9 = vadd.f32 0.0036580483, %v1266_v53  ;;  %v1278_v40 = vadd.f32 0.014752088, %v1277_v27  ;;  %v3209_v42 = vpop.eup %3208  ;;  %v1213_v15 = vsel %vm4490_vm8, %v3207_v7, %v1209_v48  ;;  %v4508_v5 = vmul.f32 0.70710677, %v4499_v63 }
 0x106   :  { %v1305_v37 = vadd.f32 0.00028619796, %v1304_v36  ;;  %v1316_v55 = vadd.f32 0.001143296, %v1315_v25  ;;  %v2922_v62 = vadd.f32 1.0, %v3118_v13  ;;  %v1218_v41 = vsel %vm4448_vm4, %v1217_v51, %v1213_v15  ;;  %v41_v39 = vld [vmem:[%s6396_s0 + $0xd8] sm:$0xff] }
 0x107   :  { %v1246_v24 = vmul.f32 %v3209_v42, %v1244_v61  ;;  %vm1251_vm10 = vweird.f32 %v3209_v42  ;;  %v1219_v16 = vmul.f32 %v1218_v41, %v4428_v23  ;;  %v1268_v20 = vmul.f32 %v1267_v9, %v4454_v10 }
 0x108   :  { %v1279_v22 = vmul.f32 %v1278_v40, %v4454_v10  ;;  %v1306_v38 = vmul.f32 %v1305_v37, %v4485_v46  ;;  %v2986_v52 = vmul.f32 %v2922_v62, %v4342_v45  ;;  %v1317_v57 = vmul.f32 %v1316_v55, %v4485_v46  ;;  %vm4530_vm11 = vmor %vm1250_vm7, %vm1251_vm10 }
 0x109   :  { %v1247_v11 = vsub.f32 1.0, %v1246_v24  ;;  %v1342_v8 = vmul.f32 %v4508_v5, %v4508_v5  ;;  %v3119_v51 = vclamps-f32 %v1219_v16, 1.0  ;;  %v1257_v23 = vor.u32 1.1754944e-38, %v1256_v60 }
 0x10a   :  { %v1269_v56 = vadd.f32 0.05243302, %v1268_v20  ;;  %v1280_v7 = vadd.f32 0.112945676, %v1279_v22  ;;  %3050 = vst [vmem:[%s6399_s3 + $0xa0] sm:$0xff] %v2986_v52  ;;  %v109_v58 = vmul.f32 %v4418_v47, %v41_v39  ;;  %v236_v36 = vmul.f32 0.5, %v4271_v2 }
 0x10b   :  { %v1248_v3 = vmul.f32 %v3209_v42, %v1247_v11  ;;  %v1307_v45 = vadd.f32 0.0036580483, %v1306_v38  ;;  %v1318_v26 = vadd.f32 0.014752088, %v1317_v57  ;;  %v4526_v29 = vmin.f32 %v1342_v8, 16.0 }
 0x10c   :  { %v2923_v17 = vadd.f32 1.0, %v3119_v51  ;;  %v1270_v1 = vmul.f32 %v1269_v56, %v4454_v10  ;;  %v1281_v12 = vmul.f32 %v1280_v7, %v4454_v10  ;;  %v4556_v40 = vmul.f32 0.5, %v4406_v21 }
 0x10d   :  { %v1249_v32 = vadd.f32 %v3209_v42, %v1248_v3  ;;  %v1308_v6 = vmul.f32 %v1307_v45, %v4485_v46  ;;  %v1319_v19 = vmul.f32 %v1318_v26, %v4485_v46  ;;  %v1344_v0 = vmul.f32 2.1237322e-06, %v4526_v29 }
 0x10e   :  { %v2987_v35 = vmul.f32 %v2923_v17, %v4381_v50  ;;  %v1271_v61 = vadd.f32 0.18741608, %v1270_v1  ;;  %v1282_v4 = vadd.f32 0.4994258, %v1281_v12  ;;  %v1355_v31 = vmul.f32 3.8918573e-05, %v4526_v29 }
 0x10f   :  { %v1253_v34 = vsel %vm4530_vm11, %v3209_v42, %v1249_v32  ;;  %v1309_v43 = vadd.f32 0.05243302, %v1308_v6  ;;  %v1320_v30 = vadd.f32 0.112945676, %v1319_v19  ;;  %v1345_v60 = vadd.f32 0.00028619796, %v1344_v0 }
 0x110   :  { %3051 = vst [vmem:[%s6399_s3 + $0xa8] sm:$0xff] %v2987_v35  ;;  %v1258_v53 = vsel %vm4501_vm9, %v1257_v23, %v1253_v34  ;;  %v1272_v27 = vmul.f32 %v1271_v61, %v4454_v10  ;;  %v1283_v50 = vmul.f32 %v1282_v4, %v4454_v10  ;;  %v1356_v48 = vadd.f32 0.001143296, %v1355_v31 }
 0x111   :  { %v1259_v25 = vmul.f32 %v1258_v53, %v4479_v59  ;;  %v1310_v13 = vmul.f32 %v1309_v43, %v4485_v46  ;;  %v1321_v9 = vmul.f32 %v1320_v30, %v4485_v46  ;;  %v1346_v54 = vmul.f32 %v1345_v60, %v4526_v29 }
 0x112   :  { %v1284_v42 = vadd.f32 1.0, %v1283_v50  ;;  %v1357_v15 = vmul.f32 %v1356_v48, %v4526_v29  ;;  %v4562_v2 = vadd.f32 %v4437_v44, %v4469_v14  ;;  %v1273_v59 = vadd.f32 1.1283791, %v1272_v27 }
 0x113   :  { %v3120_v37 = vclamps-f32 %v1259_v25, 1.0  ;;  %v1311_v55 = vadd.f32 0.18741608, %v1310_v13  ;;  %v1322_v10 = vadd.f32 0.4994258, %v1321_v9  ;;  %v4565_v62 = vmul.f32 0.5, %v4440_v49 }
 0x114   :  { %3210 = vrcp.f32 %v1284_v42  ;;  %v4568_v21 = vadd.f32 %v4437_v44, %v109_v58  ;;  %v4573_v20 = vmul.f32 0.5, %v4499_v63  ;;  %v1294_v22 = vand.u32 2147483647, %v1284_v42 }
 0x115   :  { %v2924_v41 = vadd.f32 1.0, %v3120_v37  ;;  %v1312_v24 = vmul.f32 %v1311_v55, %v4485_v46  ;;  %v1323_v16 = vmul.f32 %v1322_v10, %v4485_v46  ;;  %v1347_v38 = vadd.f32 0.0036580483, %v1346_v54 }
 0x116   :  { %v1358_v14 = vadd.f32 0.014752088, %v1357_v15  ;;  %v1296_v11 = vand.u32 2147483648, %v1284_v42  ;;  %v4578_v51 = vmul.f32 0.70710677, %v4562_v2  ;;  %v1274_v63 = vmul.f32 %v1273_v59, %v4424_v33 }
 0x117   :  { %v2988_v52 = vmul.f32 %v2924_v41, %v236_v36  ;;  %v1313_v57 = vadd.f32 1.1283791, %v1312_v24  ;;  %v1324_v8 = vadd.f32 1.0, %v1323_v16  ;;  %v1348_v49 = vmul.f32 %v1347_v38, %v4526_v29  ;;  %v42_v46 = vld [vmem:[%s6396_s0 + $0xe0] sm:$0xff] }
 0x118   :  { %v1359_v39 = vmul.f32 %v1358_v14, %v4526_v29  ;;  %v4581_v23 = vmul.f32 0.70710677, %v4568_v21  ;;  %vm1290_vm12 = vweird.f32 %v1284_v42  ;;  %vm4590_vm13 = vcmp.eq.f32.partialorder %v1294_v22, 8.507059e+37 }
 0x119   :  { %3052 = vst [vmem:[%s6399_s3 + $0xb0] sm:$0xff] %v2988_v52  ;;  %3212 = vrcp.f32 %v1324_v8  ;;  %v1334_v56 = vand.u32 2147483647, %v1324_v8  ;;  %v1336_v45 = vand.u32 2147483648, %v1324_v8  ;;  %v1349_v26 = vadd.f32 0.05243302, %v1348_v49 }
 0x11a   :  { %v3211_v7 = vpop.eup %3210  ;;  %v1360_v17 = vadd.f32 0.112945676, %v1359_v39  ;;  %v1297_v1 = vor.u32 1.1754944e-38, %v1296_v11  ;;  %v1382_v12 = vmul.f32 %v4578_v51, %v4578_v51  ;;  %v110_v58 = vmul.f32 %v4418_v47, %v42_v46 }
 0x11b   :  { %v1286_v28 = vmul.f32 %v3211_v7, %v1284_v42  ;;  %v1314_v33 = vmul.f32 %v1313_v57, %v4457_v18  ;;  %v1350_v32 = vmul.f32 %v1349_v26, %v4526_v29  ;;  %v1422_v19 = vmul.f32 %v4581_v23, %v4581_v23 }
 0x11c   :  { %v1361_v6 = vmul.f32 %v1360_v17, %v4526_v29  ;;  %vm1291_vm14 = vweird.f32 %v3211_v7  ;;  %vm1330_vm15 = vweird.f32 %v1324_v8  ;;  %v4602_v35 = vmin.f32 %v1382_v12, 16.0 }
 0x11d   :  { %v1287_v0 = vsub.f32 1.0, %v1286_v28  ;;  %vm4604_vm0 = vcmp.eq.f32.partialorder %v1334_v56, 8.507059e+37  ;;  %v1337_v4 = vor.u32 1.1754944e-38, %v1336_v45  ;;  %v1351_v31 = vadd.f32 0.18741608, %v1350_v32  ;;  %vm4616_vm1 = vmor %vm1290_vm12, %vm1291_vm14 }
 0x11e   :  { %v1362_v34 = vadd.f32 0.4994258, %v1361_v6  ;;  %v4608_v18 = vmin.f32 %v1422_v19, 16.0  ;;  %v1384_v60 = vmul.f32 2.1237322e-06, %v4602_v35  ;;  %v4613_v27 = vadd.f32 %v4437_v44, %v110_v58 }
 0x11f   :  { %v3213_v43 = vpop.eup %3212  ;;  %v1288_v30 = vmul.f32 %v3211_v7, %v1287_v0  ;;  %v1395_v53 = vmul.f32 3.8918573e-05, %v4602_v35  ;;  %v1352_v36 = vmul.f32 %v1351_v31, %v4526_v29 }
 0x120   :  { %v1326_v48 = vmul.f32 %v3213_v43, %v1324_v8  ;;  %vm1331_vm2 = vweird.f32 %v3213_v43  ;;  %v1363_v25 = vmul.f32 %v1362_v34, %v4526_v29  ;;  %v43_v13 = vld [vmem:[%s6396_s0 + $0xe8] sm:$0xff]  ;;  %v1385_v54 = vadd.f32 0.00028619796, %v1384_v60 }
 0x121   :  { %v1289_v9 = vadd.f32 %v3211_v7, %v1288_v30  ;;  %v1396_v15 = vadd.f32 0.001143296, %v1395_v53  ;;  %v1424_v37 = vmul.f32 2.1237322e-06, %v4608_v18  ;;  %v1353_v55 = vadd.f32 1.1283791, %v1352_v36  ;;  %vm4636_vm3 = vmor %vm1330_vm15, %vm1331_vm2 }
 0x122   :  { %v1327_v42 = vsub.f32 1.0, %v1326_v48  ;;  %v1364_v10 = vadd.f32 1.0, %v1363_v25  ;;  %v1435_v59 = vmul.f32 3.8918573e-05, %v4608_v18  ;;  %v1386_v24 = vmul.f32 %v1385_v54, %v4602_v35 }
 0x123   :  { %v1293_v41 = vsel %vm4616_vm1, %v3211_v7, %v1289_v9  ;;  %v1397_v29 = vmul.f32 %v1396_v15, %v4602_v35  ;;  %v1425_v16 = vadd.f32 0.00028619796, %v1424_v37  ;;  %v111_v14 = vmul.f32 %v4418_v47, %v43_v13 }
 0x124   :  { %v1298_v22 = vsel %vm4590_vm13, %v1297_v1, %v1293_v41  ;;  %v1328_v38 = vmul.f32 %v3213_v43, %v1327_v42  ;;  %3214 = vrcp.f32 %v1364_v10  ;;  %v4641_v57 = vmul.f32 %v1353_v55, %v4508_v5 }
 0x125   :  { %v1299_v52 = vmul.f32 %v1298_v22, %v1274_v63  ;;  %v1374_v49 = vand.u32 2147483647, %v1364_v10  ;;  %v4644_v39 = vmul.f32 0.70710677, %v4613_v27  ;;  %v1387_v56 = vadd.f32 0.0036580483, %v1386_v24 }
 0x126   :  { %v1329_v46 = vadd.f32 %v3213_v43, %v1328_v38  ;;  %v1398_v7 = vadd.f32 0.014752088, %v1397_v29  ;;  %v1426_v3 = vmul.f32 %v1425_v16, %v4608_v18  ;;  %vm1370_vm4 = vweird.f32 %v1364_v10 }
 0x127   :  { %v3121_v45 = vclamps-f32 %v1299_v52, 1.0  ;;  %v1376_v63 = vand.u32 2147483648, %v1364_v10  ;;  %v1436_v8 = vadd.f32 0.001143296, %v1435_v59  ;;  %v1388_v17 = vmul.f32 %v1387_v56, %v4602_v35 }
 0x128   :  { %v1333_v26 = vsel %vm4636_vm3, %v3213_v43, %v1329_v46  ;;  %v1399_v5 = vmul.f32 %v1398_v7, %v4602_v35  ;;  %v1427_v28 = vadd.f32 0.0036580483, %v1426_v3  ;;  %vm4653_vm5 = vcmp.eq.f32.partialorder %v1374_v49, 8.507059e+37 }
 0x129   :  { %v2925_v1 = vadd.f32 1.0, %v3121_v45  ;;  %v1338_v12 = vsel %vm4604_vm0, %v1337_v4, %v1333_v26  ;;  %v1437_v32 = vmul.f32 %v1436_v8, %v4608_v18  ;;  %v1389_v0 = vadd.f32 0.05243302, %v1388_v17 }
 0x12a   :  { %v3215_v6 = vpop.eup %3214  ;;  %v1339_v19 = vmul.f32 %v1338_v12, %v1314_v33  ;;  %v1400_v31 = vadd.f32 0.112945676, %v1399_v5  ;;  %v1428_v34 = vmul.f32 %v1427_v28, %v4608_v18  ;;  %v1462_v36 = vmul.f32 %v4644_v39, %v4644_v39 }
 0x12b   :  { %v2989_v43 = vmul.f32 %v2925_v1, %v4556_v40  ;;  %v1366_v30 = vmul.f32 %v3215_v6, %v1364_v10  ;;  %vm1371_vm6 = vweird.f32 %v3215_v6  ;;  %v1438_v60 = vadd.f32 0.014752088, %v1437_v32 }
 0x12c   :  { %v3122_v53 = vclamps-f32 %v1339_v19, 1.0  ;;  %v1390_v61 = vmul.f32 %v1389_v0, %v4602_v35  ;;  %v1401_v4 = vmul.f32 %v1400_v31, %v4602_v35  ;;  %v1429_v50 = vadd.f32 0.05243302, %v1428_v34  ;;  %vm4677_vm7 = vmor %vm1370_vm4, %vm1371_vm6 }
 0x12d   :  { %3053 = vst [vmem:[%s6399_s3 + $0xb8] sm:$0xff] %v2989_v43  ;;  %v1367_v33 = vsub.f32 1.0, %v1366_v30  ;;  %v1439_v48 = vmul.f32 %v1438_v60, %v4608_v18  ;;  %v4669_v40 = vadd.f32 %v4437_v44, %v111_v14  ;;  %v1377_v37 = vor.u32 1.1754944e-38, %v1376_v63 }
 0x12e   :  { %v2926_v25 = vadd.f32 1.0, %v3122_v53  ;;  %v1391_v13 = vadd.f32 0.18741608, %v1390_v61  ;;  %v1402_v9 = vadd.f32 0.4994258, %v1401_v4  ;;  %v1430_v54 = vmul.f32 %v1429_v50, %v4608_v18 }
 0x12f   :  { %v1368_v15 = vmul.f32 %v3215_v6, %v1367_v33  ;;  %v1440_v42 = vadd.f32 0.112945676, %v1439_v48  ;;  %v4672_v55 = vmin.f32 %v1462_v36, 16.0  ;;  %v4700_v45 = vmul.f32 0.5, %v4562_v2 }
 0x130   :  { %v2990_v59 = vmul.f32 %v2926_v25, %v4565_v62  ;;  %v1392_v24 = vmul.f32 %v1391_v13, %v4602_v35  ;;  %v1403_v29 = vmul.f32 %v1402_v9, %v4602_v35  ;;  %v1431_v16 = vadd.f32 0.18741608, %v1430_v54 }
 0x131   :  { %v1369_v22 = vadd.f32 %v3215_v6, %v1368_v15  ;;  %v1441_v38 = vmul.f32 %v1440_v42, %v4608_v18  ;;  %v1464_v14 = vmul.f32 2.1237322e-06, %v4672_v55  ;;  %v1475_v52 = vmul.f32 3.8918573e-05, %v4672_v55 }
 0x132   :  { %v1393_v10 = vadd.f32 1.1283791, %v1392_v24  ;;  %v1404_v11 = vadd.f32 1.0, %v1403_v29  ;;  %v4693_v35 = vmul.f32 0.70710677, %v4669_v40  ;;  %v1432_v5 = vmul.f32 %v1431_v16, %v4608_v18 }
 0x133   :  { %v1373_v49 = vsel %vm4677_vm7, %v3215_v6, %v1369_v22  ;;  %v1442_v46 = vadd.f32 0.4994258, %v1441_v38  ;;  %v1465_v56 = vadd.f32 0.00028619796, %v1464_v14  ;;  %v1476_v7 = vadd.f32 0.001143296, %v1475_v52 }
 0x134   :  { %v44_v62 = vld [vmem:[%s6396_s0 + $0xf0] sm:$0xff]  ;;  %v1378_v3 = vsel %vm4653_vm5, %v1377_v37, %v1373_v49  ;;  %3216 = vrcp.f32 %v1404_v11  ;;  %v1414_v26 = vand.u32 2147483647, %v1404_v11  ;;  %v1416_v17 = vand.u32 2147483648, %v1404_v11 }
 0x135   :  { %3054 = vst [vmem:[%s6399_s3 + $0xc0] sm:$0xff] %v2990_v59  ;;  %v112_v63 = vmul.f32 %v4418_v47, %v44_v62  ;;  %v1379_v8 = vmul.f32 %v1378_v3, %v4641_v57  ;;  %v1443_v28 = vmul.f32 %v1442_v46, %v4608_v18  ;;  %v1466_v1 = vmul.f32 %v1465_v56, %v4672_v55 }
 0x136   :  { %v1477_v12 = vmul.f32 %v1476_v7, %v4672_v55  ;;  %v1502_v58 = vmul.f32 %v4693_v35, %v4693_v35  ;;  %v1394_v57 = vmul.f32 %v1393_v10, %v4578_v51  ;;  %v4715_v6 = vmul.f32 0.5, %v4568_v21 }
 0x137   :  { %v3123_v32 = vclamps-f32 %v1379_v8, 1.0  ;;  %v4718_v19 = vmul.f32 0.5, %v4613_v27  ;;  %vm1410_vm8 = vweird.f32 %v1404_v11  ;;  %v4720_v18 = vadd.f32 1.0, %v1443_v28 }
 0x138   :  { %v1467_v0 = vadd.f32 0.0036580483, %v1466_v1  ;;  %v1478_v31 = vadd.f32 0.014752088, %v1477_v12  ;;  %v1433_v30 = vadd.f32 1.1283791, %v1432_v5  ;;  %v4734_v61 = vadd.f32 %v4437_v44, %v112_v63 }
 0x139   :  { %v2927_v43 = vadd.f32 1.0, %v3123_v32  ;;  %v4725_v60 = vmin.f32 %v1502_v58, 16.0  ;;  %vm4728_vm9 = vcmp.eq.f32.partialorder %v1414_v26, 8.507059e+37  ;;  %v1417_v27 = vor.u32 1.1754944e-38, %v1416_v17 }
 0x13a   :  { %v3217_v21 = vpop.eup %3216  ;;  %3218 = vrcp.f32 %v4720_v18  ;;  %v1468_v33 = vmul.f32 %v1467_v0, %v4672_v55  ;;  %v1454_v36 = vand.u32 2147483647, %v4720_v18  ;;  %v1479_v25 = vmul.f32 %v1478_v31, %v4672_v55 }
 0x13b   :  { %v2991_v4 = vmul.f32 %v2927_v43, %v4573_v20  ;;  %v1406_v50 = vmul.f32 %v3217_v21, %v1404_v11  ;;  %vm1411_vm10 = vweird.f32 %v3217_v21  ;;  %v1504_v13 = vmul.f32 2.1237322e-06, %v4725_v60 }
 0x13c   :  { %v45_v2 = vld [vmem:[%s6396_s0 + $0xf8] sm:$0xff]  ;;  %v46_v34 = vld [vmem:[%s6396_s0 + $0x100] sm:$0xff]  ;;  %v1469_v54 = vadd.f32 0.05243302, %v1468_v33  ;;  %v1515_v20 = vmul.f32 3.8918573e-05, %v4725_v60  ;;  %vm1450_vm11 = vweird.f32 %v4720_v18  ;;  %vm4757_vm12 = vmor %vm1410_vm8, %vm1411_vm10 }
 0x13d   :  { %v113_v51 = vmul.f32 %v4418_v47, %v45_v2  ;;  %v114_v48 = vmul.f32 %v4418_v47, %v46_v34  ;;  %3055 = vst [vmem:[%s6399_s3 + $0xc8] sm:$0xff] %v2991_v4  ;;  %v1407_v9 = vsub.f32 1.0, %v1406_v50  ;;  %v1456_v37 = vand.u32 2147483648, %v4720_v18 }
 0x13e   :  { %v1480_v42 = vadd.f32 0.112945676, %v1479_v25  ;;  %v1505_v59 = vadd.f32 0.00028619796, %v1504_v13  ;;  %v1470_v24 = vmul.f32 %v1469_v54, %v4672_v55  ;;  %v1516_v29 = vadd.f32 0.001143296, %v1515_v20 }
 0x13f   :  { %v4747_v15 = vadd.f32 %v4437_v44, %v113_v51  ;;  %v1408_v41 = vmul.f32 %v3217_v21, %v1407_v9  ;;  %v4753_v16 = vmul.f32 0.70710677, %v4734_v61  ;;  %v4767_v10 = vadd.f32 %v4437_v44, %v114_v48 }
 0x140   :  { %v3219_v22 = vpop.eup %3218  ;;  %v1481_v14 = vmul.f32 %v1480_v42, %v4672_v55  ;;  %v1506_v52 = vmul.f32 %v1505_v59, %v4725_v60  ;;  %v1471_v56 = vadd.f32 0.18741608, %v1470_v24  ;;  %v1517_v3 = vmul.f32 %v1516_v29, %v4725_v60 }
 0x141   :  { %v4764_v62 = vmul.f32 0.70710677, %v4747_v15  ;;  %v1409_v49 = vadd.f32 %v3217_v21, %v1408_v41  ;;  %v1446_v46 = vmul.f32 %v3219_v22, %v4720_v18  ;;  %vm1451_vm13 = vweird.f32 %v3219_v22 }
 0x142   :  { %v1482_v11 = vadd.f32 0.4994258, %v1481_v14  ;;  %v1507_v7 = vadd.f32 0.0036580483, %v1506_v52  ;;  %v1542_v63 = vmul.f32 %v4753_v16, %v4753_v16  ;;  %v1472_v17 = vmul.f32 %v1471_v56, %v4672_v55  ;;  %vm4785_vm14 = vmor %vm1450_vm11, %vm1451_vm13 }
 0x143   :  { %v1413_v8 = vsel %vm4757_vm12, %v3217_v21, %v1409_v49  ;;  %v1447_v26 = vsub.f32 1.0, %v1446_v46  ;;  %v1582_v5 = vmul.f32 %v4764_v62, %v4764_v62  ;;  %v1518_v58 = vadd.f32 0.014752088, %v1517_v3 }
 0x144   :  { %v1418_v28 = vsel %vm4728_vm9, %v1417_v27, %v1413_v8  ;;  %v1483_v1 = vmul.f32 %v1482_v11, %v4672_v55  ;;  %v1508_v12 = vmul.f32 %v1507_v7, %v4725_v60  ;;  %v1457_v0 = vor.u32 1.1754944e-38, %v1456_v37 }
 0x145   :  { %v1419_v2 = vmul.f32 %v1418_v28, %v1394_v57  ;;  %v1448_v32 = vmul.f32 %v3219_v22, %v1447_v26  ;;  %v1473_v31 = vadd.f32 1.1283791, %v1472_v17  ;;  %v1519_v21 = vmul.f32 %v1518_v58, %v4725_v60 }
 0x146   :  { %v1484_v43 = vadd.f32 1.0, %v1483_v1  ;;  %v1509_v51 = vadd.f32 0.05243302, %v1508_v12  ;;  %v4790_v53 = vmin.f32 %v1542_v63, 16.0  ;;  %v1434_v27 = vmul.f32 %v1433_v30, %v4581_v23 }
 0x147   :  { %v3124_v55 = vclamps-f32 %v1419_v2, 1.0  ;;  %v1449_v57 = vadd.f32 %v3219_v22, %v1448_v32  ;;  %vm1455_vm15 = vcmp.eq.f32.partialorder %v1454_v36, 8.507059e+37  ;;  %v4794_v50 = vmin.f32 %v1582_v5, 16.0 }
 0x148   :  { %3220 = vrcp.f32 %v1484_v43  ;;  %v1544_v4 = vmul.f32 2.1237322e-06, %v4790_v53  ;;  %v4797_v18 = vmul.f32 0.70710677, %v4767_v10  ;;  %v1510_v25 = vmul.f32 %v1509_v51, %v4725_v60 }
 0x149   :  { %v2928_v33 = vadd.f32 1.0, %v3124_v55  ;;  %v1453_v48 = vsel %vm4785_vm14, %v3219_v22, %v1449_v57  ;;  %v1520_v13 = vadd.f32 0.112945676, %v1519_v21  ;;  %v4803_v23 = vmul.f32 %v1473_v31, %v4644_v39 }
 0x14a   :  { %v1458_v9 = vsel %vm1455_vm15, %v1457_v0, %v1453_v48  ;;  %v1494_v30 = vand.u32 2147483647, %v1484_v43  ;;  %v4806_v36 = vmul.f32 0.5, %v4669_v40  ;;  %v1511_v37 = vadd.f32 0.18741608, %v1510_v25 }
 0x14b   :  { %v2992_v54 = vmul.f32 %v2928_v33, %v4700_v45  ;;  %v1459_v20 = vmul.f32 %v1458_v9, %v1434_v27  ;;  %v1521_v42 = vmul.f32 %v1520_v13, %v4725_v60  ;;  %v1545_v59 = vadd.f32 0.00028619796, %v1544_v4 }
 0x14c   :  { %v1555_v41 = vmul.f32 3.8918573e-05, %v4790_v53  ;;  %v1584_v24 = vmul.f32 2.1237322e-06, %v4794_v50  ;;  %v1622_v29 = vmul.f32 %v4797_v18, %v4797_v18  ;;  %vm1490_vm0 = vweird.f32 %v1484_v43 }
 0x14d   :  { %3056 = vst [vmem:[%s6399_s3 + $0xd0] sm:$0xff] %v2992_v54  ;;  %v3125_v39 = vclamps-f32 %v1459_v20, 1.0  ;;  %v1522_v40 = vadd.f32 0.4994258, %v1521_v42  ;;  %v1595_v45 = vmul.f32 3.8918573e-05, %v4794_v50  ;;  %v1546_v14 = vmul.f32 %v1545_v59, %v4790_v53 }
 0x14e   :  { %v3221_v22 = vpop.eup %3220  ;;  %v1496_v38 = vand.u32 2147483648, %v1484_v43  ;;  %v1556_v52 = vadd.f32 0.001143296, %v1555_v41  ;;  %v1585_v49 = vadd.f32 0.00028619796, %v1584_v24  ;;  %v1512_v11 = vmul.f32 %v1511_v37, %v4725_v60 }
 0x14f   :  { %v2929_v46 = vadd.f32 1.0, %v3125_v39  ;;  %v1486_v56 = vmul.f32 %v3221_v22, %v1484_v43  ;;  %v4820_v7 = vmin.f32 %v1622_v29, 16.0  ;;  %v1523_v3 = vmul.f32 %v1522_v40, %v4725_v60 }
 0x150   :  { %v1547_v63 = vadd.f32 0.0036580483, %v1546_v14  ;;  %v1557_v8 = vmul.f32 %v1556_v52, %v4790_v53  ;;  %v1586_v26 = vmul.f32 %v1585_v49, %v4794_v50  ;;  %vm1491_vm1 = vweird.f32 %v3221_v22 }
 0x151   :  { %v2993_v17 = vmul.f32 %v2929_v46, %v4715_v6  ;;  %v1487_v5 = vsub.f32 1.0, %v1486_v56  ;;  %v1596_v28 = vadd.f32 0.001143296, %v1595_v45  ;;  %v4826_v1 = vadd.f32 1.0, %v1523_v3  ;;  %vm4839_vm3 = vmor %vm1490_vm0, %vm1491_vm1 }
 0x152   :  { %v1548_v12 = vmul.f32 %v1547_v63, %v4790_v53  ;;  %v1558_v58 = vadd.f32 0.014752088, %v1557_v8  ;;  %v1587_v2 = vadd.f32 0.0036580483, %v1586_v26  ;;  %vm4832_vm2 = vcmp.eq.f32.partialorder %v1494_v30, 8.507059e+37 }
 0x153   :  { %3057 = vst [vmem:[%s6399_s3 + $0xd8] sm:$0xff] %v2993_v17  ;;  %v1488_v60 = vmul.f32 %v3221_v22, %v1487_v5  ;;  %v1597_v6 = vmul.f32 %v1596_v28, %v4794_v50  ;;  %v1624_v0 = vmul.f32 2.1237322e-06, %v4820_v7  ;;  %v1497_v34 = vor.u32 1.1754944e-38, %v1496_v38 }
 0x154   :  { %3222 = vrcp.f32 %v4826_v1  ;;  %v4845_v51 = vmul.f32 0.5, %v4734_v61  ;;  %v1635_v21 = vmul.f32 3.8918573e-05, %v4820_v7  ;;  %v1549_v27 = vadd.f32 0.05243302, %v1548_v12 }
 0x155   :  { %v1489_v55 = vadd.f32 %v3221_v22, %v1488_v60  ;;  %v1559_v57 = vmul.f32 %v1558_v58, %v4790_v53  ;;  %v1588_v4 = vmul.f32 %v1587_v2, %v4794_v50  ;;  %v1513_v33 = vadd.f32 1.1283791, %v1512_v11 }
 0x156   :  { %vm1530_vm4 = vweird.f32 %v4826_v1  ;;  %v1598_v43 = vadd.f32 0.014752088, %v1597_v6  ;;  %v1625_v48 = vadd.f32 0.00028619796, %v1624_v0  ;;  %v1534_v13 = vand.u32 2147483647, %v4826_v1 }
 0x157   :  { %v1493_v25 = vsel %vm4839_vm3, %v3221_v22, %v1489_v55  ;;  %v1550_v61 = vmul.f32 %v1549_v27, %v4790_v53  ;;  %v1560_v9 = vadd.f32 0.112945676, %v1559_v57  ;;  %v1589_v54 = vadd.f32 0.05243302, %v1588_v4 }
 0x158   :  { %v1498_v30 = vsel %vm4832_vm2, %v1497_v34, %v1493_v25  ;;  %v1599_v20 = vmul.f32 %v1598_v43, %v4794_v50  ;;  %v1626_v37 = vmul.f32 %v1625_v48, %v4820_v7  ;;  %v1636_v24 = vadd.f32 0.001143296, %v1635_v21 }
 0x159   :  { %v1499_v42 = vmul.f32 %v1498_v30, %v4803_v23  ;;  %v1551_v59 = vadd.f32 0.18741608, %v1550_v61  ;;  %v1561_v41 = vmul.f32 %v1560_v9, %v4790_v53  ;;  %v1536_v39 = vand.u32 2147483648, %v4826_v1 }
 0x15a   :  { %v3223_v29 = vpop.eup %3222  ;;  %v1590_v40 = vmul.f32 %v1589_v54, %v4794_v50  ;;  %v1600_v45 = vadd.f32 0.112945676, %v1599_v20  ;;  %v1627_v22 = vadd.f32 0.0036580483, %v1626_v37  ;;  %v1637_v8 = vmul.f32 %v1636_v24, %v4820_v7  ;;  %v47_v32 = vld [vmem:[%s6396_s0 + $0x108] sm:$0xff]  ;;  %v48_v31 = vld [vmem:[%s6396_s0 + $0x110] sm:$0xff] }
 0x15b   :  { %v3126_v38 = vclamps-f32 %v1499_v42, 1.0  ;;  %v1526_v14 = vmul.f32 %v3223_v29, %v4826_v1  ;;  %vm1531_vm5 = vweird.f32 %v3223_v29  ;;  %v1552_v52 = vmul.f32 %v1551_v59, %v4790_v53 }
 0x15c   :  { %v1562_v49 = vadd.f32 0.4994258, %v1561_v41  ;;  %v1591_v46 = vadd.f32 0.18741608, %v1590_v40  ;;  %v1601_v23 = vmul.f32 %v1600_v45, %v4794_v50  ;;  %v1628_v56 = vmul.f32 %v1627_v22, %v4820_v7  ;;  %vm4878_vm6 = vmor %vm1530_vm4, %vm1531_vm5 }
 0x15d   :  { %v2930_v11 = vadd.f32 1.0, %v3126_v38  ;;  %v1527_v3 = vsub.f32 1.0, %v1526_v14  ;;  %v1553_v63 = vadd.f32 1.1283791, %v1552_v52  ;;  %v1514_v58 = vmul.f32 %v1513_v33, %v4693_v35 }
 0x15e   :  { %v1563_v26 = vmul.f32 %v1562_v49, %v4790_v53  ;;  %v1592_v17 = vmul.f32 %v1591_v46, %v4794_v50  ;;  %v1602_v5 = vadd.f32 0.4994258, %v1601_v23  ;;  %v1629_v28 = vadd.f32 0.05243302, %v1628_v56 }
 0x15f   :  { %v2994_v12 = vmul.f32 %v2930_v11, %v4718_v19  ;;  %v1528_v2 = vmul.f32 %v3223_v29, %v1527_v3  ;;  %v1638_v60 = vadd.f32 0.014752088, %v1637_v8  ;;  %v1537_v53 = vor.u32 1.1754944e-38, %v1536_v39 }
 0x160   :  { %v4882_v0 = vadd.f32 1.0, %v1563_v26  ;;  %v1603_v19 = vmul.f32 %v1602_v5, %v4794_v50  ;;  %v1630_v35 = vmul.f32 %v1629_v28, %v4820_v7  ;;  %vm1535_vm7 = vcmp.eq.f32.partialorder %v1534_v13, 8.507059e+37 }
 0x161   :  { %3058 = vst [vmem:[%s6399_s3 + $0xe0] sm:$0xff] %v2994_v12  ;;  %v1529_v1 = vadd.f32 %v3223_v29, %v1528_v2  ;;  %v4893_v34 = vmul.f32 0.5, %v4747_v15  ;;  %v1639_v21 = vmul.f32 %v1638_v60, %v4820_v7  ;;  %v4897_v55 = vmul.f32 %v1553_v63, %v4753_v16 }
 0x162   :  { %3224 = vrcp.f32 %v4882_v0  ;;  %v1593_v50 = vadd.f32 1.1283791, %v1592_v17  ;;  %v115_v27 = vmul.f32 %v4418_v47, %v47_v32  ;;  %v4903_v4 = vadd.f32 1.0, %v1603_v19 }
 0x163   :  { %v1533_v57 = vsel %vm4878_vm6, %v3223_v29, %v1529_v1  ;;  %v1631_v33 = vadd.f32 0.18741608, %v1630_v35  ;;  %v116_v43 = vmul.f32 %v4418_v47, %v48_v31  ;;  %v1574_v48 = vand.u32 2147483647, %v4882_v0  ;;  %v4993_v1 = vld [vmem:[%s6398_s2] ss:$0 sm:$0xff] }
 0x164   :  { %v1538_v15 = vsel %vm1535_vm7, %v1537_v53, %v1533_v57  ;;  %v1576_v25 = vand.u32 2147483648, %v4882_v0  ;;  %v1640_v16 = vadd.f32 0.112945676, %v1639_v21  ;;  %vm1570_vm8 = vweird.f32 %v4882_v0 }
 0x165   :  { %v1539_v61 = vmul.f32 %v1538_v15, %v1514_v58  ;;  %3226 = vrcp.f32 %v4903_v4  ;;  %v1614_v9 = vand.u32 2147483647, %v4903_v4  ;;  %v1616_v30 = vand.u32 2147483648, %v4903_v4 }
 0x166   :  { %v1632_v54 = vmul.f32 %v1631_v33, %v4820_v7  ;;  %v1641_v20 = vmul.f32 %v1640_v16, %v4820_v7  ;;  %v4918_v37 = vadd.f32 %v4437_v44, %v115_v27  ;;  %v4921_v59 = vmul.f32 %v1593_v50, %v4764_v62 }
 0x167   :  { %v3127_v42 = vclamps-f32 %v1539_v61, 1.0  ;;  %v4924_v41 = vadd.f32 %v4437_v44, %v116_v43  ;;  %vm4927_vm9 = vcmp.eq.f32.partialorder %v1574_v48, 8.507059e+37  ;;  %v1577_v40 = vor.u32 1.1754944e-38, %v1576_v25 }
 0x168   :  { %v49_v13 = vld [vmem:[%s6396_s0 + $0x118] sm:$0xff]  ;;  %v3225_v29 = vpop.eup %3224  ;;  %vm1610_vm10 = vweird.f32 %v4903_v4  ;;  %v1642_v45 = vadd.f32 0.4994258, %v1641_v20  ;;  %v1633_v14 = vadd.f32 1.1283791, %v1632_v54  ;;  %vm4939_vm11 = vcmp.eq.f32.partialorder %v1614_v9, 8.507059e+37 }
 0x169   :  { %v117_v24 = vmul.f32 %v4418_v47, %v49_v13  ;;  %v2931_v22 = vadd.f32 1.0, %v3127_v42  ;;  %v1566_v38 = vmul.f32 %v3225_v29, %v4882_v0  ;;  %v4934_v62 = vmul.f32 0.70710677, %v4918_v37  ;;  %v50_v47 = vld [vmem:[%s6396_s0 + $0x120] sm:$0xff] }
 0x16a   :  { %v1617_v49 = vor.u32 1.1754944e-38, %v1616_v30  ;;  %v1643_v46 = vmul.f32 %v1642_v45, %v4820_v7  ;;  %v4945_v23 = vmul.f32 0.70710677, %v4924_v41  ;;  %vm1571_vm12 = vweird.f32 %v3225_v29 }
 0x16b   :  { %v4948_v56 = vadd.f32 %v4437_v44, %v117_v24  ;;  %v3227_v11 = vpop.eup %3226  ;;  %v2995_v3 = vmul.f32 %v2931_v22, %v4806_v36  ;;  %v1567_v63 = vsub.f32 1.0, %v1566_v38  ;;  %v1662_v8 = vmul.f32 %v4934_v62, %v4934_v62  ;;  %v4961_v44 = vld [vmem:[%s6397_s1] ss:$0 sm:$0xff]  ;;  %vm4977_vm13 = vmor %vm1570_vm8, %vm1571_vm12 }
 0x16c   :  { %v1606_v26 = vmul.f32 %v3227_v11, %v4903_v4  ;;  %v4954_v17 = vadd.f32 1.0, %v1643_v46  ;;  %v1702_v7 = vmul.f32 %v4945_v23, %v4945_v23  ;;  %v118_v5 = vmul.f32 %v4961_v44, %v50_v47 }
 0x16d   :  { %3059 = vst [vmem:[%s6399_s3 + $0xe8] sm:$0xff] %v2995_v3  ;;  %v1568_v36 = vmul.f32 %v3225_v29, %v1567_v63  ;;  %v4968_v28 = vmul.f32 %v1633_v14, %v4797_v18  ;;  %v4970_v12 = vmin.f32 %v1662_v8, 16.0  ;;  %v4973_v58 = vmul.f32 0.70710677, %v4948_v56 }
 0x16e   :  { %v1607_v60 = vsub.f32 1.0, %v1606_v26  ;;  %vm1611_vm14 = vweird.f32 %v3227_v11  ;;  %3228 = vrcp.f32 %v4954_v17  ;;  %v1654_v32 = vand.u32 2147483647, %v4954_v17 }
 0x16f   :  { %v1569_v6 = vadd.f32 %v3225_v29, %v1568_v36  ;;  %v1656_v18 = vand.u32 2147483648, %v4954_v17  ;;  %v1664_v53 = vmul.f32 2.1237322e-06, %v4970_v12  ;;  %v1675_v19 = vmul.f32 3.8918573e-05, %v4970_v12  ;;  %vm5002_vm15 = vmor %vm1610_vm10, %vm1611_vm14 }
 0x170   :  { %v1608_v35 = vmul.f32 %v3227_v11, %v1607_v60  ;;  %v4986_v31 = vmin.f32 %v1702_v7, 16.0  ;;  %v1742_v0 = vmul.f32 %v4973_v58, %v4973_v58  ;;  %v4996_v21 = vadd.f32 %v4993_v1, %v118_v5 }
 0x171   :  { %v1573_v50 = vsel %vm4977_vm13, %v3225_v29, %v1569_v6  ;;  %vm1650_vm0 = vweird.f32 %v4954_v17  ;;  %v1665_v57 = vadd.f32 0.00028619796, %v1664_v53  ;;  %v1676_v33 = vadd.f32 0.001143296, %v1675_v19 }
 0x172   :  { %v1578_v43 = vsel %vm4927_vm9, %v1577_v40, %v1573_v50  ;;  %v1609_v15 = vadd.f32 %v3227_v11, %v1608_v35  ;;  %v1704_v48 = vmul.f32 2.1237322e-06, %v4986_v31  ;;  %v1715_v25 = vmul.f32 3.8918573e-05, %v4986_v31 }
 0x173   :  { %v1579_v16 = vmul.f32 %v1578_v43, %v4897_v55  ;;  %vm5012_vm1 = vcmp.eq.f32.partialorder %v1654_v32, 8.507059e+37  ;;  %v1657_v13 = vor.u32 1.1754944e-38, %v1656_v18  ;;  %v1666_v61 = vmul.f32 %v1665_v57, %v4970_v12 }
 0x174   :  { %v1677_v9 = vmul.f32 %v1676_v33, %v4970_v12  ;;  %v3229_v30 = vpop.eup %3228  ;;  %v1613_v54 = vsel %vm5002_vm15, %v3227_v11, %v1609_v15  ;;  %v1705_v20 = vadd.f32 0.00028619796, %v1704_v48  ;;  %v1716_v42 = vadd.f32 0.001143296, %v1715_v25 }
 0x175   :  { %v5020_v24 = vmin.f32 %v1742_v0, 16.0  ;;  %v3128_v29 = vclamps-f32 %v1579_v16, 1.0  ;;  %v1618_v55 = vsel %vm4939_vm11, %v1617_v49, %v1613_v54  ;;  %v1646_v39 = vmul.f32 %v3229_v30, %v4954_v17 }
 0x176   :  { %vm1651_vm2 = vweird.f32 %v3229_v30  ;;  %v1619_v40 = vmul.f32 %v1618_v55, %v4921_v59  ;;  %v1667_v45 = vadd.f32 0.0036580483, %v1666_v61  ;;  %v1678_v22 = vadd.f32 0.014752088, %v1677_v9 }
 0x177   :  { %v1706_v38 = vmul.f32 %v1705_v20, %v4986_v31  ;;  %v2932_v14 = vadd.f32 1.0, %v3128_v29  ;;  %v1647_v47 = vsub.f32 1.0, %v1646_v39  ;;  %v1717_v46 = vmul.f32 %v1716_v42, %v4986_v31  ;;  %vm5038_vm3 = vmor %vm1650_vm0, %vm1651_vm2 }
 0x178   :  { %v1744_v11 = vmul.f32 2.1237322e-06, %v5020_v24  ;;  %v3129_v3 = vclamps-f32 %v1619_v40, 1.0  ;;  %v1668_v63 = vmul.f32 %v1667_v45, %v4970_v12  ;;  %v1679_v52 = vmul.f32 %v1678_v22, %v4970_v12 }
 0x179   :  { %v1707_v49 = vadd.f32 0.0036580483, %v1706_v38  ;;  %v2996_v8 = vmul.f32 %v2932_v14, %v4845_v51  ;;  %v1648_v26 = vmul.f32 %v3229_v30, %v1647_v47  ;;  %v1718_v59 = vadd.f32 0.014752088, %v1717_v46 }
 0x17a   :  { %v5033_v7 = vmul.f32 0.70710677, %v4996_v21  ;;  %v2933_v5 = vadd.f32 1.0, %v3129_v3  ;;  %v1669_v2 = vadd.f32 0.05243302, %v1668_v63  ;;  %v246_v50 = vmul.f32 0.5, %v4767_v10 }
 0x17b   :  { %v1680_v60 = vadd.f32 0.112945676, %v1679_v52  ;;  %v1708_v32 = vmul.f32 %v1707_v49, %v4986_v31  ;;  %3060 = vst [vmem:[%s6399_s3 + $0xf0] sm:$0xff] %v2996_v8  ;;  %v1649_v51 = vadd.f32 %v3229_v30, %v1648_v26  ;;  %v1719_v6 = vmul.f32 %v1718_v59, %v4986_v31 }
 0x17c   :  { %v1745_v18 = vadd.f32 0.00028619796, %v1744_v11  ;;  %v1755_v53 = vmul.f32 3.8918573e-05, %v5020_v24  ;;  %v2997_v17 = vmul.f32 %v2933_v5, %v4893_v34  ;;  %v1670_v19 = vmul.f32 %v1669_v2, %v4970_v12 }
 0x17d   :  { %v1681_v35 = vmul.f32 %v1680_v60, %v4970_v12  ;;  %v1709_v0 = vadd.f32 0.05243302, %v1708_v32  ;;  %v1653_v27 = vsel %vm5038_vm3, %v3229_v30, %v1649_v51  ;;  %v1720_v57 = vadd.f32 0.112945676, %v1719_v6 }
 0x17e   :  { %v1746_v33 = vmul.f32 %v1745_v18, %v5020_v24  ;;  %3061 = vst [vmem:[%s6399_s3 + $0xf8] sm:$0xff] %v2997_v17  ;;  %v1658_v34 = vsel %vm5012_vm1, %v1657_v13, %v1653_v27  ;;  %v1671_v43 = vadd.f32 0.18741608, %v1670_v19  ;;  %v1756_v61 = vadd.f32 0.001143296, %v1755_v53 }
 0x17f   :  { %v1682_v15 = vadd.f32 0.4994258, %v1681_v35  ;;  %v1710_v48 = vmul.f32 %v1709_v0, %v4986_v31  ;;  %v1659_v25 = vmul.f32 %v1658_v34, %v4968_v28  ;;  %v1721_v10 = vmul.f32 %v1720_v57, %v4986_v31 }
 0x180   :  { %v1747_v16 = vadd.f32 0.0036580483, %v1746_v33  ;;  %v1672_v9 = vmul.f32 %v1671_v43, %v4970_v12  ;;  %v1782_v20 = vmul.f32 %v5033_v7, %v5033_v7  ;;  %v1757_v29 = vmul.f32 %v1756_v61, %v5020_v24 }
 0x181   :  { %v1683_v30 = vmul.f32 %v1682_v15, %v4970_v12  ;;  %v1711_v54 = vadd.f32 0.18741608, %v1710_v48  ;;  %v3130_v4 = vclamps-f32 %v1659_v25, 1.0  ;;  %v1722_v13 = vadd.f32 0.4994258, %v1721_v10 }
 0x182   :  { %v1748_v42 = vmul.f32 %v1747_v16, %v5020_v24  ;;  %v1758_v45 = vadd.f32 0.014752088, %v1757_v29  ;;  %v1673_v22 = vadd.f32 1.1283791, %v1672_v9  ;;  %v5071_v38 = vmin.f32 %v1782_v20, 16.0 }
 0x183   :  { %v1684_v55 = vadd.f32 1.0, %v1683_v30  ;;  %v2934_v28 = vadd.f32 1.0, %v3130_v4  ;;  %v1723_v39 = vmul.f32 %v1722_v13, %v4986_v31  ;;  %v1712_v12 = vmul.f32 %v1711_v54, %v4986_v31 }
 0x184   :  { %v1749_v40 = vadd.f32 0.05243302, %v1748_v42  ;;  %v1759_v63 = vmul.f32 %v1758_v45, %v5020_v24  ;;  %v1784_v52 = vmul.f32 2.1237322e-06, %v5071_v38  ;;  %v5083_v31 = vmul.f32 0.5, %v4918_v37 }
 0x185   :  { %3230 = vrcp.f32 %v1684_v55  ;;  %v2998_v14 = vmul.f32 %v2934_v28, %v246_v50  ;;  %v1694_v47 = vand.u32 2147483647, %v1684_v55  ;;  %v1696_v46 = vand.u32 2147483648, %v1684_v55  ;;  %v51_v49 = vld [vmem:[%s6396_s0 + $0x128] sm:$0xff] }
 0x186   :  { %v1724_v11 = vadd.f32 1.0, %v1723_v39  ;;  %v1750_v3 = vmul.f32 %v1749_v40, %v5020_v24  ;;  %v5086_v8 = vmul.f32 0.5, %v4924_v41  ;;  %v5089_v26 = vmul.f32 0.5, %v4948_v56 }
 0x187   :  { %3062 = vst [vmem:[%s6399_s3 + $0x100] sm:$0xff] %v2998_v14  ;;  %v1674_v5 = vmul.f32 %v1673_v22, %v4934_v62  ;;  %vm1690_vm4 = vweird.f32 %v1684_v55  ;;  %v1697_v36 = vor.u32 1.1754944e-38, %v1696_v46  ;;  %v1713_v2 = vadd.f32 1.1283791, %v1712_v12 }
 0x188   :  { %3232 = vrcp.f32 %v1724_v11  ;;  %vm5095_vm5 = vcmp.eq.f32.partialorder %v1694_v47, 8.507059e+37  ;;  %v1760_v37 = vadd.f32 0.112945676, %v1759_v63  ;;  %v1785_v41 = vadd.f32 0.00028619796, %v1784_v52 }
 0x189   :  { %v1795_v32 = vmul.f32 3.8918573e-05, %v5071_v38  ;;  %v119_v56 = vmul.f32 %v4961_v44, %v51_v49  ;;  %vm1730_vm6 = vweird.f32 %v1724_v11  ;;  %v1734_v6 = vand.u32 2147483647, %v1724_v11 }
 0x18a   :  { %v1751_v18 = vadd.f32 0.18741608, %v1750_v3  ;;  %v1736_v19 = vand.u32 2147483648, %v1724_v11  ;;  %v1761_v35 = vmul.f32 %v1760_v37, %v5020_v24  ;;  %v1786_v0 = vmul.f32 %v1785_v41, %v5071_v38 }
 0x18b   :  { %v3231_v51 = vpop.eup %3230  ;;  %v1796_v50 = vadd.f32 0.001143296, %v1795_v32  ;;  %v5108_v27 = vadd.f32 %v4993_v1, %v119_v56  ;;  %vm5136_vm10 = vcmp.eq.f32.partialorder %v1734_v6, 8.507059e+37 }
 0x18c   :  { %v1686_v17 = vmul.f32 %v3231_v51, %v1684_v55  ;;  %vm1691_vm7 = vweird.f32 %v3231_v51  ;;  %v1762_v43 = vadd.f32 0.4994258, %v1761_v35  ;;  %v1787_v15 = vadd.f32 0.0036580483, %v1786_v0 }
 0x18d   :  { %v1752_v10 = vmul.f32 %v1751_v18, %v5020_v24  ;;  %v1797_v16 = vmul.f32 %v1796_v50, %v5071_v38  ;;  %v5119_v54 = vmul.f32 0.70710677, %v5108_v27  ;;  %vm5123_vm9 = vmor %vm1690_vm4, %vm1691_vm7  ;;  %v1714_v55 = vmul.f32 %v1713_v2, %v4945_v23 }
 0x18e   :  { %v52_v59 = vld [vmem:[%s6396_s0 + $0x130] sm:$0xff]  ;;  %v53_v62 = vld [vmem:[%s6396_s0 + $0x138] sm:$0xff]  ;;  %v3233_v33 = vpop.eup %3232  ;;  %v1687_v34 = vsub.f32 1.0, %v1686_v17  ;;  %v1763_v9 = vmul.f32 %v1762_v43, %v5020_v24  ;;  %v1788_v30 = vmul.f32 %v1787_v15, %v5071_v38  ;;  %v1737_v46 = vor.u32 1.1754944e-38, %v1736_v19 }
 0x18f   :  { %v120_v53 = vmul.f32 %v4961_v44, %v52_v59  ;;  %v121_v48 = vmul.f32 %v4961_v44, %v53_v62  ;;  %v1726_v25 = vmul.f32 %v3233_v33, %v1724_v11  ;;  %vm1731_vm8 = vweird.f32 %v3233_v33 }
 0x190   :  { %v1688_v61 = vmul.f32 %v3231_v51, %v1687_v34  ;;  %v1798_v13 = vadd.f32 0.014752088, %v1797_v16  ;;  %v1764_v28 = vadd.f32 1.0, %v1763_v9  ;;  %v1789_v39 = vadd.f32 0.05243302, %v1788_v30  ;;  %vm5145_vm11 = vmor %vm1730_vm6, %vm1731_vm8 }
 0x191   :  { %v5111_v57 = vadd.f32 %v4993_v1, %v120_v53  ;;  %v1727_v4 = vsub.f32 1.0, %v1726_v25  ;;  %v5131_v29 = vadd.f32 %v4993_v1, %v121_v48  ;;  %v1822_v40 = vmul.f32 %v5119_v54, %v5119_v54 }
 0x192   :  { %v1689_v24 = vadd.f32 %v3231_v51, %v1688_v61  ;;  %v1799_v12 = vmul.f32 %v1798_v13, %v5071_v38  ;;  %v1753_v3 = vadd.f32 1.1283791, %v1752_v10  ;;  %3234 = vrcp.f32 %v1764_v28 }
 0x193   :  { %v5128_v42 = vmul.f32 0.70710677, %v5111_v57  ;;  %v1728_v45 = vmul.f32 %v3233_v33, %v1727_v4  ;;  %v1790_v52 = vmul.f32 %v1789_v39, %v5071_v38  ;;  %v5154_v37 = vmin.f32 %v1822_v40, 16.0 }
 0x194   :  { %v1693_v14 = vsel %vm5123_vm9, %v3231_v51, %v1689_v24  ;;  %v1800_v2 = vadd.f32 0.112945676, %v1799_v12  ;;  %v5157_v11 = vmul.f32 0.70710677, %v5131_v29  ;;  %vm1770_vm12 = vweird.f32 %v1764_v28 }
 0x195   :  { %v1698_v23 = vsel %vm5095_vm5, %v1697_v36, %v1693_v14  ;;  %v1729_v63 = vadd.f32 %v3233_v33, %v1728_v45  ;;  %v1862_v49 = vmul.f32 %v5128_v42, %v5128_v42  ;;  %v1774_v32 = vand.u32 2147483647, %v1764_v28 }
 0x196   :  { %v1699_v59 = vmul.f32 %v1698_v23, %v1674_v5  ;;  %v1791_v60 = vadd.f32 0.18741608, %v1790_v52  ;;  %v1801_v51 = vmul.f32 %v1800_v2, %v5071_v38  ;;  %v1824_v5 = vmul.f32 2.1237322e-06, %v5154_v37 }
 0x197   :  { %v1733_v41 = vsel %vm5145_vm11, %v3233_v33, %v1729_v63  ;;  %v1776_v18 = vand.u32 2147483648, %v1764_v28  ;;  %v1835_v62 = vmul.f32 3.8918573e-05, %v5154_v37  ;;  %v5167_v50 = vmin.f32 %v1862_v49, 16.0 }
 0x198   :  { %v3131_v36 = vclamps-f32 %v1699_v59, 1.0  ;;  %v1738_v56 = vsel %vm5136_vm10, %v1737_v46, %v1733_v41  ;;  %v1792_v53 = vmul.f32 %v1791_v60, %v5071_v38  ;;  %v3235_v17 = vpop.eup %3234  ;;  %v1802_v35 = vadd.f32 0.4994258, %v1801_v51 }
 0x199   :  { %v1739_v6 = vmul.f32 %v1738_v56, %v1714_v55  ;;  %v1825_v0 = vadd.f32 0.00028619796, %v1824_v5  ;;  %v1766_v34 = vmul.f32 %v3235_v17, %v1764_v28  ;;  %vm1771_vm13 = vweird.f32 %v3235_v17 }
 0x19a   :  { %v2935_v19 = vadd.f32 1.0, %v3131_v36  ;;  %v1902_v43 = vmul.f32 %v5157_v11, %v5157_v11  ;;  %v1803_v48 = vmul.f32 %v1802_v35, %v5071_v38  ;;  %v1836_v10 = vadd.f32 0.001143296, %v1835_v62  ;;  %vm5184_vm14 = vmor %vm1770_vm12, %vm1771_vm13 }
 0x19b   :  { %v3132_v33 = vclamps-f32 %v1739_v6, 1.0  ;;  %v1826_v25 = vmul.f32 %v1825_v0, %v5154_v37  ;;  %v1767_v61 = vsub.f32 1.0, %v1766_v34  ;;  %v1793_v9 = vadd.f32 1.1283791, %v1792_v53 }
 0x19c   :  { %v2999_v15 = vmul.f32 %v2935_v19, %v5083_v31  ;;  %v1864_v30 = vmul.f32 2.1237322e-06, %v5167_v50  ;;  %v1804_v20 = vadd.f32 1.0, %v1803_v48  ;;  %v1837_v13 = vmul.f32 %v1836_v10, %v5154_v37 }
 0x19d   :  { %v2936_v16 = vadd.f32 1.0, %v3132_v33  ;;  %v1827_v4 = vadd.f32 0.0036580483, %v1826_v25  ;;  %v1875_v31 = vmul.f32 3.8918573e-05, %v5167_v50  ;;  %v1754_v24 = vmul.f32 %v1753_v3, %v4973_v58 }
 0x19e   :  { %3063 = vst [vmem:[%s6399_s3 + $0x108] sm:$0xff] %v2999_v15  ;;  %v1768_v39 = vmul.f32 %v3235_v17, %v1767_v61  ;;  %v1865_v40 = vadd.f32 0.00028619796, %v1864_v30  ;;  %vm5188_vm15 = vcmp.eq.f32.partialorder %v1774_v32, 8.507059e+37  ;;  %v1777_v22 = vor.u32 1.1754944e-38, %v1776_v18 }
 0x19f   :  { %v3000_v38 = vmul.f32 %v2936_v16, %v5086_v8  ;;  %3236 = vrcp.f32 %v1804_v20  ;;  %v5192_v12 = vmin.f32 %v1902_v43, 16.0  ;;  %v1828_v8 = vmul.f32 %v1827_v4, %v5154_v37 }
 0x1a0   :  { %v1769_v58 = vadd.f32 %v3235_v17, %v1768_v39  ;;  %v1838_v28 = vadd.f32 0.014752088, %v1837_v13  ;;  %v1866_v14 = vmul.f32 %v1865_v40, %v5167_v50  ;;  %v5200_v47 = vmul.f32 %v1793_v9, %v5033_v7 }
 0x1a1   :  { %3064 = vst [vmem:[%s6399_s3 + $0x110] sm:$0xff] %v3000_v38  ;;  %vm1810_vm0 = vweird.f32 %v1804_v20  ;;  %v1876_v46 = vadd.f32 0.001143296, %v1875_v31  ;;  %v1904_v3 = vmul.f32 2.1237322e-06, %v5192_v12  ;;  %v1816_v19 = vand.u32 2147483648, %v1804_v20 }
 0x1a2   :  { %v1773_v23 = vsel %vm5184_vm14, %v3235_v17, %v1769_v58  ;;  %v1829_v63 = vadd.f32 0.05243302, %v1828_v8  ;;  %v1839_v52 = vmul.f32 %v1838_v28, %v5154_v37  ;;  %v1867_v49 = vadd.f32 0.0036580483, %v1866_v14 }
 0x1a3   :  { %v1778_v59 = vsel %vm5188_vm15, %v1777_v22, %v1773_v23  ;;  %v1877_v2 = vmul.f32 %v1876_v46, %v5167_v50  ;;  %v1905_v41 = vadd.f32 0.00028619796, %v1904_v3  ;;  %v1915_v7 = vmul.f32 3.8918573e-05, %v5192_v12 }
 0x1a4   :  { %v1779_v32 = vmul.f32 %v1778_v59, %v1754_v24  ;;  %v1814_v60 = vand.u32 2147483647, %v1804_v20  ;;  %v1830_v36 = vmul.f32 %v1829_v63, %v5154_v37  ;;  %v1840_v56 = vadd.f32 0.112945676, %v1839_v52 }
 0x1a5   :  { %v3237_v51 = vpop.eup %3236  ;;  %v1868_v5 = vmul.f32 %v1867_v49, %v5167_v50  ;;  %v1878_v6 = vadd.f32 0.014752088, %v1877_v2  ;;  %v1906_v18 = vmul.f32 %v1905_v41, %v5192_v12  ;;  %v1916_v53 = vadd.f32 0.001143296, %v1915_v7 }
 0x1a6   :  { %v3133_v62 = vclamps-f32 %v1779_v32, 1.0  ;;  %v1806_v17 = vmul.f32 %v3237_v51, %v1804_v20  ;;  %v1831_v35 = vadd.f32 0.18741608, %v1830_v36  ;;  %v1841_v0 = vmul.f32 %v1840_v56, %v5154_v37 }
 0x1a7   :  { %v1869_v33 = vadd.f32 0.05243302, %v1868_v5  ;;  %v1879_v34 = vmul.f32 %v1878_v6, %v5167_v50  ;;  %v1907_v43 = vadd.f32 0.0036580483, %v1906_v18  ;;  %vm1811_vm1 = vweird.f32 %v3237_v51 }
 0x1a8   :  { %v2937_v15 = vadd.f32 1.0, %v3133_v62  ;;  %v1807_v48 = vsub.f32 1.0, %v1806_v17  ;;  %v1917_v25 = vmul.f32 %v1916_v53, %v5192_v12  ;;  %vm5216_vm2 = vcmp.eq.f32.partialorder %v1814_v60, 8.507059e+37  ;;  %v54_v30 = vld [vmem:[%s6396_s0 + $0x140] sm:$0xff]  ;;  %vm5228_vm3 = vmor %vm1810_vm0, %vm1811_vm1 }
 0x1a9   :  { %v1842_v16 = vadd.f32 0.4994258, %v1841_v0  ;;  %v1870_v61 = vmul.f32 %v1869_v33, %v5167_v50  ;;  %v1880_v9 = vadd.f32 0.112945676, %v1879_v34  ;;  %v1832_v31 = vmul.f32 %v1831_v35, %v5154_v37 }
 0x1aa   :  { %v3001_v4 = vmul.f32 %v2937_v15, %v5089_v26  ;;  %v1808_v13 = vmul.f32 %v3237_v51, %v1807_v48  ;;  %v1908_v38 = vmul.f32 %v1907_v43, %v5192_v12  ;;  %v1817_v39 = vor.u32 1.1754944e-38, %v1816_v19  ;;  %v55_v26 = vld [vmem:[%s6396_s0 + $0x148] sm:$0xff] }
 0x1ab   :  { %v1843_v40 = vmul.f32 %v1842_v16, %v5154_v37  ;;  %v1881_v55 = vmul.f32 %v1880_v9, %v5167_v50  ;;  %v1918_v45 = vadd.f32 0.014752088, %v1917_v25  ;;  %v1871_v20 = vadd.f32 0.18741608, %v1870_v61 }
 0x1ac   :  { %3065 = vst [vmem:[%s6399_s3 + $0x118] sm:$0xff] %v3001_v4  ;;  %v1809_v22 = vadd.f32 %v3237_v51, %v1808_v13  ;;  %v1909_v58 = vadd.f32 0.05243302, %v1908_v38  ;;  %v122_v8 = vmul.f32 %v4961_v44, %v54_v30  ;;  %v1833_v3 = vadd.f32 1.1283791, %v1832_v31 }
 0x1ad   :  { %v1844_v28 = vadd.f32 1.0, %v1843_v40  ;;  %v1882_v14 = vadd.f32 0.4994258, %v1881_v55  ;;  %v1919_v37 = vmul.f32 %v1918_v45, %v5192_v12  ;;  %v123_v63 = vmul.f32 %v4961_v44, %v55_v26 }
 0x1ae   :  { %v1813_v46 = vsel %vm5228_vm3, %v3237_v51, %v1809_v22  ;;  %v1910_v23 = vmul.f32 %v1909_v58, %v5192_v12  ;;  %v250_v52 = vmul.f32 0.5, %v4996_v21  ;;  %v5250_v59 = vadd.f32 %v4993_v1, %v122_v8 }
 0x1af   :  { %v1818_v49 = vsel %vm5216_vm2, %v1817_v39, %v1813_v46  ;;  %3238 = vrcp.f32 %v1844_v28  ;;  %v5254_v41 = vmul.f32 0.5, %v5108_v27  ;;  %v1872_v7 = vmul.f32 %v1871_v20, %v5167_v50 }
 0x1b0   :  { %v1819_v2 = vmul.f32 %v1818_v49, %v5200_v47  ;;  %v1883_v32 = vmul.f32 %v1882_v14, %v5167_v50  ;;  %v1854_v60 = vand.u32 2147483647, %v1844_v28  ;;  %v1911_v36 = vadd.f32 0.18741608, %v1910_v23 }
 0x1b1   :  { %v1920_v56 = vadd.f32 0.112945676, %v1919_v37  ;;  %v5259_v21 = vadd.f32 %v4993_v1, %v123_v63  ;;  %v1834_v5 = vmul.f32 %v1833_v3, %v5119_v54  ;;  %v5263_v6 = vmul.f32 0.5, %v5111_v57 }
 0x1b2   :  { %v3134_v51 = vclamps-f32 %v1819_v2, 1.0  ;;  %v1884_v47 = vadd.f32 1.0, %v1883_v32  ;;  %v1856_v18 = vand.u32 2147483648, %v1844_v28  ;;  %v1912_v27 = vmul.f32 %v1911_v36, %v5192_v12 }
 0x1b3   :  { %v1921_v53 = vmul.f32 %v1920_v56, %v5192_v12  ;;  %v5268_v50 = vmul.f32 0.70710677, %v5250_v59  ;;  %v1873_v17 = vadd.f32 1.1283791, %v1872_v7  ;;  %v5271_v19 = vmul.f32 0.70710677, %v5259_v21 }
 0x1b4   :  { %v2938_v62 = vadd.f32 1.0, %v3134_v51  ;;  %3240 = vrcp.f32 %v1884_v47  ;;  %v56_v57 = vld [vmem:[%s6396_s0 + $0x150] sm:$0xff]  ;;  %vm1850_vm4 = vweird.f32 %v1844_v28  ;;  %vm5276_vm5 = vcmp.eq.f32.partialorder %v1854_v60, 8.507059e+37  ;;  %v57_v34 = vld [vmem:[%s6396_s0 + $0x158] sm:$0xff] }
 0x1b5   :  { %v3239_v54 = vpop.eup %3238  ;;  %v1894_v0 = vand.u32 2147483647, %v1884_v47  ;;  %v1922_v33 = vadd.f32 0.4994258, %v1921_v53  ;;  %v1896_v48 = vand.u32 2147483648, %v1884_v47  ;;  %v1857_v10 = vor.u32 1.1754944e-38, %v1856_v18 }
 0x1b6   :  { %v3002_v43 = vmul.f32 %v2938_v62, %v250_v52  ;;  %v1846_v15 = vmul.f32 %v3239_v54, %v1844_v28  ;;  %v1913_v25 = vadd.f32 1.1283791, %v1912_v27  ;;  %vm1851_vm6 = vweird.f32 %v3239_v54 }
 0x1b7   :  { %v1923_v16 = vmul.f32 %v1922_v33, %v5192_v12  ;;  %v1942_v61 = vmul.f32 %v5268_v50, %v5268_v50  ;;  %v1982_v30 = vmul.f32 %v5271_v19, %v5271_v19  ;;  %v124_v4 = vmul.f32 %v4961_v44, %v56_v57  ;;  %vm5305_vm9 = vmor %vm1850_vm4, %vm1851_vm6 }
 0x1b8   :  { %3066 = vst [vmem:[%s6399_s3 + $0x120] sm:$0xff] %v3002_v43  ;;  %v1847_v9 = vsub.f32 1.0, %v1846_v15  ;;  %v125_v13 = vmul.f32 %v4961_v44, %v57_v34  ;;  %v1874_v31 = vmul.f32 %v1873_v17, %v5128_v42  ;;  %vm1890_vm7 = vweird.f32 %v1884_v47 }
 0x1b9   :  { %v1924_v38 = vadd.f32 1.0, %v1923_v16  ;;  %v5294_v12 = vmin.f32 %v1942_v61, 16.0  ;;  %vm5296_vm8 = vcmp.eq.f32.partialorder %v1894_v0, 8.507059e+37  ;;  %v1897_v55 = vor.u32 1.1754944e-38, %v1896_v48 }
 0x1ba   :  { %v3241_v24 = vpop.eup %3240  ;;  %v1848_v39 = vmul.f32 %v3239_v54, %v1847_v9  ;;  %v5301_v45 = vmul.f32 %v1913_v25, %v5157_v11  ;;  %v5309_v22 = vmin.f32 %v1982_v30, 16.0  ;;  %v5312_v20 = vadd.f32 %v4993_v1, %v124_v4 }
 0x1bb   :  { %v1886_v42 = vmul.f32 %v3241_v24, %v1884_v47  ;;  %3242 = vrcp.f32 %v1924_v38  ;;  %v1934_v8 = vand.u32 2147483647, %v1924_v38  ;;  %v1944_v14 = vmul.f32 2.1237322e-06, %v5294_v12 }
 0x1bc   :  { %v1849_v58 = vadd.f32 %v3239_v54, %v1848_v39  ;;  %v5316_v11 = vadd.f32 %v4993_v1, %v125_v13  ;;  %vm1891_vm10 = vweird.f32 %v3241_v24  ;;  %v1955_v28 = vmul.f32 3.8918573e-05, %v5294_v12 }
 0x1bd   :  { %v1887_v37 = vsub.f32 1.0, %v1886_v42  ;;  %v1984_v46 = vmul.f32 2.1237322e-06, %v5309_v22  ;;  %vm1930_vm11 = vweird.f32 %v1924_v38  ;;  %v1936_v23 = vand.u32 2147483648, %v1924_v38  ;;  %vm5325_vm12 = vmor %vm1890_vm7, %vm1891_vm10 }
 0x1be   :  { %v1853_v3 = vsel %vm5305_vm9, %v3239_v54, %v1849_v58  ;;  %v1945_v63 = vadd.f32 0.00028619796, %v1944_v14  ;;  %v1956_v2 = vadd.f32 0.001143296, %v1955_v28  ;;  %vm5329_vm13 = vcmp.eq.f32.partialorder %v1934_v8, 8.507059e+37 }
 0x1bf   :  { %v1858_v52 = vsel %vm5276_vm5, %v1857_v10, %v1853_v3  ;;  %v1888_v49 = vmul.f32 %v3241_v24, %v1887_v37  ;;  %v1985_v7 = vadd.f32 0.00028619796, %v1984_v46  ;;  %v1995_v51 = vmul.f32 3.8918573e-05, %v5309_v22  ;;  %v58_v42 = vld [vmem:[%s6396_s0 + $0x160] sm:$0xff] }
 0x1c0   :  { %v1859_v32 = vmul.f32 %v1858_v52, %v1834_v5  ;;  %v1946_v56 = vmul.f32 %v1945_v63, %v5294_v12  ;;  %v5336_v18 = vmul.f32 0.70710677, %v5312_v20  ;;  %v1957_v5 = vmul.f32 %v1956_v2, %v5294_v12 }
 0x1c1   :  { %v3243_v27 = vpop.eup %3242  ;;  %v1889_v53 = vadd.f32 %v3241_v24, %v1888_v49  ;;  %v1986_v47 = vmul.f32 %v1985_v7, %v5309_v22  ;;  %v5341_v62 = vmul.f32 0.70710677, %v5316_v11  ;;  %v1996_v34 = vadd.f32 0.001143296, %v1995_v51 }
 0x1c2   :  { %v3135_v17 = vclamps-f32 %v1859_v32, 1.0  ;;  %v1926_v57 = vmul.f32 %v3243_v27, %v1924_v38  ;;  %vm1931_vm14 = vweird.f32 %v3243_v27  ;;  %v1947_v54 = vadd.f32 0.0036580483, %v1946_v56 }
 0x1c3   :  { %v1893_v35 = vsel %vm5325_vm12, %v3241_v24, %v1889_v53  ;;  %v1958_v0 = vadd.f32 0.014752088, %v1957_v5  ;;  %v1987_v33 = vadd.f32 0.0036580483, %v1986_v47  ;;  %v1997_v9 = vmul.f32 %v1996_v34, %v5309_v22  ;;  %vm5354_vm15 = vmor %vm1930_vm11, %vm1931_vm14 }
 0x1c4   :  { %v2939_v43 = vadd.f32 1.0, %v3135_v17  ;;  %v1898_v15 = vsel %vm5296_vm8, %v1897_v55, %v1893_v35  ;;  %v1927_v48 = vsub.f32 1.0, %v1926_v57  ;;  %v1948_v25 = vmul.f32 %v1947_v54, %v5294_v12 }
 0x1c5   :  { %v1899_v10 = vmul.f32 %v1898_v15, %v1874_v31  ;;  %v1959_v16 = vmul.f32 %v1958_v0, %v5294_v12  ;;  %v1988_v61 = vmul.f32 %v1987_v33, %v5309_v22  ;;  %v1937_v13 = vor.u32 1.1754944e-38, %v1936_v23 }
 0x1c6   :  { %v3003_v30 = vmul.f32 %v2939_v43, %v5254_v41  ;;  %v1928_v4 = vmul.f32 %v3243_v27, %v1927_v48  ;;  %v1949_v24 = vadd.f32 0.05243302, %v1948_v25  ;;  %v2022_v26 = vmul.f32 %v5336_v18, %v5336_v18 }
 0x1c7   :  { %v3136_v39 = vclamps-f32 %v1899_v10, 1.0  ;;  %v1960_v55 = vadd.f32 0.112945676, %v1959_v16  ;;  %v1989_v31 = vadd.f32 0.05243302, %v1988_v61  ;;  %v2062_v8 = vmul.f32 %v5341_v62, %v5341_v62 }
 0x1c8   :  { %3067 = vst [vmem:[%s6399_s3 + $0x128] sm:$0xff] %v3003_v30  ;;  %v1929_v41 = vadd.f32 %v3243_v27, %v1928_v4  ;;  %v1950_v38 = vmul.f32 %v1949_v24, %v5294_v12  ;;  %v1998_v58 = vadd.f32 0.014752088, %v1997_v9  ;;  %v5371_v46 = vmin.f32 %v2022_v26, 16.0 }
 0x1c9   :  { %v2940_v14 = vadd.f32 1.0, %v3136_v39  ;;  %v1961_v37 = vmul.f32 %v1960_v55, %v5294_v12  ;;  %v1990_v28 = vmul.f32 %v1989_v31, %v5309_v22  ;;  %v126_v52 = vmul.f32 %v4961_v44, %v58_v42 }
 0x1ca   :  { %v1933_v3 = vsel %vm5354_vm15, %v3243_v27, %v1929_v41  ;;  %v1951_v23 = vadd.f32 0.18741608, %v1950_v38  ;;  %v1999_v63 = vmul.f32 %v1998_v58, %v5309_v22  ;;  %v5382_v53 = vmin.f32 %v2062_v8, 16.0 }
 0x1cb   :  { %v3004_v49 = vmul.f32 %v2940_v14, %v5263_v6  ;;  %v1938_v2 = vsel %vm5329_vm13, %v1937_v13, %v1933_v3  ;;  %v1962_v7 = vadd.f32 0.4994258, %v1961_v37  ;;  %v1991_v32 = vadd.f32 0.18741608, %v1990_v28 }
 0x1cc   :  { %v1939_v60 = vmul.f32 %v1938_v2, %v5301_v45  ;;  %v1952_v56 = vmul.f32 %v1951_v23, %v5294_v12  ;;  %v2000_v51 = vadd.f32 0.112945676, %v1999_v63  ;;  %v2024_v36 = vmul.f32 2.1237322e-06, %v5371_v46 }
 0x1cd   :  { %3068 = vst [vmem:[%s6399_s3 + $0x130] sm:$0xff] %v3004_v49  ;;  %v1963_v27 = vmul.f32 %v1962_v7, %v5294_v12  ;;  %v1992_v6 = vmul.f32 %v1991_v32, %v5309_v22  ;;  %v2035_v5 = vmul.f32 3.8918573e-05, %v5371_v46  ;;  %v253_v47 = vmul.f32 0.5, %v5131_v29 }
 0x1ce   :  { %v3137_v45 = vclamps-f32 %v1939_v60, 1.0  ;;  %v2001_v17 = vmul.f32 %v2000_v51, %v5309_v22  ;;  %v5394_v57 = vmul.f32 0.5, %v5250_v59  ;;  %v2025_v35 = vadd.f32 0.00028619796, %v2024_v36 }
 0x1cf   :  { %v1964_v54 = vadd.f32 1.0, %v1963_v27  ;;  %v2064_v0 = vmul.f32 2.1237322e-06, %v5382_v53  ;;  %v2036_v34 = vadd.f32 0.001143296, %v2035_v5  ;;  %v5398_v43 = vadd.f32 %v4993_v1, %v126_v52 }
 0x1d0   :  { %v2941_v33 = vadd.f32 1.0, %v3137_v45  ;;  %v2002_v12 = vadd.f32 0.4994258, %v2001_v17  ;;  %v1953_v15 = vadd.f32 1.1283791, %v1952_v56  ;;  %v5401_v29 = vmul.f32 0.5, %v5259_v21 }
 0x1d1   :  { %3244 = vrcp.f32 %v1964_v54  ;;  %v1993_v48 = vadd.f32 1.1283791, %v1992_v6  ;;  %v1974_v10 = vand.u32 2147483647, %v1964_v54  ;;  %v2026_v61 = vmul.f32 %v2025_v35, %v5371_v46 }
 0x1d2   :  { %v3005_v25 = vmul.f32 %v2941_v33, %v253_v47  ;;  %v2003_v16 = vmul.f32 %v2002_v12, %v5309_v22  ;;  %v1976_v9 = vand.u32 2147483648, %v1964_v54  ;;  %v5409_v30 = vmul.f32 0.5, %v5312_v20 }
 0x1d3   :  { %v2037_v4 = vmul.f32 %v2036_v34, %v5371_v46  ;;  %v2065_v13 = vadd.f32 0.00028619796, %v2064_v0  ;;  %v2027_v24 = vadd.f32 0.0036580483, %v2026_v61  ;;  %v2075_v39 = vmul.f32 3.8918573e-05, %v5382_v53 }
 0x1d4   :  { %v59_v59 = vld [vmem:[%s6396_s0 + $0x168] sm:$0xff]  ;;  %v5415_v21 = vadd.f32 1.0, %v2003_v16  ;;  %v1954_v40 = vmul.f32 %v1953_v15, %v5268_v50  ;;  %vm1970_vm0 = vweird.f32 %v1964_v54  ;;  %vm5424_vm1 = vcmp.eq.f32.partialorder %v1974_v10, 8.507059e+37 }
 0x1d5   :  { %3069 = vst [vmem:[%s6399_s3 + $0x138] sm:$0xff] %v3005_v25  ;;  %v127_v22 = vmul.f32 %v4961_v44, %v59_v59  ;;  %v2038_v55 = vadd.f32 0.014752088, %v2037_v4  ;;  %v2066_v20 = vmul.f32 %v2065_v13, %v5382_v53  ;;  %v5429_v42 = vmul.f32 %v1993_v48, %v5271_v19 }
 0x1d6   :  { %3246 = vrcp.f32 %v5415_v21  ;;  %v5433_v41 = vmul.f32 0.70710677, %v5398_v43  ;;  %v2028_v38 = vmul.f32 %v2027_v24, %v5371_v46  ;;  %v2076_v14 = vadd.f32 0.001143296, %v2075_v39 }
 0x1d7   :  { %v3245_v50 = vpop.eup %3244  ;;  %v2039_v58 = vmul.f32 %v2038_v55, %v5371_v46  ;;  %v2067_v8 = vadd.f32 0.0036580483, %v2066_v20  ;;  %v1977_v28 = vor.u32 1.1754944e-38, %v1976_v9  ;;  %v5438_v3 = vadd.f32 %v4993_v1, %v127_v22 }
 0x1d8   :  { %v1966_v37 = vmul.f32 %v3245_v50, %v1964_v54  ;;  %v2016_v23 = vand.u32 2147483648, %v5415_v21  ;;  %v2029_v63 = vadd.f32 0.05243302, %v2028_v38  ;;  %vm1971_vm2 = vweird.f32 %v3245_v50 }
 0x1d9   :  { %v2040_v52 = vadd.f32 0.112945676, %v2039_v58  ;;  %v2068_v49 = vmul.f32 %v2067_v8, %v5382_v53  ;;  %v2077_v7 = vmul.f32 %v2076_v14, %v5382_v53  ;;  %v2102_v32 = vmul.f32 %v5433_v41, %v5433_v41  ;;  %vm5453_vm4 = vmor %vm1970_vm0, %vm1971_vm2 }
 0x1da   :  { %v1967_v2 = vsub.f32 1.0, %v1966_v37  ;;  %vm2010_vm3 = vweird.f32 %v5415_v21  ;;  %v2030_v60 = vmul.f32 %v2029_v63, %v5371_v46  ;;  %v2014_v6 = vand.u32 2147483647, %v5415_v21 }
 0x1db   :  { %v2041_v56 = vmul.f32 %v2040_v52, %v5371_v46  ;;  %v2078_v36 = vadd.f32 0.014752088, %v2077_v7  ;;  %v5450_v5 = vmin.f32 %v2102_v32, 16.0  ;;  %v2017_v17 = vor.u32 1.1754944e-38, %v2016_v23 }
 0x1dc   :  { %v60_v31 = vld [vmem:[%s6396_s0 + $0x170] sm:$0xff]  ;;  %v3247_v51 = vpop.eup %3246  ;;  %v1968_v27 = vmul.f32 %v3245_v50, %v1967_v2  ;;  %v2031_v35 = vadd.f32 0.18741608, %v2030_v60  ;;  %v5466_v61 = vmul.f32 0.70710677, %v5438_v3  ;;  %vm2015_vm7 = vcmp.eq.f32.partialorder %v2014_v6, 8.507059e+37 }
 0x1dd   :  { %v128_v19 = vmul.f32 %v4961_v44, %v60_v31  ;;  %v2069_v44 = vadd.f32 0.05243302, %v2068_v49  ;;  %v2006_v45 = vmul.f32 %v3247_v51, %v5415_v21  ;;  %v2042_v0 = vadd.f32 0.4994258, %v2041_v56 }
 0x1de   :  { %v1969_v33 = vadd.f32 %v3245_v50, %v1968_v27  ;;  %v2079_v34 = vmul.f32 %v2078_v36, %v5382_v53  ;;  %v2104_v15 = vmul.f32 2.1237322e-06, %v5450_v5  ;;  %vm2011_vm5 = vweird.f32 %v3247_v51 }
 0x1df   :  { %v2070_v12 = vmul.f32 %v2069_v44, %v5382_v53  ;;  %v2007_v48 = vsub.f32 1.0, %v2006_v45  ;;  %v2032_v54 = vmul.f32 %v2031_v35, %v5371_v46  ;;  %v2043_v59 = vmul.f32 %v2042_v0, %v5371_v46  ;;  %vm5473_vm6 = vmor %vm2010_vm3, %vm2011_vm5 }
 0x1e0   :  { %v1973_v25 = vsel %vm5453_vm4, %v3245_v50, %v1969_v33  ;;  %v2080_v16 = vadd.f32 0.112945676, %v2079_v34  ;;  %v2115_v24 = vmul.f32 3.8918573e-05, %v5450_v5  ;;  %v2105_v20 = vadd.f32 0.00028619796, %v2104_v15 }
 0x1e1   :  { %v2071_v10 = vadd.f32 0.18741608, %v2070_v12  ;;  %v1978_v9 = vsel %vm5424_vm1, %v1977_v28, %v1973_v25  ;;  %v2008_v4 = vmul.f32 %v3247_v51, %v2007_v48  ;;  %v2044_v13 = vadd.f32 1.0, %v2043_v59 }
 0x1e2   :  { %v1979_v39 = vmul.f32 %v1978_v9, %v1954_v40  ;;  %v2033_v22 = vadd.f32 1.1283791, %v2032_v54  ;;  %v2081_v55 = vmul.f32 %v2080_v16, %v5382_v53  ;;  %v5479_v26 = vmul.f32 0.5, %v5316_v11 }
 0x1e3   :  { %v2009_v31 = vadd.f32 %v3247_v51, %v2008_v4  ;;  %3248 = vrcp.f32 %v2044_v13  ;;  %v2072_v38 = vmul.f32 %v2071_v10, %v5382_v53  ;;  %v2142_v21 = vmul.f32 %v5466_v61, %v5466_v61 }
 0x1e4   :  { %v3138_v50 = vclamps-f32 %v1979_v39, 1.0  ;;  %v5485_v40 = vadd.f32 %v4993_v1, %v128_v19  ;;  %v2082_v8 = vadd.f32 0.4994258, %v2081_v55  ;;  %v2106_v14 = vmul.f32 %v2105_v20, %v5450_v5 }
 0x1e5   :  { %v2013_v58 = vsel %vm5473_vm6, %v3247_v51, %v2009_v31  ;;  %v2116_v37 = vadd.f32 0.001143296, %v2115_v24  ;;  %v2034_v11 = vmul.f32 %v2033_v22, %v5336_v18  ;;  %v5492_v63 = vmul.f32 0.5, %v5398_v43 }
 0x1e6   :  { %v2942_v28 = vadd.f32 1.0, %v3138_v50  ;;  %v2018_v23 = vsel %vm2015_vm7, %v2017_v17, %v2013_v58  ;;  %v2054_v49 = vand.u32 2147483647, %v2044_v13  ;;  %v2083_v1 = vmul.f32 %v2082_v8, %v5382_v53 }
 0x1e7   :  { %v2019_v52 = vmul.f32 %v2018_v23, %v5429_v42  ;;  %v2107_v19 = vadd.f32 0.0036580483, %v2106_v14  ;;  %v2056_v7 = vand.u32 2147483648, %v2044_v13  ;;  %v2117_v32 = vmul.f32 %v2116_v37, %v5450_v5 }
 0x1e8   :  { %v3006_v2 = vmul.f32 %v2942_v28, %v5394_v57  ;;  %v5498_v60 = vmin.f32 %v2142_v21, 16.0  ;;  %v2073_v51 = vadd.f32 1.1283791, %v2072_v38  ;;  %v2084_v18 = vadd.f32 1.0, %v2083_v1 }
 0x1e9   :  { %v3249_v56 = vpop.eup %3248  ;;  %v3139_v44 = vclamps-f32 %v2019_v52, 1.0  ;;  %v2108_v43 = vmul.f32 %v2107_v19, %v5450_v5  ;;  %vm2050_vm8 = vweird.f32 %v2044_v13  ;;  %v2118_v53 = vadd.f32 0.014752088, %v2117_v32 }
 0x1ea   :  { %3070 = vst [vmem:[%s6399_s3 + $0x140] sm:$0xff] %v3006_v2  ;;  %v2046_v42 = vmul.f32 %v3249_v56, %v2044_v13  ;;  %v2144_v57 = vmul.f32 2.1237322e-06, %v5498_v60  ;;  %vm5505_vm9 = vcmp.eq.f32.partialorder %v2054_v49, 8.507059e+37  ;;  %3250 = vrcp.f32 %v2084_v18  ;;  %v5535_v13 = vld [vmem:[%s6397_s1] ss:$0 sm:$0xff] }
 0x1eb   :  { %v2943_v27 = vadd.f32 1.0, %v3139_v44  ;;  %v5510_v36 = vmul.f32 0.70710677, %v5485_v40  ;;  %vm2051_vm10 = vweird.f32 %v3249_v56  ;;  %v2109_v45 = vadd.f32 0.05243302, %v2108_v43 }
 0x1ec   :  { %v2047_v47 = vsub.f32 1.0, %v2046_v42  ;;  %v2119_v17 = vmul.f32 %v2118_v53, %v5450_v5  ;;  %v2057_v0 = vor.u32 1.1754944e-38, %v2056_v7  ;;  %v2145_v33 = vadd.f32 0.00028619796, %v2144_v57  ;;  %vm5523_vm11 = vmor %vm2050_vm8, %vm2051_vm10 }
 0x1ed   :  { %v3007_v35 = vmul.f32 %v2943_v27, %v5401_v29  ;;  %v2155_v12 = vmul.f32 3.8918573e-05, %v5498_v60  ;;  %v2094_v48 = vand.u32 2147483647, %v2084_v18  ;;  %v2110_v54 = vmul.f32 %v2109_v45, %v5450_v5 }
 0x1ee   :  { %v2048_v15 = vmul.f32 %v3249_v56, %v2047_v47  ;;  %v2120_v59 = vadd.f32 0.112945676, %v2119_v17  ;;  %v2074_v25 = vmul.f32 %v2073_v51, %v5341_v62  ;;  %v2146_v10 = vmul.f32 %v2145_v33, %v5498_v60 }
 0x1ef   :  { %v2156_v16 = vadd.f32 0.001143296, %v2155_v12  ;;  %v2182_v9 = vmul.f32 %v5510_v36, %v5510_v36  ;;  %vm2090_vm12 = vweird.f32 %v2084_v18  ;;  %v2096_v22 = vand.u32 2147483648, %v2084_v18 }
 0x1f0   :  { %v2049_v4 = vadd.f32 %v3249_v56, %v2048_v15  ;;  %v2121_v24 = vmul.f32 %v2120_v59, %v5450_v5  ;;  %v3251_v46 = vpop.eup %3250  ;;  %v2147_v62 = vadd.f32 0.0036580483, %v2146_v10  ;;  %vm5543_vm13 = vcmp.eq.f32.partialorder %v2094_v48, 8.507059e+37 }
 0x1f1   :  { %v61_v34 = vld [vmem:[%s6396_s0 + $0x178] sm:$0xff]  ;;  %v2157_v55 = vmul.f32 %v2156_v16, %v5498_v60  ;;  %v5539_v20 = vmin.f32 %v2182_v9, 16.0  ;;  %v2086_v50 = vmul.f32 %v3251_v46, %v2084_v18  ;;  %v2111_v21 = vadd.f32 0.18741608, %v2110_v54  ;;  %v5571_v18 = vld [vmem:[%s6398_s2] ss:$0 sm:$0xff] }
 0x1f2   :  { %3071 = vst [vmem:[%s6399_s3 + $0x148] sm:$0xff] %v3007_v35  ;;  %v129_v39 = vmul.f32 %v5535_v13, %v61_v34  ;;  %v2053_v31 = vsel %vm5523_vm11, %v3249_v56, %v2049_v4  ;;  %v2122_v8 = vadd.f32 0.4994258, %v2121_v24  ;;  %v2148_v14 = vmul.f32 %v2147_v62, %v5498_v60 }
 0x1f3   :  { %v2058_v58 = vsel %vm5505_vm9, %v2057_v0, %v2053_v31  ;;  %v2158_v37 = vadd.f32 0.014752088, %v2157_v55  ;;  %v2087_v23 = vsub.f32 1.0, %v2086_v50  ;;  %vm2091_vm14 = vweird.f32 %v3251_v46 }
 0x1f4   :  { %v2059_v28 = vmul.f32 %v2058_v58, %v2034_v11  ;;  %v2184_v52 = vmul.f32 2.1237322e-06, %v5539_v20  ;;  %v2123_v49 = vmul.f32 %v2122_v8, %v5450_v5  ;;  %v2149_v1 = vadd.f32 0.05243302, %v2148_v14  ;;  %vm5558_vm15 = vmor %vm2090_vm12, %vm2091_vm14 }
 0x1f5   :  { %v2159_v19 = vmul.f32 %v2158_v37, %v5498_v60  ;;  %v2195_v2 = vmul.f32 3.8918573e-05, %v5539_v20  ;;  %v2088_v32 = vmul.f32 %v3251_v46, %v2087_v23  ;;  %v2097_v56 = vor.u32 1.1754944e-38, %v2096_v22 }
 0x1f6   :  { %v3140_v7 = vclamps-f32 %v2059_v28, 1.0  ;;  %v2185_v44 = vadd.f32 0.00028619796, %v2184_v52  ;;  %v2112_v43 = vmul.f32 %v2111_v21, %v5450_v5  ;;  %v2124_v42 = vadd.f32 1.0, %v2123_v49 }
 0x1f7   :  { %v2150_v53 = vmul.f32 %v2149_v1, %v5498_v60  ;;  %v2160_v57 = vadd.f32 0.112945676, %v2159_v19  ;;  %v2089_v6 = vadd.f32 %v3251_v46, %v2088_v32  ;;  %v2196_v45 = vadd.f32 0.001143296, %v2195_v2 }
 0x1f8   :  { %v2944_v27 = vadd.f32 1.0, %v3140_v7  ;;  %v2186_v47 = vmul.f32 %v2185_v44, %v5539_v20  ;;  %3252 = vrcp.f32 %v2124_v42  ;;  %v5566_v17 = vmul.f32 0.5, %v5438_v3 }
 0x1f9   :  { %v62_v51 = vld [vmem:[%s6396_s0 + $0x180] sm:$0xff]  ;;  %v5574_v5 = vadd.f32 %v5571_v18, %v129_v39  ;;  %v2093_v33 = vsel %vm5558_vm15, %v3251_v46, %v2089_v6  ;;  %v2151_v12 = vadd.f32 0.18741608, %v2150_v53  ;;  %v2161_v34 = vmul.f32 %v2160_v57, %v5498_v60  ;;  %v63_v3 = vld [vmem:[%s6396_s0 + $0x188] sm:$0xff] }
 0x1fa   :  { %v130_v35 = vmul.f32 %v5535_v13, %v62_v51  ;;  %v3008_v0 = vmul.f32 %v2944_v27, %v5409_v30  ;;  %v2098_v15 = vsel %vm5543_vm13, %v2097_v56, %v2093_v33  ;;  %v2113_v48 = vadd.f32 1.1283791, %v2112_v43 }
 0x1fb   :  { %vm2130_vm0 = vweird.f32 %v2124_v42  ;;  %v2187_v54 = vadd.f32 0.0036580483, %v2186_v47  ;;  %v2099_v30 = vmul.f32 %v2098_v15, %v2074_v25  ;;  %v2152_v59 = vmul.f32 %v2151_v12, %v5498_v60 }
 0x1fc   :  { %3072 = vst [vmem:[%s6399_s3 + $0x150] sm:$0xff] %v3008_v0  ;;  %v2162_v29 = vadd.f32 0.4994258, %v2161_v34  ;;  %v2197_v10 = vmul.f32 %v2196_v45, %v5539_v20  ;;  %v5593_v9 = vmul.f32 0.70710677, %v5574_v5  ;;  %v5596_v4 = vadd.f32 %v5571_v18, %v130_v35 }
 0x1fd   :  { %v2188_v16 = vmul.f32 %v2187_v54, %v5539_v20  ;;  %v131_v24 = vmul.f32 %v5535_v13, %v63_v3  ;;  %v3141_v39 = vclamps-f32 %v2099_v30, 1.0  ;;  %v2134_v46 = vand.u32 2147483647, %v2124_v42 }
 0x1fe   :  { %v2163_v22 = vmul.f32 %v2162_v29, %v5498_v60  ;;  %v2198_v25 = vadd.f32 0.014752088, %v2197_v10  ;;  %v3253_v62 = vpop.eup %3252  ;;  %v2136_v55 = vand.u32 2147483648, %v2124_v42  ;;  %v2222_v50 = vmul.f32 %v5593_v9, %v5593_v9 }
 0x1ff   :  { %v2189_v31 = vadd.f32 0.05243302, %v2188_v16  ;;  %v5603_v38 = vmul.f32 0.70710677, %v5596_v4  ;;  %v2945_v21 = vadd.f32 1.0, %v3141_v39  ;;  %v2126_v58 = vmul.f32 %v3253_v62, %v2124_v42 }
 0x200   :  { %v2153_v8 = vadd.f32 1.1283791, %v2152_v59  ;;  %v5606_v14 = vadd.f32 %v5571_v18, %v131_v24  ;;  %vm2131_vm1 = vweird.f32 %v3253_v62  ;;  %v2164_v37 = vadd.f32 1.0, %v2163_v22 }
 0x201   :  { %v2199_v60 = vmul.f32 %v2198_v25, %v5539_v20  ;;  %v5609_v28 = vmin.f32 %v2222_v50, 16.0  ;;  %v3009_v23 = vmul.f32 %v2945_v21, %v5479_v26  ;;  %v2127_v52 = vsub.f32 1.0, %v2126_v58  ;;  %vm5631_vm3 = vmor %vm2130_vm0, %vm2131_vm1 }
 0x202   :  { %v2190_v49 = vmul.f32 %v2189_v31, %v5539_v20  ;;  %v2262_v1 = vmul.f32 %v5603_v38, %v5603_v38  ;;  %v2114_v19 = vmul.f32 %v2113_v48, %v5433_v41  ;;  %vm5616_vm2 = vcmp.eq.f32.partialorder %v2134_v46, 8.507059e+37 }
 0x203   :  { %3254 = vrcp.f32 %v2164_v37  ;;  %v5621_v7 = vmul.f32 0.5, %v5485_v40  ;;  %3073 = vst [vmem:[%s6399_s3 + $0x158] sm:$0xff] %v3009_v23  ;;  %v2128_v26 = vmul.f32 %v3253_v62, %v2127_v52  ;;  %v2137_v32 = vor.u32 1.1754944e-38, %v2136_v55 }
 0x204   :  { %v2200_v56 = vadd.f32 0.112945676, %v2199_v60  ;;  %v5627_v44 = vmul.f32 0.70710677, %v5606_v14  ;;  %v5636_v51 = vmul.f32 %v2153_v8, %v5466_v61  ;;  %v2174_v40 = vand.u32 2147483647, %v2164_v37 }
 0x205   :  { %v2224_v11 = vmul.f32 2.1237322e-06, %v5609_v28  ;;  %v2235_v43 = vmul.f32 3.8918573e-05, %v5609_v28  ;;  %v2129_v53 = vadd.f32 %v3253_v62, %v2128_v26  ;;  %v2191_v57 = vadd.f32 0.18741608, %v2190_v49 }
 0x206   :  { %v2201_v27 = vmul.f32 %v2200_v56, %v5539_v20  ;;  %v5641_v6 = vmin.f32 %v2262_v1, 16.0  ;;  %vm2170_vm4 = vweird.f32 %v2164_v37  ;;  %v2176_v42 = vand.u32 2147483648, %v2164_v37 }
 0x207   :  { %v2225_v47 = vadd.f32 0.00028619796, %v2224_v11  ;;  %v2236_v45 = vadd.f32 0.001143296, %v2235_v43  ;;  %v2133_v35 = vsel %vm5631_vm3, %v3253_v62, %v2129_v53  ;;  %v2302_v33 = vmul.f32 %v5627_v44, %v5627_v44 }
 0x208   :  { %v2202_v61 = vadd.f32 0.4994258, %v2201_v27  ;;  %v2264_v0 = vmul.f32 2.1237322e-06, %v5641_v6  ;;  %v2138_v34 = vsel %vm5616_vm2, %v2137_v32, %v2133_v35  ;;  %v2275_v48 = vmul.f32 3.8918573e-05, %v5641_v6 }
 0x209   :  { %v3255_v12 = vpop.eup %3254  ;;  %v2226_v3 = vmul.f32 %v2225_v47, %v5609_v28  ;;  %v2237_v15 = vmul.f32 %v2236_v45, %v5609_v28  ;;  %v2139_v54 = vmul.f32 %v2138_v34, %v2114_v19  ;;  %v2192_v59 = vmul.f32 %v2191_v57, %v5539_v20 }
 0x20a   :  { %v2166_v30 = vmul.f32 %v3255_v12, %v2164_v37  ;;  %vm2171_vm5 = vweird.f32 %v3255_v12  ;;  %v2203_v29 = vmul.f32 %v2202_v61, %v5539_v20  ;;  %v2265_v24 = vadd.f32 0.00028619796, %v2264_v0  ;;  %v64_v62 = vld [vmem:[%s6396_s0 + $0x190] sm:$0xff] }
 0x20b   :  { %v2227_v10 = vadd.f32 0.0036580483, %v2226_v3  ;;  %v2238_v16 = vadd.f32 0.014752088, %v2237_v15  ;;  %v3142_v39 = vclamps-f32 %v2139_v54, 1.0  ;;  %v5655_v25 = vmin.f32 %v2302_v33, 16.0  ;;  %vm5670_vm7 = vmor %vm2170_vm4, %vm2171_vm5 }
 0x20c   :  { %v2167_v46 = vsub.f32 1.0, %v2166_v30  ;;  %v2276_v22 = vadd.f32 0.001143296, %v2275_v48  ;;  %v2204_v55 = vadd.f32 1.0, %v2203_v29  ;;  %v2266_v21 = vmul.f32 %v2265_v24, %v5641_v6 }
 0x20d   :  { %v2228_v31 = vmul.f32 %v2227_v10, %v5609_v28  ;;  %v2239_v50 = vmul.f32 %v2238_v16, %v5609_v28  ;;  %v2946_v20 = vadd.f32 1.0, %v3142_v39  ;;  %vm5663_vm6 = vcmp.eq.f32.partialorder %v2174_v40, 8.507059e+37 }
 0x20e   :  { %v2168_v58 = vmul.f32 %v3255_v12, %v2167_v46  ;;  %v2277_v60 = vmul.f32 %v2276_v22, %v5641_v6  ;;  %v2177_v52 = vor.u32 1.1754944e-38, %v2176_v42  ;;  %3256 = vrcp.f32 %v2204_v55 }
 0x20f   :  { %v2304_v49 = vmul.f32 2.1237322e-06, %v5655_v25  ;;  %v132_v1 = vmul.f32 %v5535_v13, %v64_v62  ;;  %v3010_v19 = vmul.f32 %v2946_v20, %v5492_v63  ;;  %v2229_v26 = vadd.f32 0.05243302, %v2228_v31 }
 0x210   :  { %v2169_v2 = vadd.f32 %v3255_v12, %v2168_v58  ;;  %v2240_v32 = vadd.f32 0.112945676, %v2239_v50  ;;  %v2193_v56 = vadd.f32 1.1283791, %v2192_v59  ;;  %vm2210_vm8 = vweird.f32 %v2204_v55 }
 0x211   :  { %v2214_v41 = vand.u32 2147483647, %v2204_v55  ;;  %v2267_v40 = vadd.f32 0.0036580483, %v2266_v21  ;;  %3074 = vst [vmem:[%s6399_s3 + $0x160] sm:$0xff] %v3010_v19  ;;  %v2230_v11 = vmul.f32 %v2229_v26, %v5609_v28  ;;  %v2216_v33 = vand.u32 2147483648, %v2204_v55 }
 0x212   :  { %v2173_v37 = vsel %vm5670_vm7, %v3255_v12, %v2169_v2  ;;  %v2241_v43 = vmul.f32 %v2240_v32, %v5609_v28  ;;  %v2278_v53 = vadd.f32 0.014752088, %v2277_v60  ;;  %v2305_v27 = vadd.f32 0.00028619796, %v2304_v49 }
 0x213   :  { %v2178_v63 = vsel %vm5663_vm6, %v2177_v52, %v2173_v37  ;;  %v2268_v57 = vmul.f32 %v2267_v40, %v5641_v6  ;;  %v2315_v42 = vmul.f32 3.8918573e-05, %v5655_v25  ;;  %v2231_v45 = vadd.f32 0.18741608, %v2230_v11 }
 0x214   :  { %v2179_v47 = vmul.f32 %v2178_v63, %v5636_v51  ;;  %v2242_v35 = vadd.f32 0.4994258, %v2241_v43  ;;  %v2279_v61 = vmul.f32 %v2278_v53, %v5641_v6  ;;  %v3257_v0 = vpop.eup %3256  ;;  %v2306_v34 = vmul.f32 %v2305_v27, %v5655_v25 }
 0x215   :  { %v2269_v12 = vadd.f32 0.05243302, %v2268_v57  ;;  %v2316_v3 = vadd.f32 0.001143296, %v2315_v42  ;;  %v2206_v48 = vmul.f32 %v3257_v0, %v2204_v55  ;;  %v2232_v54 = vmul.f32 %v2231_v45, %v5609_v28 }
 0x216   :  { %v3143_v15 = vclamps-f32 %v2179_v47, 1.0  ;;  %v5693_v30 = vadd.f32 %v5571_v18, %v132_v1  ;;  %vm2211_vm9 = vweird.f32 %v3257_v0  ;;  %v2243_v51 = vmul.f32 %v2242_v35, %v5609_v28 }
 0x217   :  { %v2270_v59 = vmul.f32 %v2269_v12, %v5641_v6  ;;  %v2280_v29 = vadd.f32 0.112945676, %v2279_v61  ;;  %v2207_v16 = vsub.f32 1.0, %v2206_v48  ;;  %v2233_v24 = vadd.f32 1.1283791, %v2232_v54  ;;  %vm5707_vm10 = vmor %vm2210_vm8, %vm2211_vm9 }
 0x218   :  { %v2947_v10 = vadd.f32 1.0, %v3143_v15  ;;  %v2307_v39 = vadd.f32 0.0036580483, %v2306_v34  ;;  %v2244_v46 = vadd.f32 1.0, %v2243_v51  ;;  %v2317_v31 = vmul.f32 %v2316_v3, %v5655_v25 }
 0x219   :  { %v2271_v22 = vadd.f32 0.18741608, %v2270_v59  ;;  %v2281_v62 = vmul.f32 %v2280_v29, %v5641_v6  ;;  %v2208_v21 = vmul.f32 %v3257_v0, %v2207_v16  ;;  %v5701_v20 = vmul.f32 0.5, %v5574_v5 }
 0x21a   :  { %v3011_v50 = vmul.f32 %v2947_v10, %v5566_v17  ;;  %v2308_v28 = vmul.f32 %v2307_v39, %v5655_v25  ;;  %v2194_v58 = vmul.f32 %v2193_v56, %v5510_v36  ;;  %vm5711_vm11 = vcmp.eq.f32.partialorder %v2214_v41, 8.507059e+37  ;;  %v65_v17 = vld [vmem:[%s6396_s0 + $0x198] sm:$0xff] }
 0x21b   :  { %v2217_v23 = vor.u32 1.1754944e-38, %v2216_v33  ;;  %3258 = vrcp.f32 %v2244_v46  ;;  %v2209_v36 = vadd.f32 %v3257_v0, %v2208_v21  ;;  %v5722_v5 = vmul.f32 0.5, %v5596_v4 }
 0x21c   :  { %3075 = vst [vmem:[%s6399_s3 + $0x168] sm:$0xff] %v3011_v50  ;;  %v2282_v55 = vadd.f32 0.4994258, %v2281_v62  ;;  %v2309_v52 = vadd.f32 0.05243302, %v2308_v28  ;;  %v5725_v49 = vmul.f32 %v2233_v24, %v5593_v9  ;;  %v2272_v1 = vmul.f32 %v2271_v22, %v5641_v6 }
 0x21d   :  { %v2318_v19 = vadd.f32 0.014752088, %v2317_v31  ;;  %v5729_v2 = vmul.f32 0.70710677, %v5693_v30  ;;  %v2213_v26 = vsel %vm5707_vm10, %v3257_v0, %v2209_v36  ;;  %vm2250_vm12 = vweird.f32 %v2244_v46 }
 0x21e   :  { %v2283_v32 = vmul.f32 %v2282_v55, %v5641_v6  ;;  %v2310_v4 = vmul.f32 %v2309_v52, %v5655_v25  ;;  %v2218_v56 = vsel %vm5711_vm11, %v2217_v23, %v2213_v26  ;;  %v133_v40 = vmul.f32 %v5535_v13, %v65_v17 }
 0x21f   :  { %v2319_v9 = vmul.f32 %v2318_v19, %v5655_v25  ;;  %v2342_v41 = vmul.f32 %v5729_v2, %v5729_v2  ;;  %v2219_v37 = vmul.f32 %v2218_v56, %v2194_v58  ;;  %v2254_v11 = vand.u32 2147483647, %v2244_v46 }
 0x220   :  { %v2284_v43 = vadd.f32 1.0, %v2283_v32  ;;  %v2311_v53 = vadd.f32 0.18741608, %v2310_v4  ;;  %v2256_v57 = vand.u32 2147483648, %v2244_v46  ;;  %v2273_v27 = vadd.f32 1.1283791, %v2272_v1 }
 0x221   :  { %v3259_v63 = vpop.eup %3258  ;;  %v2320_v42 = vadd.f32 0.112945676, %v2319_v9  ;;  %v5744_v47 = vmin.f32 %v2342_v41, 16.0  ;;  %v3144_v45 = vclamps-f32 %v2219_v37, 1.0  ;;  %v5747_v61 = vadd.f32 %v5571_v18, %v133_v40 }
 0x222   :  { %v2246_v35 = vmul.f32 %v3259_v63, %v2244_v46  ;;  %3260 = vrcp.f32 %v2284_v43  ;;  %vm2251_vm13 = vweird.f32 %v3259_v63  ;;  %v2294_v0 = vand.u32 2147483647, %v2284_v43 }
 0x223   :  { %v66_v6 = vld [vmem:[%s6396_s0 + $0x1a0] sm:$0xff]  ;;  %v2312_v33 = vmul.f32 %v2311_v53, %v5655_v25  ;;  %v2948_v34 = vadd.f32 1.0, %v3144_v45  ;;  %v2321_v15 = vmul.f32 %v2320_v42, %v5655_v25  ;;  %v2344_v48 = vmul.f32 2.1237322e-06, %v5744_v47  ;;  %vm5761_vm15 = vmor %vm2250_vm12, %vm2251_vm13 }
 0x224   :  { %v134_v12 = vmul.f32 %v5535_v13, %v66_v6  ;;  %v2247_v3 = vsub.f32 1.0, %v2246_v35  ;;  %vm5753_vm14 = vcmp.eq.f32.partialorder %v2254_v11, 8.507059e+37  ;;  %v2257_v51 = vor.u32 1.1754944e-38, %v2256_v57 }
 0x225   :  { %v2274_v59 = vmul.f32 %v2273_v27, %v5603_v38  ;;  %v2296_v29 = vand.u32 2147483648, %v2284_v43  ;;  %v3012_v10 = vmul.f32 %v2948_v34, %v5621_v7  ;;  %v2322_v24 = vadd.f32 0.4994258, %v2321_v15 }
 0x226   :  { %v2248_v16 = vmul.f32 %v3259_v63, %v2247_v3  ;;  %v2345_v39 = vadd.f32 0.00028619796, %v2344_v48  ;;  %vm2290_vm0 = vweird.f32 %v2284_v43  ;;  %vm5765_vm1 = vcmp.eq.f32.partialorder %v2294_v0, 8.507059e+37 }
 0x227   :  { %v2313_v31 = vadd.f32 1.1283791, %v2312_v33  ;;  %v2355_v38 = vmul.f32 3.8918573e-05, %v5744_v47  ;;  %v5771_v50 = vmul.f32 0.70710677, %v5747_v61  ;;  %v2323_v21 = vmul.f32 %v2322_v24, %v5655_v25 }
 0x228   :  { %v3261_v7 = vpop.eup %3260  ;;  %3076 = vst [vmem:[%s6399_s3 + $0x170] sm:$0xff] %v3012_v10  ;;  %v2249_v46 = vadd.f32 %v3259_v63, %v2248_v16  ;;  %v2346_v28 = vmul.f32 %v2345_v39, %v5744_v47  ;;  %v5779_v58 = vadd.f32 %v5571_v18, %v134_v12  ;;  %v2297_v60 = vor.u32 1.1754944e-38, %v2296_v29 }
 0x229   :  { %v2286_v8 = vmul.f32 %v3261_v7, %v2284_v43  ;;  %v2356_v23 = vadd.f32 0.001143296, %v2355_v38  ;;  %v2382_v17 = vmul.f32 %v5771_v50, %v5771_v50  ;;  %vm2291_vm2 = vweird.f32 %v3261_v7 }
 0x22a   :  { %v2253_v36 = vsel %vm5761_vm15, %v3259_v63, %v2249_v46  ;;  %v5785_v55 = vadd.f32 1.0, %v2323_v21  ;;  %v2347_v52 = vadd.f32 0.0036580483, %v2346_v28  ;;  %v5797_v56 = vmul.f32 %v2313_v31, %v5627_v44  ;;  %vm5807_vm3 = vmor %vm2290_vm0, %vm2291_vm2 }
 0x22b   :  { %v2258_v1 = vsel %vm5753_vm14, %v2257_v51, %v2253_v36  ;;  %v2287_v19 = vsub.f32 1.0, %v2286_v8  ;;  %v2357_v26 = vmul.f32 %v2356_v23, %v5744_v47  ;;  %v5793_v32 = vmin.f32 %v2382_v17, 16.0 }
 0x22c   :  { %v2259_v4 = vmul.f32 %v2258_v1, %v5725_v49  ;;  %3262 = vrcp.f32 %v5785_v55  ;;  %v5801_v9 = vmul.f32 0.70710677, %v5779_v58  ;;  %v2348_v40 = vmul.f32 %v2347_v52, %v5744_v47 }
 0x22d   :  { %v2288_v41 = vmul.f32 %v3261_v7, %v2287_v19  ;;  %v2358_v37 = vadd.f32 0.014752088, %v2357_v26  ;;  %v2336_v44 = vand.u32 2147483648, %v5785_v55  ;;  %v2384_v49 = vmul.f32 2.1237322e-06, %v5793_v32 }
 0x22e   :  { %v3145_v53 = vclamps-f32 %v2259_v4, 1.0  ;;  %v2395_v63 = vmul.f32 3.8918573e-05, %v5793_v32  ;;  %vm2330_vm4 = vweird.f32 %v5785_v55  ;;  %v2349_v27 = vadd.f32 0.05243302, %v2348_v40 }
 0x22f   :  { %v67_v25 = vld [vmem:[%s6396_s0 + $0x1a8] sm:$0xff]  ;;  %v2289_v57 = vadd.f32 %v3261_v7, %v2288_v41  ;;  %v2359_v42 = vmul.f32 %v2358_v37, %v5744_v47  ;;  %v2385_v35 = vadd.f32 0.00028619796, %v2384_v49  ;;  %v2422_v43 = vmul.f32 %v5801_v9, %v5801_v9 }
 0x230   :  { %v135_v11 = vmul.f32 %v5535_v13, %v67_v25  ;;  %v2949_v45 = vadd.f32 1.0, %v3145_v53  ;;  %v2396_v0 = vadd.f32 0.001143296, %v2395_v63  ;;  %v2334_v12 = vand.u32 2147483647, %v5785_v55 }
 0x231   :  { %v2293_v33 = vsel %vm5807_vm3, %v3261_v7, %v2289_v57  ;;  %v2350_v34 = vmul.f32 %v2349_v27, %v5744_v47  ;;  %v2360_v3 = vadd.f32 0.112945676, %v2359_v42  ;;  %v2337_v51 = vor.u32 1.1754944e-38, %v2336_v44 }
 0x232   :  { %v3263_v15 = vpop.eup %3262  ;;  %v3013_v48 = vmul.f32 %v2949_v45, %v5701_v20  ;;  %v2298_v54 = vsel %vm5765_vm1, %v2297_v60, %v2293_v33  ;;  %v2386_v29 = vmul.f32 %v2385_v35, %v5793_v32  ;;  %v5828_v39 = vadd.f32 %v5571_v18, %v135_v11 }
 0x233   :  { %v2299_v10 = vmul.f32 %v2298_v54, %v2274_v59  ;;  %v2326_v16 = vmul.f32 %v3263_v15, %v5785_v55  ;;  %v2351_v24 = vadd.f32 0.18741608, %v2350_v34  ;;  %v2361_v22 = vmul.f32 %v2360_v3, %v5744_v47 }
 0x234   :  { %3077 = vst [vmem:[%s6399_s3 + $0x178] sm:$0xff] %v3013_v48  ;;  %v2387_v20 = vadd.f32 0.0036580483, %v2386_v29  ;;  %v2397_v62 = vmul.f32 %v2396_v0, %v5793_v32  ;;  %v5835_v31 = vmin.f32 %v2422_v43, 16.0  ;;  %vm2331_vm5 = vweird.f32 %v3263_v15 }
 0x235   :  { %v3146_v38 = vclamps-f32 %v2299_v10, 1.0  ;;  %v2327_v7 = vsub.f32 1.0, %v2326_v16  ;;  %v2352_v59 = vmul.f32 %v2351_v24, %v5744_v47  ;;  %v2362_v46 = vadd.f32 0.4994258, %v2361_v22  ;;  %vm5846_vm6 = vmor %vm2330_vm4, %vm2331_vm5 }
 0x236   :  { %v2388_v21 = vmul.f32 %v2387_v20, %v5793_v32  ;;  %v2398_v28 = vadd.f32 0.014752088, %v2397_v62  ;;  %v2424_v8 = vmul.f32 2.1237322e-06, %v5835_v31  ;;  %v2435_v17 = vmul.f32 3.8918573e-05, %v5835_v31 }
 0x237   :  { %v2950_v60 = vadd.f32 1.0, %v3146_v38  ;;  %v2328_v23 = vmul.f32 %v3263_v15, %v2327_v7  ;;  %v5842_v36 = vmul.f32 0.70710677, %v5828_v39  ;;  %v2363_v25 = vmul.f32 %v2362_v46, %v5744_v47 }
 0x238   :  { %v2389_v1 = vadd.f32 0.05243302, %v2388_v21  ;;  %v2399_v19 = vmul.f32 %v2398_v28, %v5793_v32  ;;  %v2425_v26 = vadd.f32 0.00028619796, %v2424_v8  ;;  %vm2335_vm7 = vcmp.eq.f32.partialorder %v2334_v12, 8.507059e+37 }
 0x239   :  { %v3014_v4 = vmul.f32 %v2950_v60, %v5722_v5  ;;  %v2329_v41 = vadd.f32 %v3263_v15, %v2328_v23  ;;  %v2436_v40 = vadd.f32 0.001143296, %v2435_v17  ;;  %v2364_v37 = vadd.f32 1.0, %v2363_v25 }
 0x23a   :  { %v2390_v11 = vmul.f32 %v2389_v1, %v5793_v32  ;;  %v2400_v53 = vadd.f32 0.112945676, %v2399_v19  ;;  %v2426_v55 = vmul.f32 %v2425_v26, %v5835_v31  ;;  %v2353_v6 = vadd.f32 1.1283791, %v2352_v59 }
 0x23b   :  { %3078 = vst [vmem:[%s6399_s3 + $0x180] sm:$0xff] %v3014_v4  ;;  %v2333_v47 = vsel %vm5846_vm6, %v3263_v15, %v2329_v41  ;;  %v2437_v44 = vmul.f32 %v2436_v40, %v5835_v31  ;;  %v2462_v5 = vmul.f32 %v5842_v36, %v5842_v36  ;;  %v263_v49 = vmul.f32 0.5, %v5606_v14 }
 0x23c   :  { %v2338_v63 = vsel %vm2335_vm7, %v2337_v51, %v2333_v47  ;;  %3264 = vrcp.f32 %v2364_v37  ;;  %v5866_v27 = vmul.f32 0.5, %v5693_v30  ;;  %v2391_v42 = vadd.f32 0.18741608, %v2390_v11 }
 0x23d   :  { %v2339_v57 = vmul.f32 %v2338_v63, %v5797_v56  ;;  %v2401_v45 = vmul.f32 %v2400_v53, %v5793_v32  ;;  %v5873_v0 = vmul.f32 0.5, %v5747_v61  ;;  %v2427_v43 = vadd.f32 0.0036580483, %v2426_v55 }
 0x23e   :  { %v2438_v33 = vadd.f32 0.014752088, %v2437_v44  ;;  %v5875_v14 = vmin.f32 %v2462_v5, 16.0  ;;  %v2354_v56 = vmul.f32 %v2353_v6, %v5729_v2  ;;  %v5879_v30 = vmul.f32 0.5, %v5779_v58 }
 0x23f   :  { %v3147_v12 = vclamps-f32 %v2339_v57, 1.0  ;;  %v2402_v34 = vadd.f32 0.4994258, %v2401_v45  ;;  %v2374_v3 = vand.u32 2147483647, %v2364_v37  ;;  %v2428_v15 = vmul.f32 %v2427_v43, %v5835_v31 }
 0x240   :  { %v2439_v48 = vmul.f32 %v2438_v33, %v5835_v31  ;;  %v2464_v54 = vmul.f32 2.1237322e-06, %v5875_v14  ;;  %v2475_v29 = vmul.f32 3.8918573e-05, %v5875_v14  ;;  %v2392_v2 = vmul.f32 %v2391_v42, %v5793_v32 }
 0x241   :  { %v2951_v61 = vadd.f32 1.0, %v3147_v12  ;;  %v2403_v51 = vmul.f32 %v2402_v34, %v5793_v32  ;;  %v2429_v24 = vadd.f32 0.05243302, %v2428_v15  ;;  %vm2370_vm8 = vweird.f32 %v2364_v37 }
 0x242   :  { %v68_v35 = vld [vmem:[%s6396_s0 + $0x1b0] sm:$0xff]  ;;  %v3265_v16 = vpop.eup %3264  ;;  %v2440_v58 = vadd.f32 0.112945676, %v2439_v48  ;;  %v2465_v22 = vadd.f32 0.00028619796, %v2464_v54  ;;  %v2376_v38 = vand.u32 2147483648, %v2364_v37 }
 0x243   :  { %v136_v10 = vmul.f32 %v5535_v13, %v68_v35  ;;  %v3015_v20 = vmul.f32 %v2951_v61, %v263_v49  ;;  %v2366_v62 = vmul.f32 %v3265_v16, %v2364_v37  ;;  %v69_v7 = vld [vmem:[%s6396_s0 + $0x1b8] sm:$0xff]  ;;  %vm2371_vm9 = vweird.f32 %v3265_v16 }
 0x244   :  { %v2404_v59 = vadd.f32 1.0, %v2403_v51  ;;  %v2430_v46 = vmul.f32 %v2429_v24, %v5835_v31  ;;  %v2441_v21 = vmul.f32 %v2440_v58, %v5835_v31  ;;  %v2466_v28 = vmul.f32 %v2465_v22, %v5875_v14  ;;  %vm5907_vm11 = vmor %vm2370_vm8, %vm2371_vm9 }
 0x245   :  { %3079 = vst [vmem:[%s6399_s3 + $0x188] sm:$0xff] %v3015_v20  ;;  %v2367_v32 = vsub.f32 1.0, %v2366_v62  ;;  %v2476_v8 = vadd.f32 0.001143296, %v2475_v29  ;;  %v5898_v60 = vadd.f32 %v5571_v18, %v136_v10  ;;  %vm5900_vm10 = vcmp.eq.f32.partialorder %v2374_v3, 8.507059e+37 }
 0x246   :  { %v2393_v17 = vadd.f32 1.1283791, %v2392_v2  ;;  %3266 = vrcp.f32 %v2404_v59  ;;  %v137_v52 = vmul.f32 %v5535_v13, %v69_v7  ;;  %v2431_v1 = vadd.f32 0.18741608, %v2430_v46 }
 0x247   :  { %v2368_v25 = vmul.f32 %v3265_v16, %v2367_v32  ;;  %v2442_v19 = vadd.f32 0.4994258, %v2441_v21  ;;  %v2467_v26 = vadd.f32 0.0036580483, %v2466_v28  ;;  %v2377_v41 = vor.u32 1.1754944e-38, %v2376_v38 }
 0x248   :  { %v2414_v40 = vand.u32 2147483647, %v2404_v59  ;;  %v2477_v11 = vmul.f32 %v2476_v8, %v5875_v14  ;;  %v5913_v53 = vmul.f32 0.70710677, %v5898_v60  ;;  %v2432_v47 = vmul.f32 %v2431_v1, %v5835_v31 }
 0x249   :  { %v2369_v55 = vadd.f32 %v3265_v16, %v2368_v25  ;;  %v2443_v6 = vmul.f32 %v2442_v19, %v5835_v31  ;;  %v2468_v44 = vmul.f32 %v2467_v26, %v5875_v14  ;;  %v2416_v5 = vand.u32 2147483648, %v2404_v59 }
 0x24a   :  { %v2478_v37 = vadd.f32 0.014752088, %v2477_v11  ;;  %v2502_v49 = vmul.f32 %v5913_v53, %v5913_v53  ;;  %v5921_v63 = vadd.f32 %v5571_v18, %v137_v52  ;;  %v2394_v42 = vmul.f32 %v2393_v17, %v5771_v50 }
 0x24b   :  { %v2373_v57 = vsel %vm5907_vm11, %v3265_v16, %v2369_v55  ;;  %v5926_v45 = vadd.f32 1.0, %v2443_v6  ;;  %v5929_v35 = vmul.f32 0.5, %v5828_v39  ;;  %v2469_v33 = vadd.f32 0.05243302, %v2468_v44 }
 0x24c   :  { %v3267_v31 = vpop.eup %3266  ;;  %v2378_v43 = vsel %vm5900_vm10, %v2377_v41, %v2373_v57  ;;  %v2479_v12 = vmul.f32 %v2478_v37, %v5875_v14  ;;  %v5934_v34 = vmin.f32 %v2502_v49, 16.0  ;;  %vm2410_vm12 = vweird.f32 %v2404_v59  ;;  %v70_v50 = vld [vmem:[%s6396_s0 + $0x1c0] sm:$0xff] }
 0x24d   :  { %v2379_v3 = vmul.f32 %v2378_v43, %v2354_v56  ;;  %v2406_v15 = vmul.f32 %v3267_v31, %v2404_v59  ;;  %v2433_v48 = vadd.f32 1.1283791, %v2432_v47  ;;  %vm5939_vm13 = vcmp.eq.f32.partialorder %v2414_v40, 8.507059e+37 }
 0x24e   :  { %v2417_v54 = vor.u32 1.1754944e-38, %v2416_v5  ;;  %3268 = vrcp.f32 %v5926_v45  ;;  %v5945_v61 = vmul.f32 0.70710677, %v5921_v63  ;;  %vm2411_vm14 = vweird.f32 %v3267_v31 }
 0x24f   :  { %v3148_v51 = vclamps-f32 %v2379_v3, 1.0  ;;  %v2407_v29 = vsub.f32 1.0, %v2406_v15  ;;  %v2480_v56 = vadd.f32 0.112945676, %v2479_v12  ;;  %v2470_v10 = vmul.f32 %v2469_v33, %v5875_v14  ;;  %vm5954_vm15 = vmor %vm2410_vm12, %vm2411_vm14 }
 0x250   :  { %v2504_v16 = vmul.f32 2.1237322e-06, %v5934_v34  ;;  %v2515_v2 = vmul.f32 3.8918573e-05, %v5934_v34  ;;  %v138_v24 = vmul.f32 %v5535_v13, %v70_v50  ;;  %v2434_v20 = vmul.f32 %v2433_v48, %v5801_v9 }
 0x251   :  { %v2952_v58 = vadd.f32 1.0, %v3148_v51  ;;  %v2408_v22 = vmul.f32 %v3267_v31, %v2407_v29  ;;  %v2481_v62 = vmul.f32 %v2480_v56, %v5875_v14  ;;  %vm2450_vm0 = vweird.f32 %v5926_v45 }
 0x252   :  { %v2505_v7 = vadd.f32 0.00028619796, %v2504_v16  ;;  %v2516_v46 = vadd.f32 0.001143296, %v2515_v2  ;;  %v2542_v21 = vmul.f32 %v5945_v61, %v5945_v61  ;;  %v2454_v8 = vand.u32 2147483647, %v5926_v45 }
 0x253   :  { %v3016_v32 = vmul.f32 %v2952_v58, %v5866_v27  ;;  %v2409_v28 = vadd.f32 %v3267_v31, %v2408_v22  ;;  %v2482_v9 = vadd.f32 0.4994258, %v2481_v62  ;;  %v2456_v59 = vand.u32 2147483648, %v5926_v45 }
 0x254   :  { %v3269_v23 = vpop.eup %3268  ;;  %v2471_v17 = vadd.f32 0.18741608, %v2470_v10  ;;  %v2506_v52 = vmul.f32 %v2505_v7, %v5934_v34  ;;  %v2517_v25 = vmul.f32 %v2516_v46, %v5934_v34  ;;  %v5972_v19 = vmin.f32 %v2542_v21, 16.0 }
 0x255   :  { %3080 = vst [vmem:[%s6399_s3 + $0x190] sm:$0xff] %v3016_v32  ;;  %v2413_v1 = vsel %vm5954_vm15, %v3267_v31, %v2409_v28  ;;  %v2446_v27 = vmul.f32 %v3269_v23, %v5926_v45  ;;  %v5975_v26 = vadd.f32 %v5571_v18, %v138_v24  ;;  %v2483_v41 = vmul.f32 %v2482_v9, %v5875_v14 }
 0x256   :  { %v2418_v4 = vsel %vm5939_vm13, %v2417_v54, %v2413_v1  ;;  %v2507_v40 = vadd.f32 0.0036580483, %v2506_v52  ;;  %v2518_v11 = vadd.f32 0.014752088, %v2517_v25  ;;  %vm2451_vm1 = vweird.f32 %v3269_v23 }
 0x257   :  { %v2419_v55 = vmul.f32 %v2418_v4, %v2394_v42  ;;  %v2447_v47 = vsub.f32 1.0, %v2446_v27  ;;  %v2544_v6 = vmul.f32 2.1237322e-06, %v5972_v19  ;;  %v2472_v44 = vmul.f32 %v2471_v17, %v5875_v14  ;;  %vm5992_vm3 = vmor %vm2450_vm0, %vm2451_vm1 }
 0x258   :  { %v5982_v5 = vadd.f32 1.0, %v2483_v41  ;;  %v2508_v37 = vmul.f32 %v2507_v40, %v5934_v34  ;;  %v2519_v49 = vmul.f32 %v2518_v11, %v5934_v34  ;;  %vm5986_vm2 = vcmp.eq.f32.partialorder %v2454_v8, 8.507059e+37 }
 0x259   :  { %v3149_v57 = vclamps-f32 %v2419_v55, 1.0  ;;  %v2448_v31 = vmul.f32 %v3269_v23, %v2447_v47  ;;  %v2545_v33 = vadd.f32 0.00028619796, %v2544_v6  ;;  %v2457_v14 = vor.u32 1.1754944e-38, %v2456_v59 }
 0x25a   :  { %3270 = vrcp.f32 %v5982_v5  ;;  %v2555_v12 = vmul.f32 3.8918573e-05, %v5972_v19  ;;  %v5999_v3 = vmul.f32 0.70710677, %v5975_v26  ;;  %v2509_v50 = vadd.f32 0.05243302, %v2508_v37 }
 0x25b   :  { %v2953_v15 = vadd.f32 1.0, %v3149_v57  ;;  %v2449_v48 = vadd.f32 %v3269_v23, %v2448_v31  ;;  %v2520_v39 = vadd.f32 0.112945676, %v2519_v49  ;;  %v2473_v54 = vadd.f32 1.1283791, %v2472_v44 }
 0x25c   :  { %v2494_v51 = vand.u32 2147483647, %v5982_v5  ;;  %v6003_v45 = vmul.f32 0.5, %v5898_v60  ;;  %v2546_v29 = vmul.f32 %v2545_v33, %v5972_v19  ;;  %v2510_v16 = vmul.f32 %v2509_v50, %v5934_v34 }
 0x25d   :  { %v3017_v56 = vmul.f32 %v2953_v15, %v5873_v0  ;;  %v2453_v10 = vsel %vm5992_vm3, %v3269_v23, %v2449_v48  ;;  %v2521_v2 = vmul.f32 %v2520_v39, %v5934_v34  ;;  %v2556_v22 = vadd.f32 0.001143296, %v2555_v12 }
 0x25e   :  { %v2458_v24 = vsel %vm5986_vm2, %v2457_v14, %v2453_v10  ;;  %v2547_v58 = vadd.f32 0.0036580483, %v2546_v29  ;;  %v2582_v60 = vmul.f32 %v5999_v3, %v5999_v3  ;;  %vm2490_vm4 = vweird.f32 %v5982_v5 }
 0x25f   :  { %3081 = vst [vmem:[%s6399_s3 + $0x198] sm:$0xff] %v3017_v56  ;;  %v2459_v0 = vmul.f32 %v2458_v24, %v2434_v20  ;;  %v2511_v62 = vadd.f32 0.18741608, %v2510_v16  ;;  %v2522_v38 = vadd.f32 0.4994258, %v2521_v2  ;;  %v2496_v46 = vand.u32 2147483648, %v5982_v5 }
 0x260   :  { %v3271_v7 = vpop.eup %3270  ;;  %v2548_v21 = vmul.f32 %v2547_v58, %v5972_v19  ;;  %v2557_v32 = vmul.f32 %v2556_v22, %v5972_v19  ;;  %v6022_v28 = vmin.f32 %v2582_v60, 16.0  ;;  %v2474_v57 = vmul.f32 %v2473_v54, %v5842_v36 }
 0x261   :  { %v3150_v8 = vclamps-f32 %v2459_v0, 1.0  ;;  %v2486_v9 = vmul.f32 %v3271_v7, %v5982_v5  ;;  %vm2491_vm5 = vweird.f32 %v3271_v7  ;;  %v2512_v23 = vmul.f32 %v2511_v62, %v5934_v34 }
 0x262   :  { %v2523_v17 = vmul.f32 %v2522_v38, %v5934_v34  ;;  %v2549_v52 = vadd.f32 0.05243302, %v2548_v21  ;;  %v2558_v25 = vadd.f32 0.014752088, %v2557_v32  ;;  %v2584_v1 = vmul.f32 2.1237322e-06, %v6022_v28  ;;  %vm6045_vm6 = vmor %vm2490_vm4, %vm2491_vm5 }
 0x263   :  { %v2954_v27 = vadd.f32 1.0, %v3150_v8  ;;  %v2487_v4 = vsub.f32 1.0, %v2486_v9  ;;  %v2513_v41 = vadd.f32 1.1283791, %v2512_v23  ;;  %v2595_v40 = vmul.f32 3.8918573e-05, %v6022_v28 }
 0x264   :  { %v6035_v11 = vadd.f32 1.0, %v2523_v17  ;;  %v2559_v55 = vmul.f32 %v2558_v25, %v5972_v19  ;;  %v2585_v47 = vadd.f32 0.00028619796, %v2584_v1  ;;  %v2550_v34 = vmul.f32 %v2549_v52, %v5972_v19 }
 0x265   :  { %v3018_v44 = vmul.f32 %v2954_v27, %v5879_v30  ;;  %v2488_v37 = vmul.f32 %v3271_v7, %v2487_v4  ;;  %v2596_v49 = vadd.f32 0.001143296, %v2595_v40  ;;  %v2497_v43 = vor.u32 1.1754944e-38, %v2496_v46 }
 0x266   :  { %v71_v20 = vld [vmem:[%s6396_s0 + $0x1c8] sm:$0xff]  ;;  %v72_v59 = vld [vmem:[%s6396_s0 + $0x1d0] sm:$0xff]  ;;  %3272 = vrcp.f32 %v6035_v11  ;;  %vm2495_vm7 = vcmp.eq.f32.partialorder %v2494_v51, 8.507059e+37  ;;  %v6060_v5 = vmul.f32 %v2513_v41, %v5913_v53  ;;  %v2560_v33 = vadd.f32 0.112945676, %v2559_v55 }
 0x267   :  { %v139_v6 = vmul.f32 %v5535_v13, %v71_v20  ;;  %v6053_v13 = vld [vmem:[%s6397_s1] ss:$0 sm:$0xff]  ;;  %3082 = vst [vmem:[%s6399_s3 + $0x1a0] sm:$0xff] %v3018_v44  ;;  %v2489_v36 = vadd.f32 %v3271_v7, %v2488_v37  ;;  %vm2530_vm8 = vweird.f32 %v6035_v11  ;;  %v2534_v42 = vand.u32 2147483647, %v6035_v11 }
 0x268   :  { %v140_v30 = vmul.f32 %v6053_v13, %v72_v59  ;;  %v2586_v14 = vmul.f32 %v2585_v47, %v6022_v28  ;;  %v2597_v12 = vmul.f32 %v2596_v49, %v6022_v28  ;;  %v2551_v48 = vadd.f32 0.18741608, %v2550_v34  ;;  %v6098_v59 = vld [vmem:[%s6398_s2] ss:$0 sm:$0xff] }
 0x269   :  { %v2493_v15 = vsel %vm6045_vm6, %v3271_v7, %v2489_v36  ;;  %v2561_v50 = vmul.f32 %v2560_v33, %v5972_v19  ;;  %v6070_v39 = vadd.f32 %v5571_v18, %v139_v6  ;;  %v2536_v16 = vand.u32 2147483648, %v6035_v11 }
 0x26a   :  { %v2498_v54 = vsel %vm2495_vm7, %v2497_v43, %v2493_v15  ;;  %v2587_v51 = vadd.f32 0.0036580483, %v2586_v14  ;;  %v2598_v29 = vadd.f32 0.014752088, %v2597_v12  ;;  %v6076_v56 = vadd.f32 %v5571_v18, %v140_v30 }
 0x26b   :  { %v2499_v10 = vmul.f32 %v2498_v54, %v2474_v57  ;;  %v2562_v2 = vadd.f32 0.4994258, %v2561_v50  ;;  %v6080_v24 = vmul.f32 0.70710677, %v6070_v39  ;;  %v2552_v7 = vmul.f32 %v2551_v48, %v5972_v19 }
 0x26c   :  { %v3273_v58 = vpop.eup %3272  ;;  %v2588_v22 = vmul.f32 %v2587_v51, %v6022_v28  ;;  %v2599_v60 = vmul.f32 %v2598_v29, %v6022_v28  ;;  %v6085_v0 = vmul.f32 0.70710677, %v6076_v56  ;;  %v2537_v41 = vor.u32 1.1754944e-38, %v2536_v16 }
 0x26d   :  { %v3151_v38 = vclamps-f32 %v2499_v10, 1.0  ;;  %v2526_v18 = vmul.f32 %v3273_v58, %v6035_v11  ;;  %vm2531_vm9 = vweird.f32 %v3273_v58  ;;  %v2563_v46 = vmul.f32 %v2562_v2, %v5972_v19 }
 0x26e   :  { %v73_v53 = vld [vmem:[%s6396_s0 + $0x1d8] sm:$0xff]  ;;  %v2589_v21 = vadd.f32 0.05243302, %v2588_v22  ;;  %v2600_v32 = vadd.f32 0.112945676, %v2599_v60  ;;  %v2622_v8 = vmul.f32 %v6080_v24, %v6080_v24  ;;  %v2662_v20 = vmul.f32 %v6085_v0, %v6085_v0  ;;  %vm6111_vm10 = vmor %vm2530_vm8, %vm2531_vm9 }
 0x26f   :  { %v141_v62 = vmul.f32 %v6053_v13, %v73_v53  ;;  %v2955_v9 = vadd.f32 1.0, %v3151_v38  ;;  %v2527_v23 = vsub.f32 1.0, %v2526_v18  ;;  %v2564_v52 = vadd.f32 1.0, %v2563_v46 }
 0x270   :  { %v2590_v19 = vmul.f32 %v2589_v21, %v6022_v28  ;;  %v2601_v25 = vmul.f32 %v2600_v32, %v6022_v28  ;;  %v6105_v1 = vmin.f32 %v2622_v8, 16.0  ;;  %v2553_v40 = vadd.f32 1.1283791, %v2552_v7 }
 0x271   :  { %v6101_v17 = vadd.f32 %v6098_v59, %v141_v62  ;;  %v3019_v27 = vmul.f32 %v2955_v9, %v5929_v35  ;;  %v2528_v4 = vmul.f32 %v3273_v58, %v2527_v23  ;;  %3274 = vrcp.f32 %v2564_v52 }
 0x272   :  { %v2574_v47 = vand.u32 2147483647, %v2564_v52  ;;  %v6115_v6 = vmin.f32 %v2662_v20, 16.0  ;;  %vm2535_vm11 = vcmp.eq.f32.partialorder %v2534_v42, 8.507059e+37  ;;  %v2591_v37 = vadd.f32 0.18741608, %v2590_v19 }
 0x273   :  { %v6118_v44 = vmul.f32 0.70710677, %v6101_v17  ;;  %3083 = vst [vmem:[%s6399_s3 + $0x1a8] sm:$0xff] %v3019_v27  ;;  %v2529_v35 = vadd.f32 %v3273_v58, %v2528_v4  ;;  %v2602_v34 = vadd.f32 0.4994258, %v2601_v25  ;;  %v6124_v11 = vmul.f32 0.5, %v5921_v63 }
 0x274   :  { %v2576_v49 = vand.u32 2147483648, %v2564_v52  ;;  %v2624_v57 = vmul.f32 2.1237322e-06, %v6105_v1  ;;  %v2635_v31 = vmul.f32 3.8918573e-05, %v6105_v1  ;;  %v2592_v30 = vmul.f32 %v2591_v37, %v6022_v28 }
 0x275   :  { %v2533_v43 = vsel %vm6111_vm10, %v3273_v58, %v2529_v35  ;;  %v2603_v36 = vmul.f32 %v2602_v34, %v6022_v28  ;;  %v2664_v33 = vmul.f32 2.1237322e-06, %v6115_v6  ;;  %v2675_v63 = vmul.f32 3.8918573e-05, %v6115_v6 }
 0x276   :  { %v2538_v42 = vsel %vm2535_vm11, %v2537_v41, %v2533_v43  ;;  %v2625_v14 = vadd.f32 0.00028619796, %v2624_v57  ;;  %v2636_v12 = vadd.f32 0.001143296, %v2635_v31  ;;  %v2554_v48 = vmul.f32 %v2553_v40, %v5945_v61 }
 0x277   :  { %v2539_v15 = vmul.f32 %v2538_v42, %v6060_v5  ;;  %v2593_v50 = vadd.f32 1.1283791, %v2592_v30  ;;  %v2604_v53 = vadd.f32 1.0, %v2603_v36  ;;  %v3275_v54 = vpop.eup %3274  ;;  %v2665_v10 = vadd.f32 0.00028619796, %v2664_v33 }
 0x278   :  { %v2626_v51 = vmul.f32 %v2625_v14, %v6105_v1  ;;  %v2637_v29 = vmul.f32 %v2636_v12, %v6105_v1  ;;  %v2676_v28 = vadd.f32 0.001143296, %v2675_v63  ;;  %v2566_v2 = vmul.f32 %v3275_v54, %v2564_v52 }
 0x279   :  { %v3152_v16 = vclamps-f32 %v2539_v15, 1.0  ;;  %vm2570_vm12 = vweird.f32 %v2564_v52  ;;  %vm6138_vm13 = vcmp.eq.f32.partialorder %v2574_v47, 8.507059e+37  ;;  %vm2571_vm14 = vweird.f32 %v3275_v54 }
 0x27a   :  { %v2577_v5 = vor.u32 1.1754944e-38, %v2576_v49  ;;  %3276 = vrcp.f32 %v2604_v53  ;;  %v2702_v61 = vmul.f32 %v6118_v44, %v6118_v44  ;;  %v2567_v60 = vsub.f32 1.0, %v2566_v2  ;;  %vm6154_vm15 = vmor %vm2570_vm12, %vm2571_vm14 }
 0x27b   :  { %v2956_v22 = vadd.f32 1.0, %v3152_v16  ;;  %v2627_v62 = vadd.f32 0.0036580483, %v2626_v51  ;;  %v2638_v38 = vadd.f32 0.014752088, %v2637_v29  ;;  %v6145_v18 = vmul.f32 %v2593_v50, %v5999_v3 }
 0x27c   :  { %v2614_v7 = vand.u32 2147483647, %v2604_v53  ;;  %v2666_v46 = vmul.f32 %v2665_v10, %v6115_v6  ;;  %v2677_v21 = vmul.f32 %v2676_v28, %v6115_v6  ;;  %v2568_v8 = vmul.f32 %v3275_v54, %v2567_v60 }
 0x27d   :  { %v3020_v32 = vmul.f32 %v2956_v22, %v6003_v45  ;;  %v2628_v9 = vmul.f32 %v2627_v62, %v6105_v1  ;;  %v2639_v23 = vmul.f32 %v2638_v38, %v6105_v1  ;;  %vm2610_vm0 = vweird.f32 %v2604_v53 }
 0x27e   :  { %v2667_v3 = vadd.f32 0.0036580483, %v2666_v46  ;;  %v2678_v19 = vadd.f32 0.014752088, %v2677_v21  ;;  %v6158_v25 = vmin.f32 %v2702_v61, 16.0  ;;  %v2569_v45 = vadd.f32 %v3275_v54, %v2568_v8 }
 0x27f   :  { %3084 = vst [vmem:[%s6399_s3 + $0x1b0] sm:$0xff] %v3020_v32  ;;  %v2616_v27 = vand.u32 2147483648, %v2604_v53  ;;  %v2629_v4 = vadd.f32 0.05243302, %v2628_v9  ;;  %v2640_v41 = vadd.f32 0.112945676, %v2639_v23 }
 0x280   :  { %v3277_v40 = vpop.eup %3276  ;;  %vm6163_vm1 = vcmp.eq.f32.partialorder %v2614_v7, 8.507059e+37  ;;  %v2668_v55 = vmul.f32 %v2667_v3, %v6115_v6  ;;  %v2679_v47 = vmul.f32 %v2678_v19, %v6115_v6  ;;  %v2704_v35 = vmul.f32 2.1237322e-06, %v6158_v25 }
 0x281   :  { %v2573_v37 = vsel %vm6154_vm15, %v3275_v54, %v2569_v45  ;;  %v2606_v34 = vmul.f32 %v3277_v40, %v2604_v53  ;;  %v2630_v49 = vmul.f32 %v2629_v4, %v6105_v1  ;;  %v2715_v57 = vmul.f32 3.8918573e-05, %v6158_v25 }
 0x282   :  { %v2578_v31 = vsel %vm6138_vm13, %v2577_v5, %v2573_v37  ;;  %v2641_v43 = vmul.f32 %v2640_v41, %v6105_v1  ;;  %v2669_v30 = vadd.f32 0.05243302, %v2668_v55  ;;  %v2680_v36 = vadd.f32 0.112945676, %v2679_v47 }
 0x283   :  { %v2579_v33 = vmul.f32 %v2578_v31, %v2554_v48  ;;  %v2607_v42 = vsub.f32 1.0, %v2606_v34  ;;  %vm2611_vm2 = vweird.f32 %v3277_v40  ;;  %v2631_v14 = vadd.f32 0.18741608, %v2630_v49 }
 0x284   :  { %v2642_v12 = vadd.f32 0.4994258, %v2641_v43  ;;  %v2670_v63 = vmul.f32 %v2669_v30, %v6115_v6  ;;  %v2681_v15 = vmul.f32 %v2680_v36, %v6115_v6  ;;  %v2705_v50 = vadd.f32 0.00028619796, %v2704_v35  ;;  %vm6183_vm3 = vmor %vm2610_vm0, %vm2611_vm2 }
 0x285   :  { %v3153_v54 = vclamps-f32 %v2579_v33, 1.0  ;;  %v2608_v51 = vmul.f32 %v3277_v40, %v2607_v42  ;;  %v2617_v29 = vor.u32 1.1754944e-38, %v2616_v27  ;;  %v2716_v10 = vadd.f32 0.001143296, %v2715_v57 }
 0x286   :  { %v74_v28 = vld [vmem:[%s6396_s0 + $0x1e0] sm:$0xff]  ;;  %v2632_v16 = vmul.f32 %v2631_v14, %v6105_v1  ;;  %v2643_v2 = vmul.f32 %v2642_v12, %v6105_v1  ;;  %v2682_v58 = vadd.f32 0.4994258, %v2681_v15  ;;  %v2706_v5 = vmul.f32 %v2705_v50, %v6158_v25 }
 0x287   :  { %v2957_v61 = vadd.f32 1.0, %v3153_v54  ;;  %v2609_v22 = vadd.f32 %v3277_v40, %v2608_v51  ;;  %v2671_v60 = vadd.f32 0.18741608, %v2670_v63  ;;  %v2717_v62 = vmul.f32 %v2716_v10, %v6158_v25 }
 0x288   :  { %v2644_v38 = vadd.f32 1.0, %v2643_v2  ;;  %v2683_v7 = vmul.f32 %v2682_v58, %v6115_v6  ;;  %v2707_v53 = vadd.f32 0.0036580483, %v2706_v5  ;;  %v142_v46 = vmul.f32 %v6053_v13, %v74_v28 }
 0x289   :  { %v3021_v21 = vmul.f32 %v2957_v61, %v6124_v11  ;;  %v2613_v32 = vsel %vm6183_vm3, %v3277_v40, %v2609_v22  ;;  %v2718_v1 = vadd.f32 0.014752088, %v2717_v62  ;;  %v2633_v9 = vadd.f32 1.1283791, %v2632_v16 }
 0x28a   :  { %v2618_v8 = vsel %vm6163_vm1, %v2617_v29, %v2613_v32  ;;  %3278 = vrcp.f32 %v2644_v38  ;;  %v270_v23 = vmul.f32 0.5, %v5975_v26  ;;  %v2672_v3 = vmul.f32 %v2671_v60, %v6115_v6 }
 0x28b   :  { %3085 = vst [vmem:[%s6399_s3 + $0x1b8] sm:$0xff] %v3021_v21  ;;  %v2619_v20 = vmul.f32 %v2618_v8, %v6145_v18  ;;  %v6204_v11 = vadd.f32 1.0, %v2683_v7  ;;  %v2654_v19 = vand.u32 2147483647, %v2644_v38  ;;  %v2708_v45 = vmul.f32 %v2707_v53, %v6158_v25 }
 0x28c   :  { %v2719_v27 = vmul.f32 %v2718_v1, %v6158_v25  ;;  %v6209_v4 = vadd.f32 %v6098_v59, %v142_v46  ;;  %v6215_v26 = vmul.f32 0.5, %v6070_v39  ;;  %v2656_v18 = vand.u32 2147483648, %v2644_v38 }
 0x28d   :  { %v3154_v40 = vclamps-f32 %v2619_v20, 1.0  ;;  %3280 = vrcp.f32 %v6204_v11  ;;  %v2634_v52 = vmul.f32 %v2633_v9, %v6080_v24  ;;  %vm2650_vm4 = vweird.f32 %v2644_v38 }
 0x28e   :  { %v6223_v55 = vmul.f32 0.5, %v6076_v56  ;;  %v2709_v47 = vadd.f32 0.05243302, %v2708_v45  ;;  %v2720_v37 = vadd.f32 0.112945676, %v2719_v27  ;;  %vm6229_vm5 = vcmp.eq.f32.partialorder %v2654_v19, 8.507059e+37 }
 0x28f   :  { %v2958_v35 = vadd.f32 1.0, %v3154_v40  ;;  %v6226_v34 = vmul.f32 0.70710677, %v6209_v4  ;;  %v2673_v31 = vadd.f32 1.1283791, %v2672_v3  ;;  %v2657_v36 = vor.u32 1.1754944e-38, %v2656_v18 }
 0x290   :  { %v3279_v49 = vpop.eup %3278  ;;  %v2710_v24 = vmul.f32 %v2709_v47, %v6158_v25  ;;  %v2721_v33 = vmul.f32 %v2720_v37, %v6158_v25  ;;  %vm2690_vm6 = vweird.f32 %v6204_v11  ;;  %v2694_v29 = vand.u32 2147483647, %v6204_v11 }
 0x291   :  { %v3022_v56 = vmul.f32 %v2958_v35, %v270_v23  ;;  %v2646_v30 = vmul.f32 %v3279_v49, %v2644_v38  ;;  %v2742_v14 = vmul.f32 %v6226_v34, %v6226_v34  ;;  %vm2651_vm7 = vweird.f32 %v3279_v49 }
 0x292   :  { %v75_v41 = vld [vmem:[%s6396_s0 + $0x1e8] sm:$0xff]  ;;  %v76_v6 = vld [vmem:[%s6396_s0 + $0x1f0] sm:$0xff]  ;;  %v2711_v42 = vadd.f32 0.18741608, %v2710_v24  ;;  %v2722_v50 = vadd.f32 0.4994258, %v2721_v33  ;;  %vm6264_vm8 = vmor %vm2650_vm4, %vm2651_vm7  ;;  %v2674_v9 = vmul.f32 %v2673_v31, %v6085_v0 }
 0x293   :  { %v143_v39 = vmul.f32 %v6053_v13, %v75_v41  ;;  %v144_v43 = vmul.f32 %v6053_v13, %v76_v6  ;;  %v3281_v63 = vpop.eup %3280  ;;  %3086 = vst [vmem:[%s6399_s3 + $0x1c0] sm:$0xff] %v3022_v56  ;;  %v2647_v15 = vsub.f32 1.0, %v2646_v30  ;;  %v2696_v10 = vand.u32 2147483648, %v6204_v11 }
 0x294   :  { %v2686_v51 = vmul.f32 %v3281_v63, %v6204_v11  ;;  %v6251_v28 = vmin.f32 %v2742_v14, 16.0  ;;  %v2723_v16 = vmul.f32 %v2722_v50, %v6158_v25  ;;  %vm2691_vm9 = vweird.f32 %v3281_v63 }
 0x295   :  { %v6240_v12 = vadd.f32 %v6098_v59, %v143_v39  ;;  %v6246_v54 = vadd.f32 %v6098_v59, %v144_v43  ;;  %v2648_v48 = vmul.f32 %v3279_v49, %v2647_v15  ;;  %v2712_v60 = vmul.f32 %v2711_v42, %v6158_v25  ;;  %vm6283_vm10 = vmor %vm2690_vm6, %vm2691_vm9 }
 0x296   :  { %v2687_v22 = vsub.f32 1.0, %v2686_v51  ;;  %v2744_v62 = vmul.f32 2.1237322e-06, %v6251_v28  ;;  %v6270_v53 = vadd.f32 1.0, %v2723_v16  ;;  %v2755_v46 = vmul.f32 3.8918573e-05, %v6251_v28 }
 0x297   :  { %v6255_v2 = vmul.f32 0.70710677, %v6240_v12  ;;  %v6258_v58 = vmul.f32 0.70710677, %v6246_v54  ;;  %v2649_v7 = vadd.f32 %v3279_v49, %v2648_v48  ;;  %v2697_v20 = vor.u32 1.1754944e-38, %v2696_v10 }
 0x298   :  { %v2688_v32 = vmul.f32 %v3281_v63, %v2687_v22  ;;  %v2745_v38 = vadd.f32 0.00028619796, %v2744_v62  ;;  %3282 = vrcp.f32 %v6270_v53  ;;  %vm2695_vm11 = vcmp.eq.f32.partialorder %v2694_v29, 8.507059e+37 }
 0x299   :  { %v2782_v21 = vmul.f32 %v6255_v2, %v6255_v2  ;;  %v2822_v1 = vmul.f32 %v6258_v58, %v6258_v58  ;;  %v2653_v25 = vsel %vm6264_vm8, %v3279_v49, %v2649_v7  ;;  %v2713_v27 = vadd.f32 1.1283791, %v2712_v60 }
 0x29a   :  { %v77_v5 = vld [vmem:[%s6396_s0 + $0x1f8] sm:$0xff]  ;;  %v2658_v3 = vsel %vm6229_vm5, %v2657_v36, %v2653_v25  ;;  %v2689_v19 = vadd.f32 %v3281_v63, %v2688_v32  ;;  %v2756_v41 = vadd.f32 0.001143296, %v2755_v46  ;;  %v2734_v49 = vand.u32 2147483647, %v6270_v53 }
 0x29b   :  { %v145_v8 = vmul.f32 %v6053_v13, %v77_v5  ;;  %v2746_v13 = vmul.f32 %v2745_v38, %v6251_v28  ;;  %v2659_v45 = vmul.f32 %v2658_v3, %v2634_v52  ;;  %v6291_v0 = vmin.f32 %v2782_v21, 16.0 }
 0x29c   :  { %v2693_v11 = vsel %vm6283_vm10, %v3281_v63, %v2689_v19  ;;  %v6295_v18 = vmin.f32 %v2822_v1, 16.0  ;;  %v2757_v37 = vmul.f32 %v2756_v41, %v6251_v28  ;;  %vm2730_vm12 = vweird.f32 %v6270_v53 }
 0x29d   :  { %v2747_v40 = vadd.f32 0.0036580483, %v2746_v13  ;;  %v6298_v6 = vadd.f32 %v6098_v59, %v145_v8  ;;  %v3155_v47 = vclamps-f32 %v2659_v45, 1.0  ;;  %v2698_v35 = vsel %vm2695_vm11, %v2697_v20, %v2693_v11 }
 0x29e   :  { %v2784_v39 = vmul.f32 2.1237322e-06, %v6291_v0  ;;  %v2699_v52 = vmul.f32 %v2698_v35, %v2674_v9  ;;  %v2795_v57 = vmul.f32 3.8918573e-05, %v6291_v0  ;;  %v2824_v31 = vmul.f32 2.1237322e-06, %v6295_v18  ;;  %v3283_v24 = vpop.eup %3282 }
 0x29f   :  { %v2959_v43 = vadd.f32 1.0, %v3155_v47  ;;  %v2758_v56 = vadd.f32 0.014752088, %v2757_v37  ;;  %v2726_v36 = vmul.f32 %v3283_v24, %v6270_v53  ;;  %v2736_v33 = vand.u32 2147483648, %v6270_v53 }
 0x2a0   :  { %v2785_v59 = vadd.f32 0.00028619796, %v2784_v39  ;;  %v3156_v30 = vclamps-f32 %v2699_v52, 1.0  ;;  %v2748_v42 = vmul.f32 %v2747_v40, %v6251_v28  ;;  %v2796_v50 = vadd.f32 0.001143296, %v2795_v57 }
 0x2a1   :  { %v3023_v14 = vmul.f32 %v2959_v43, %v6215_v26  ;;  %v2759_v63 = vmul.f32 %v2758_v56, %v6251_v28  ;;  %v2727_v29 = vsub.f32 1.0, %v2726_v36  ;;  %vm2731_vm13 = vweird.f32 %v3283_v24 }
 0x2a2   :  { %v2786_v15 = vmul.f32 %v2785_v59, %v6291_v0  ;;  %v2960_v51 = vadd.f32 1.0, %v3156_v30  ;;  %v2825_v10 = vadd.f32 0.00028619796, %v2824_v31  ;;  %v2714_v48 = vmul.f32 %v2713_v27, %v6118_v44  ;;  %vm6321_vm14 = vmor %vm2730_vm12, %vm2731_vm13 }
 0x2a3   :  { %3087 = vst [vmem:[%s6399_s3 + $0x1c8] sm:$0xff] %v3023_v14  ;;  %v2760_v16 = vadd.f32 0.112945676, %v2759_v63  ;;  %v2797_v61 = vmul.f32 %v2796_v50, %v6291_v0  ;;  %v2728_v22 = vmul.f32 %v3283_v24, %v2727_v29  ;;  %v2749_v60 = vadd.f32 0.05243302, %v2748_v42 }
 0x2a4   :  { %v2787_v5 = vadd.f32 0.0036580483, %v2786_v15  ;;  %v3024_v26 = vmul.f32 %v2960_v51, %v6223_v55  ;;  %v2826_v62 = vmul.f32 %v2825_v10, %v6295_v18  ;;  %v2737_v46 = vor.u32 1.1754944e-38, %v2736_v33 }
 0x2a5   :  { %v2761_v21 = vmul.f32 %v2760_v16, %v6251_v28  ;;  %v2798_v44 = vadd.f32 0.014752088, %v2797_v61  ;;  %v2835_v32 = vmul.f32 3.8918573e-05, %v6295_v18  ;;  %v2729_v55 = vadd.f32 %v3283_v24, %v2728_v22 }
 0x2a6   :  { %3088 = vst [vmem:[%s6399_s3 + $0x1d0] sm:$0xff] %v3024_v26  ;;  %vm2735_vm15 = vcmp.eq.f32.partialorder %v2734_v49, 8.507059e+37  ;;  %v2788_v38 = vmul.f32 %v2787_v5, %v6291_v0  ;;  %v6332_v53 = vmul.f32 0.70710677, %v6298_v6  ;;  %v2750_v23 = vmul.f32 %v2749_v60, %v6251_v28 }
 0x2a7   :  { %v2762_v1 = vadd.f32 0.4994258, %v2761_v21  ;;  %v2799_v8 = vmul.f32 %v2798_v44, %v6291_v0  ;;  %v2836_v25 = vadd.f32 0.001143296, %v2835_v32  ;;  %v2733_v9 = vsel %vm6321_vm14, %v3283_v24, %v2729_v55 }
 0x2a8   :  { %v2827_v20 = vadd.f32 0.0036580483, %v2826_v62  ;;  %v2738_v3 = vsel %vm2735_vm15, %v2737_v46, %v2733_v9  ;;  %v2862_v45 = vmul.f32 %v6332_v53, %v6332_v53  ;;  %v2789_v41 = vadd.f32 0.05243302, %v2788_v38 }
 0x2a9   :  { %v2763_v19 = vmul.f32 %v2762_v1, %v6251_v28  ;;  %v2800_v13 = vadd.f32 0.112945676, %v2799_v8  ;;  %v2739_v27 = vmul.f32 %v2738_v3, %v2714_v48  ;;  %v2837_v47 = vmul.f32 %v2836_v25, %v6295_v18 }
 0x2aa   :  { %v273_v35 = vmul.f32 0.5, %v6101_v17  ;;  %v2751_v39 = vadd.f32 0.18741608, %v2750_v23  ;;  %v2828_v52 = vmul.f32 %v2827_v20, %v6295_v18  ;;  %v6345_v49 = vmin.f32 %v2862_v45, 16.0 }
 0x2ab   :  { %v2764_v11 = vadd.f32 1.0, %v2763_v19  ;;  %v2801_v40 = vmul.f32 %v2800_v13, %v6291_v0  ;;  %v3157_v37 = vclamps-f32 %v2739_v27, 1.0  ;;  %v2790_v31 = vmul.f32 %v2789_v41, %v6291_v0 }
 0x2ac   :  { %v2838_v43 = vadd.f32 0.014752088, %v2837_v47  ;;  %v2864_v56 = vmul.f32 2.1237322e-06, %v6345_v49  ;;  %v2752_v30 = vmul.f32 %v2751_v39, %v6251_v28  ;;  %v2829_v17 = vadd.f32 0.05243302, %v2828_v52 }
 0x2ad   :  { %3284 = vrcp.f32 %v2764_v11  ;;  %v2961_v57 = vadd.f32 1.0, %v3157_v37  ;;  %v2802_v24 = vadd.f32 0.4994258, %v2801_v40  ;;  %v2875_v14 = vmul.f32 3.8918573e-05, %v6345_v49 }
 0x2ae   :  { %v2839_v33 = vmul.f32 %v2838_v43, %v6295_v18  ;;  %v2865_v42 = vadd.f32 0.00028619796, %v2864_v56  ;;  %v2791_v63 = vadd.f32 0.18741608, %v2790_v31  ;;  %v2753_v28 = vadd.f32 1.1283791, %v2752_v30 }
 0x2af   :  { %v3025_v59 = vmul.f32 %v2961_v57, %v273_v35  ;;  %v2803_v36 = vmul.f32 %v2802_v24, %v6291_v0  ;;  %v2876_v10 = vadd.f32 0.001143296, %v2875_v14  ;;  %v2830_v16 = vmul.f32 %v2829_v17, %v6295_v18 }
 0x2b0   :  { %v2840_v51 = vadd.f32 0.112945676, %v2839_v33  ;;  %v2866_v29 = vmul.f32 %v2865_v42, %v6345_v49  ;;  %vm2770_vm0 = vweird.f32 %v2764_v11  ;;  %v2774_v5 = vand.u32 2147483647, %v2764_v11 }
 0x2b1   :  { %3089 = vst [vmem:[%s6399_s3 + $0x1d8] sm:$0xff] %v3025_v59  ;;  %v2804_v15 = vadd.f32 1.0, %v2803_v36  ;;  %v2776_v61 = vand.u32 2147483648, %v2764_v11  ;;  %v2792_v60 = vmul.f32 %v2791_v63, %v6291_v0  ;;  %v2877_v62 = vmul.f32 %v2876_v10, %v6345_v49 }
 0x2b2   :  { %v2841_v26 = vmul.f32 %v2840_v51, %v6295_v18  ;;  %v2867_v46 = vadd.f32 0.0036580483, %v2866_v29  ;;  %v2754_v32 = vmul.f32 %v2753_v28, %v6226_v34  ;;  %v2831_v1 = vadd.f32 0.18741608, %v2830_v16 }
 0x2b3   :  { %v3285_v50 = vpop.eup %3284  ;;  %3286 = vrcp.f32 %v2804_v15  ;;  %v2878_v44 = vadd.f32 0.014752088, %v2877_v62  ;;  %v2777_v38 = vor.u32 1.1754944e-38, %v2776_v61  ;;  %vm2775_vm3 = vcmp.eq.f32.partialorder %v2774_v5, 8.507059e+37 }
 0x2b4   :  { %v2766_v48 = vmul.f32 %v3285_v50, %v2764_v11  ;;  %vm2771_vm1 = vweird.f32 %v3285_v50  ;;  %v2842_v7 = vadd.f32 0.4994258, %v2841_v26  ;;  %v2793_v0 = vadd.f32 1.1283791, %v2792_v60 }
 0x2b5   :  { %vm6362_vm2 = vmor %vm2770_vm0, %vm2771_vm1  ;;  %v2879_v23 = vmul.f32 %v2878_v44, %v6345_v49  ;;  %vm2810_vm4 = vweird.f32 %v2804_v15  ;;  %v2868_v19 = vmul.f32 %v2867_v46, %v6345_v49  ;;  %v2814_v13 = vand.u32 2147483647, %v2804_v15 }
 0x2b6   :  { %v2767_v22 = vsub.f32 1.0, %v2766_v48  ;;  %v2843_v8 = vmul.f32 %v2842_v7, %v6295_v18  ;;  %v2816_v45 = vand.u32 2147483648, %v2804_v15  ;;  %v274_v39 = vmul.f32 0.5, %v6209_v4 }
 0x2b7   :  { %v2880_v27 = vadd.f32 0.112945676, %v2879_v23  ;;  %v2869_v35 = vadd.f32 0.05243302, %v2868_v19  ;;  %v2832_v31 = vmul.f32 %v2831_v1, %v6295_v18  ;;  %v2794_v24 = vmul.f32 %v2793_v0, %v6255_v2 }
 0x2b8   :  { %v2768_v21 = vmul.f32 %v3285_v50, %v2767_v22  ;;  %v2844_v3 = vadd.f32 1.0, %v2843_v8  ;;  %v2817_v57 = vor.u32 1.1754944e-38, %v2816_v45  ;;  %vm2815_vm7 = vcmp.eq.f32.partialorder %v2814_v13, 8.507059e+37 }
 0x2b9   :  { %v3287_v25 = vpop.eup %3286  ;;  %v2881_v37 = vmul.f32 %v2880_v27, %v6345_v49  ;;  %v2870_v17 = vmul.f32 %v2869_v35, %v6345_v49  ;;  %v275_v29 = vmul.f32 0.5, %v6240_v12  ;;  %v276_v44 = vmul.f32 0.5, %v6246_v54 }
 0x2ba   :  { %v2769_v9 = vadd.f32 %v3285_v50, %v2768_v21  ;;  %v2806_v20 = vmul.f32 %v3287_v25, %v2804_v15  ;;  %vm2811_vm5 = vweird.f32 %v3287_v25  ;;  %3288 = vrcp.f32 %v2844_v3 }
 0x2bb   :  { %vm2812_vm6 = vmor %vm2810_vm4, %vm2811_vm5  ;;  %v2882_v56 = vadd.f32 0.4994258, %v2881_v37  ;;  %v2833_v15 = vadd.f32 1.1283791, %v2832_v31  ;;  %vm2850_vm8 = vweird.f32 %v2844_v3  ;;  %v2854_v18 = vand.u32 2147483647, %v2844_v3 }
 0x2bc   :  { %v2773_v34 = vsel %vm6362_vm2, %v3285_v50, %v2769_v9  ;;  %v2807_v11 = vsub.f32 1.0, %v2806_v20  ;;  %v2856_v50 = vand.u32 2147483648, %v2844_v3  ;;  %v2871_v28 = vadd.f32 0.18741608, %v2870_v17 }
 0x2bd   :  { %v2778_v41 = vsel %vm2775_vm3, %v2777_v38, %v2773_v34  ;;  %v2883_v33 = vmul.f32 %v2882_v56, %v6345_v49  ;;  %v2834_v61 = vmul.f32 %v2833_v15, %v6258_v58  ;;  %vm2855_vm11 = vcmp.eq.f32.partialorder %v2854_v18, 8.507059e+37 }
 0x2be   :  { %v2779_v40 = vmul.f32 %v2778_v41, %v2754_v32  ;;  %v2808_v47 = vmul.f32 %v3287_v25, %v2807_v11  ;;  %v2857_v5 = vor.u32 1.1754944e-38, %v2856_v50  ;;  %v2872_v60 = vmul.f32 %v2871_v28, %v6345_v49 }
 0x2bf   :  { %v2884_v51 = vadd.f32 1.0, %v2883_v33  ;;  %v277_v19 = vmul.f32 0.5, %v6298_v6 }
 0x2c0   :  { %v3158_v52 = vclamps-f32 %v2779_v40, 1.0  ;;  %v2809_v43 = vadd.f32 %v3287_v25, %v2808_v47  ;;  %v3289_v30 = vpop.eup %3288  ;;  %v2873_v32 = vadd.f32 1.1283791, %v2872_v60 }
 0x2c1   :  { %v2846_v14 = vmul.f32 %v3289_v30, %v2844_v3  ;;  %vm2851_vm9 = vweird.f32 %v3289_v30  ;;  %3290 = vrcp.f32 %v2884_v51  ;;  %vm2890_vm12 = vweird.f32 %v2884_v51 }
 0x2c2   :  { %v2962_v59 = vadd.f32 1.0, %v3158_v52  ;;  %v2813_v36 = vsel %vm2812_vm6, %v3287_v25, %v2809_v43  ;;  %vm2852_vm10 = vmor %vm2850_vm8, %vm2851_vm9  ;;  %v2896_v55 = vand.u32 2147483648, %v2884_v51  ;;  %v2894_v1 = vand.u32 2147483647, %v2884_v51 }
 0x2c3   :  { %v2818_v4 = vsel %vm2815_vm7, %v2817_v57, %v2813_v36  ;;  %v2847_v2 = vsub.f32 1.0, %v2846_v14  ;;  %v2874_v0 = vmul.f32 %v2873_v32, %v6332_v53 }
 0x2c4   :  { %v3026_v42 = vmul.f32 %v2962_v59, %v274_v39  ;;  %v2819_v63 = vmul.f32 %v2818_v4, %v2794_v24  ;;  %v2897_v25 = vor.u32 1.1754944e-38, %v2896_v55  ;;  %vm2895_vm15 = vcmp.eq.f32.partialorder %v2894_v1, 8.507059e+37 }
 0x2c5   :  { %v2848_v48 = vmul.f32 %v3289_v30, %v2847_v2 }
 0x2c6   :  { %3090 = vst [vmem:[%s6399_s3 + $0x1e0] sm:$0xff] %v3026_v42  ;;  %v3159_v10 = vclamps-f32 %v2819_v63, 1.0 }
 0x2c7   :  { %v2849_v26 = vadd.f32 %v3289_v30, %v2848_v48  ;;  %v3291_v7 = vpop.eup %3290 }
 0x2c8   :  { %v2963_v16 = vadd.f32 1.0, %v3159_v10  ;;  %v2886_v21 = vmul.f32 %v3291_v7, %v2884_v51  ;;  %vm2891_vm13 = vweird.f32 %v3291_v7 }
 0x2c9   :  { %v2853_v62 = vsel %vm2852_vm10, %v3289_v30, %v2849_v26  ;;  %vm2892_vm14 = vmor %vm2890_vm12, %vm2891_vm13 }
 0x2ca   :  { %v3027_v22 = vmul.f32 %v2963_v16, %v275_v29  ;;  %v2858_v12 = vsel %vm2855_vm11, %v2857_v5, %v2853_v62  ;;  %v2887_v38 = vsub.f32 1.0, %v2886_v21 }
 0x2cb   :  { %v2859_v46 = vmul.f32 %v2858_v12, %v2834_v61 }
 0x2cc   :  { %3091 = vst [vmem:[%s6399_s3 + $0x1e8] sm:$0xff] %v3027_v22  ;;  %v2888_v49 = vmul.f32 %v3291_v7, %v2887_v38 }
 0x2cd   :  { %v3160_v58 = vclamps-f32 %v2859_v46, 1.0 }
 0x2ce   :  { %v2889_v23 = vadd.f32 %v3291_v7, %v2888_v49 }
 0x2cf   :  { %v2964_v8 = vadd.f32 1.0, %v3160_v58 }
 0x2d0   :  { %v2893_v54 = vsel %vm2892_vm14, %v3291_v7, %v2889_v23 }
 0x2d1   :  { %v3028_v9 = vmul.f32 %v2964_v8, %v276_v44  ;;  %v2898_v20 = vsel %vm2895_vm15, %v2897_v25, %v2893_v54 }
 0x2d2   :  { %v2899_v3 = vmul.f32 %v2898_v20, %v2874_v0 }
 0x2d3   :  { %3092 = vst [vmem:[%s6399_s3 + $0x1f0] sm:$0xff] %v3028_v9 }
 0x2d4   :  { %v3161_v34 = vclamps-f32 %v2899_v3, 1.0 }
 0x2d6   :  { %v2965_v13 = vadd.f32 1.0, %v3161_v34 }
 0x2d8   :  { %v3029_v45 = vmul.f32 %v2965_v13, %v277_v19 }
 0x2da   :  { %3093 = vst [vmem:[%s6399_s3 + $0x1f8] sm:$0xff] %v3029_v45 }

// kernel: a_call__.2
= control target key start
LH: loop header
LB: loop body
LE: loop exit
PB: predicated region body
PF: predicated region fallthrough
CT: control target
= control target key end

     0   :  { %s2406_s1 = inlined_call_operand.vmem [shape: bf16[128,128], index: 1, kind: input, shape index: {}]   ;;  %s2407_s2 = inlined_call_operand.vmem [shape: f32[1,128], index: 2, kind: input, shape index: {}]   ;;  %s2408_s0 = inlined_call_operand.vmem [shape: bf16[512,128], index: 0, kind: input, shape index: {}]   ;;  %s2409_s3 = inlined_call_operand.vmem [shape: f32[512,128], index: 3, kind: output, shape index: {0}]   ;;  %s2410_s4 = inlined_call_operand.vmem [shape: f32[1,1,128], index: 4, kind: output, shape index: {1}]   ;;  %s2411_s5 = inlined_call_operand.vmem [shape: f32[1,1,128], index: 5, kind: output, shape index: {2}]  }
   0x1   :  { %v1639_v0 = vld [vmem:[%s2406_s1 + $0x38] sm:$0xff]  ;;  %v1638_v1 = vld [vmem:[%s2406_s1 + $0x30] sm:$0xff]  ;;  %v1637_v2 = vld [vmem:[%s2406_s1 + $0x28] sm:$0xff] }
   0x2   :  { %470 = vmatpush.bf16.msra.mxu0 %v1639_v0  ;;  %1640 = vmatpush.bf16.msra.mxu1 %v1639_v0  ;;  %v1636_v3 = vld [vmem:[%s2406_s1 + $0x20] sm:$0xff]  ;;  %v1635_v4 = vld [vmem:[%s2406_s1 + $0x18] sm:$0xff]  ;;  %v1634_v5 = vld [vmem:[%s2406_s1 + $0x10] sm:$0xff] }
   0x3   :  { %1641 = vmatpush.bf16.msra.mxu2 %v1639_v0  ;;  %1642 = vmatpush.bf16.msra.mxu3 %v1639_v0  ;;  %v1633_v6 = vld [vmem:[%s2406_s1 + $0x8] sm:$0xff]  ;;  %v1632_v7 = vld [vmem:[%s2406_s1] sm:$0xff]  ;;  %v1602_v13 = vld [vmem:[%s2408_s0 + $0x10] sm:$0xff] }
   0x4   :  { %v1600_v8 = vld [vmem:[%s2408_s0] sm:$0xff]  ;;  %v1601_v10 = vld [vmem:[%s2408_s0 + $0x8] sm:$0xff]  ;;  %v1610_v14 = vld [vmem:[%s2408_s0 + $0x50] sm:$0xff] }
   0x5   :  { %v1608_v9 = vld [vmem:[%s2408_s0 + $0x40] sm:$0xff]  ;;  %v1609_v11 = vld [vmem:[%s2408_s0 + $0x48] sm:$0xff]  ;;  %v1603_v16 = vld [vmem:[%s2408_s0 + $0x18] sm:$0xff] }
   0x6   :  { %471 = vmatpush.bf16.msra.mxu0 %v1638_v1  ;;  %1643 = vmatpush.bf16.msra.mxu1 %v1638_v1  ;;  %v1616_v12 = vld [vmem:[%s2408_s0 + $0x80] sm:$0xff]  ;;  %v1617_v15 = vld [vmem:[%s2408_s0 + $0x88] sm:$0xff]  ;;  %v1611_v17 = vld [vmem:[%s2408_s0 + $0x58] sm:$0xff] }
   0x7   :  { %1644 = vmatpush.bf16.msra.mxu2 %v1638_v1  ;;  %1645 = vmatpush.bf16.msra.mxu3 %v1638_v1  ;;  %v1618_v18 = vld [vmem:[%s2408_s0 + $0x90] sm:$0xff]  ;;  %v1624_v19 = vld [vmem:[%s2408_s0 + $0xc0] sm:$0xff]  ;;  %v1619_v22 = vld [vmem:[%s2408_s0 + $0x98] sm:$0xff] }
   0x8   :  { %v1604_v20 = vld [vmem:[%s2408_s0 + $0x20] sm:$0xff]  ;;  %v1625_v23 = vld [vmem:[%s2408_s0 + $0xc8] sm:$0xff]  ;;  %v1626_v27 = vld [vmem:[%s2408_s0 + $0xd0] sm:$0xff] }
   0x9   :  { %v1612_v21 = vld [vmem:[%s2408_s0 + $0x60] sm:$0xff]  ;;  %v1605_v24 = vld [vmem:[%s2408_s0 + $0x28] sm:$0xff]  ;;  %v1606_v28 = vld [vmem:[%s2408_s0 + $0x30] sm:$0xff] }
   0xa   :  { %472 = vmatpush.bf16.msra.mxu0 %v1637_v2  ;;  %1646 = vmatpush.bf16.msra.mxu1 %v1637_v2  ;;  %v1613_v25 = vld [vmem:[%s2408_s0 + $0x68] sm:$0xff]  ;;  %v1620_v26 = vld [vmem:[%s2408_s0 + $0xa0] sm:$0xff]  ;;  %v1614_v29 = vld [vmem:[%s2408_s0 + $0x70] sm:$0xff] }
   0xb   :  { %1647 = vmatpush.bf16.msra.mxu2 %v1637_v2  ;;  %1648 = vmatpush.bf16.msra.mxu3 %v1637_v2  ;;  %v1621_v30 = vld [vmem:[%s2408_s0 + $0xa8] sm:$0xff]  ;;  %v1627_v31 = vld [vmem:[%s2408_s0 + $0xd8] sm:$0xff]  ;;  %v1622_v34 = vld [vmem:[%s2408_s0 + $0xb0] sm:$0xff] }
   0xc   :  { %v1607_v32 = vld [vmem:[%s2408_s0 + $0x38] sm:$0xff]  ;;  %v1628_v35 = vld [vmem:[%s2408_s0 + $0xe0] sm:$0xff]  ;;  %v1629_v42 = vld [vmem:[%s2408_s0 + $0xe8] sm:$0xff] }
   0xd   :  { %v1615_v33 = vld [vmem:[%s2408_s0 + $0x78] sm:$0xff]  ;;  %v1806_v36 = vld [vmem:[%s2407_s2] ss:$0 sm:$0xff]  ;;  %v1630_v57 = vld [vmem:[%s2408_s0 + $0xf0] sm:$0xff] }
   0xe   :  { %473 = vmatpush.bf16.msra.mxu0 %v1636_v3  ;;  %1649 = vmatpush.bf16.msra.mxu1 %v1636_v3  ;;  %v1623_v41 = vld [vmem:[%s2408_s0 + $0xb8] sm:$0xff] }
   0xf   :  { %1650 = vmatpush.bf16.msra.mxu2 %v1636_v3  ;;  %1651 = vmatpush.bf16.msra.mxu3 %v1636_v3 }
  0x12   :  { %474 = vmatpush.bf16.msra.mxu0 %v1635_v4  ;;  %1652 = vmatpush.bf16.msra.mxu1 %v1635_v4 }
  0x13   :  { %1653 = vmatpush.bf16.msra.mxu2 %v1635_v4  ;;  %1654 = vmatpush.bf16.msra.mxu3 %v1635_v4 }
  0x16   :  { %475 = vmatpush.bf16.msra.mxu0 %v1634_v5  ;;  %1655 = vmatpush.bf16.msra.mxu1 %v1634_v5 }
  0x17   :  { %1656 = vmatpush.bf16.msra.mxu2 %v1634_v5  ;;  %1657 = vmatpush.bf16.msra.mxu3 %v1634_v5 }
  0x1a   :  { %476 = vmatpush.bf16.msra.mxu0 %v1633_v6  ;;  %1658 = vmatpush.bf16.msra.mxu1 %v1633_v6 }
  0x1b   :  { %1659 = vmatpush.bf16.msra.mxu2 %v1633_v6  ;;  %1660 = vmatpush.bf16.msra.mxu3 %v1633_v6 }
  0x1e   :  { %477 = vmatpush.bf16.msra.mxu0 %v1632_v7  ;;  %1661 = vmatpush.bf16.msra.mxu1 %v1632_v7 }
  0x1f   :  { %1662 = vmatpush.bf16.msra.mxu2 %v1632_v7  ;;  %1663 = vmatpush.bf16.msra.mxu3 %v1632_v7 }
  0x21   :  { %478 = vmatmul.bf16.vlgmr.msra.gmra.mxu0 %v1600_v8  ;;  %518 = vmatmul.bf16.vlgmr.msra.gmra.mxu1 %v1608_v9 }
  0x22   :  { %558 = vmatmul.bf16.vlgmr.msra.gmra.mxu2 %v1616_v12  ;;  %598 = vmatmul.bf16.vlgmr.msra.gmra.mxu3 %v1624_v19  ;;  %v1631_v12 = vld [vmem:[%s2408_s0 + $0xf8] sm:$0xff] }
  0x31   :  { %483 = vmatmul.bf16.gmra.mxu0 %v1601_v10  ;;  %523 = vmatmul.bf16.gmra.mxu1 %v1609_v11 }
  0x32   :  { %563 = vmatmul.bf16.gmra.mxu2 %v1617_v15  ;;  %603 = vmatmul.bf16.gmra.mxu3 %v1625_v23 }
  0x41   :  { %488 = vmatmul.bf16.gmra.mxu0 %v1602_v13  ;;  %528 = vmatmul.bf16.gmra.mxu1 %v1610_v14 }
  0x42   :  { %568 = vmatmul.bf16.gmra.mxu2 %v1618_v18  ;;  %608 = vmatmul.bf16.gmra.mxu3 %v1626_v27 }
  0x51   :  { %493 = vmatmul.bf16.gmra.mxu0 %v1603_v16  ;;  %533 = vmatmul.bf16.gmra.mxu1 %v1611_v17 }
  0x52   :  { %573 = vmatmul.bf16.gmra.mxu2 %v1619_v22  ;;  %613 = vmatmul.bf16.gmra.mxu3 %v1627_v31 }
  0x61   :  { %498 = vmatmul.bf16.gmra.mxu0 %v1604_v20  ;;  %538 = vmatmul.bf16.gmra.mxu1 %v1612_v21 }
  0x62   :  { %578 = vmatmul.bf16.gmra.mxu2 %v1620_v26  ;;  %618 = vmatmul.bf16.gmra.mxu3 %v1628_v35 }
  0x71   :  { %503 = vmatmul.bf16.gmra.mxu0 %v1605_v24  ;;  %543 = vmatmul.bf16.gmra.mxu1 %v1613_v25 }
  0x72   :  { %583 = vmatmul.bf16.gmra.mxu2 %v1621_v30  ;;  %623 = vmatmul.bf16.gmra.mxu3 %v1629_v42 }
  0x81   :  { %508 = vmatmul.bf16.gmra.mxu0 %v1606_v28  ;;  %548 = vmatmul.bf16.gmra.mxu1 %v1614_v29 }
  0x82   :  { %588 = vmatmul.bf16.gmra.mxu2 %v1622_v34  ;;  %628 = vmatmul.bf16.gmra.mxu3 %v1630_v57 }
  0x91   :  { %513 = vmatmul.bf16.gmra.mxu0 %v1607_v32  ;;  %553 = vmatmul.bf16.gmra.mxu1 %v1615_v33 }
  0x92   :  { %593 = vmatmul.bf16.gmra.mxu2 %v1623_v41  ;;  %633 = vmatmul.bf16.gmra.mxu3 %v1631_v12 }
  0x9e   :  { %v479_v37 = vpop.f32.mrf.mxu0  ;;  %v519_v38 = vpop.f32.mrf.mxu1 }
  0x9f   :  { %v838_v39 = vadd.f32 %v1806_v36, %v479_v37  ;;  %v1810_v40 = vadd.f32 %v1806_v36, %v519_v38 }
  0xa1   :  { %902 = vst [vmem:[%s2409_s3] sm:$0xff] %v838_v39  ;;  %v1293_v47 = vmul.f32 %v838_v39, %v838_v39 }
  0xa2   :  { %918 = vst [vmem:[%s2409_s3 + $0x80] sm:$0xff] %v1810_v40 }
  0xa5   :  { %v559_v63 = vpop.f32.mrf.mxu2  ;;  %v599_v31 = vpop.f32.mrf.mxu3 }
  0xa6   :  { %v481_v43 = vpop.f32.mrf.mxu0  ;;  %v521_v44 = vpop.f32.mrf.mxu1  ;;  %v1862_v3 = vadd.f32 %v1806_v36, %v559_v63  ;;  %v1953_v33 = vadd.f32 %v1806_v36, %v599_v31 }
  0xa7   :  { %v839_v45 = vadd.f32 %v1806_v36, %v481_v43  ;;  %v1827_v46 = vadd.f32 %v1806_v36, %v521_v44 }
  0xa8   :  { %934 = vst [vmem:[%s2409_s3 + $0x100] sm:$0xff] %v1862_v3 }
  0xa9   :  { %903 = vst [vmem:[%s2409_s3 + $0x8] sm:$0xff] %v839_v45  ;;  %v1224_v48 = vadd.f32 %v839_v45, %v838_v39  ;;  %v1294_v49 = vmul.f32 %v839_v45, %v839_v45 }
  0xaa   :  { %919 = vst [vmem:[%s2409_s3 + $0x88] sm:$0xff] %v1827_v46 }
  0xab   :  { %v1357_v50 = vadd.f32 %v1294_v49, %v1293_v47  ;;  %950 = vst [vmem:[%s2409_s3 + $0x180] sm:$0xff] %v1953_v33 }
  0xad   :  { %v561_v8 = vpop.f32.mrf.mxu2  ;;  %v601_v41 = vpop.f32.mrf.mxu3 }
  0xae   :  { %v484_v51 = vpop.f32.mrf.mxu0  ;;  %v524_v52 = vpop.f32.mrf.mxu1  ;;  %v1873_v9 = vadd.f32 %v1806_v36, %v561_v8  ;;  %v1973_v43 = vadd.f32 %v1806_v36, %v601_v41 }
  0xaf   :  { %v840_v53 = vadd.f32 %v1806_v36, %v484_v51  ;;  %v1838_v54 = vadd.f32 %v1806_v36, %v524_v52 }
  0xb0   :  { %935 = vst [vmem:[%s2409_s3 + $0x108] sm:$0xff] %v1873_v9 }
  0xb1   :  { %904 = vst [vmem:[%s2409_s3 + $0x10] sm:$0xff] %v840_v53  ;;  %v1225_v55 = vadd.f32 %v1224_v48, %v840_v53  ;;  %v1295_v56 = vmul.f32 %v840_v53, %v840_v53 }
  0xb2   :  { %920 = vst [vmem:[%s2409_s3 + $0x90] sm:$0xff] %v1838_v54 }
  0xb3   :  { %v1358_v58 = vadd.f32 %v1357_v50, %v1295_v56  ;;  %951 = vst [vmem:[%s2409_s3 + $0x188] sm:$0xff] %v1973_v43 }
  0xb5   :  { %v564_v18 = vpop.f32.mrf.mxu2  ;;  %v604_v50 = vpop.f32.mrf.mxu3 }
  0xb6   :  { %v486_v59 = vpop.f32.mrf.mxu0  ;;  %v526_v60 = vpop.f32.mrf.mxu1  ;;  %v1908_v19 = vadd.f32 %v1806_v36, %v564_v18  ;;  %v2009_v52 = vadd.f32 %v1806_v36, %v604_v50 }
  0xb7   :  { %v841_v61 = vadd.f32 %v1806_v36, %v486_v59  ;;  %v1852_v62 = vadd.f32 %v1806_v36, %v526_v60 }
  0xb8   :  { %936 = vst [vmem:[%s2409_s3 + $0x110] sm:$0xff] %v1908_v19 }
  0xb9   :  { %905 = vst [vmem:[%s2409_s3 + $0x18] sm:$0xff] %v841_v61  ;;  %v1226_v0 = vadd.f32 %v1225_v55, %v841_v61  ;;  %v1296_v1 = vmul.f32 %v841_v61, %v841_v61 }
  0xba   :  { %921 = vst [vmem:[%s2409_s3 + $0x98] sm:$0xff] %v1852_v62 }
  0xbb   :  { %v1359_v2 = vadd.f32 %v1358_v58, %v1296_v1  ;;  %952 = vst [vmem:[%s2409_s3 + $0x190] sm:$0xff] %v2009_v52 }
  0xbd   :  { %v566_v24 = vpop.f32.mrf.mxu2  ;;  %v606_v59 = vpop.f32.mrf.mxu3 }
  0xbe   :  { %v489_v4 = vpop.f32.mrf.mxu0  ;;  %v529_v5 = vpop.f32.mrf.mxu1  ;;  %v1921_v25 = vadd.f32 %v1806_v36, %v566_v24  ;;  %v2027_v61 = vadd.f32 %v1806_v36, %v606_v59 }
  0xbf   :  { %v842_v6 = vadd.f32 %v1806_v36, %v489_v4  ;;  %v1870_v7 = vadd.f32 %v1806_v36, %v529_v5 }
  0xc0   :  { %937 = vst [vmem:[%s2409_s3 + $0x118] sm:$0xff] %v1921_v25 }
  0xc1   :  { %906 = vst [vmem:[%s2409_s3 + $0x20] sm:$0xff] %v842_v6  ;;  %v1878_v10 = vadd.f32 %v1226_v0, %v842_v6  ;;  %v1297_v11 = vmul.f32 %v842_v6, %v842_v6 }
  0xc2   :  { %922 = vst [vmem:[%s2409_s3 + $0xa0] sm:$0xff] %v1870_v7 }
  0xc3   :  { %v1887_v13 = vadd.f32 %v1359_v2, %v1297_v11  ;;  %953 = vst [vmem:[%s2409_s3 + $0x198] sm:$0xff] %v2027_v61 }
  0xc5   :  { %v569_v30 = vpop.f32.mrf.mxu2  ;;  %v609_v5 = vpop.f32.mrf.mxu3 }
  0xc6   :  { %v491_v14 = vpop.f32.mrf.mxu0  ;;  %v531_v15 = vpop.f32.mrf.mxu1  ;;  %v1950_v32 = vadd.f32 %v1806_v36, %v569_v30 }
  0xc7   :  { %v1894_v16 = vadd.f32 %v1806_v36, %v491_v14  ;;  %v1897_v17 = vadd.f32 %v1806_v36, %v531_v15 }
  0xc8   :  { %938 = vst [vmem:[%s2409_s3 + $0x120] sm:$0xff] %v1950_v32 }
  0xc9   :  { %907 = vst [vmem:[%s2409_s3 + $0x28] sm:$0xff] %v1894_v16  ;;  %v1298_v24 = vmul.f32 %v1894_v16, %v1894_v16 }
  0xca   :  { %923 = vst [vmem:[%s2409_s3 + $0xa8] sm:$0xff] %v1897_v17 }
  0xcb   :  { %v1361_v31 = vadd.f32 %v1887_v13, %v1298_v24 }
  0xcd   :  { %v571_v39 = vpop.f32.mrf.mxu2  ;;  %v611_v18 = vpop.f32.mrf.mxu3 }
  0xce   :  { %v494_v20 = vpop.f32.mrf.mxu0  ;;  %v534_v21 = vpop.f32.mrf.mxu1  ;;  %v1970_v42 = vadd.f32 %v1806_v36, %v571_v39 }
  0xcf   :  { %v1915_v22 = vadd.f32 %v1806_v36, %v494_v20  ;;  %v1918_v23 = vadd.f32 %v1806_v36, %v534_v21  ;;  %v2063_v20 = vadd.f32 %v1806_v36, %v609_v5 }
  0xd0   :  { %939 = vst [vmem:[%s2409_s3 + $0x128] sm:$0xff] %v1970_v42 }
  0xd1   :  { %908 = vst [vmem:[%s2409_s3 + $0x30] sm:$0xff] %v1915_v22  ;;  %v1299_v30 = vmul.f32 %v1915_v22, %v1915_v22 }
  0xd2   :  { %924 = vst [vmem:[%s2409_s3 + $0xb0] sm:$0xff] %v1918_v23 }
  0xd3   :  { %954 = vst [vmem:[%s2409_s3 + $0x1a0] sm:$0xff] %v2063_v20  ;;  %v1362_v13 = vadd.f32 %v1361_v31, %v1299_v30 }
  0xd5   :  { %v574_v49 = vpop.f32.mrf.mxu2 }
  0xd6   :  { %v496_v26 = vpop.f32.mrf.mxu0  ;;  %v536_v27 = vpop.f32.mrf.mxu1  ;;  %v2006_v51 = vadd.f32 %v1806_v36, %v574_v49 }
  0xd7   :  { %v1936_v28 = vadd.f32 %v1806_v36, %v496_v26  ;;  %v1939_v29 = vadd.f32 %v1806_v36, %v536_v27  ;;  %v2078_v26 = vadd.f32 %v1806_v36, %v611_v18  ;;  %v1228_v27 = vadd.f32 %v1878_v10, %v1894_v16 }
  0xd8   :  { %940 = vst [vmem:[%s2409_s3 + $0x130] sm:$0xff] %v2006_v51 }
  0xd9   :  { %909 = vst [vmem:[%s2409_s3 + $0x38] sm:$0xff] %v1936_v28  ;;  %v1300_v10 = vmul.f32 %v1936_v28, %v1936_v28 }
  0xda   :  { %925 = vst [vmem:[%s2409_s3 + $0xb8] sm:$0xff] %v1939_v29 }
  0xdb   :  { %955 = vst [vmem:[%s2409_s3 + $0x1a8] sm:$0xff] %v2078_v26  ;;  %v1363_v50 = vadd.f32 %v1362_v13, %v1300_v10 }
  0xdd   :  { %v576_v58 = vpop.f32.mrf.mxu2 }
  0xde   :  { %v499_v34 = vpop.f32.mrf.mxu0  ;;  %v539_v35 = vpop.f32.mrf.mxu1  ;;  %v2024_v60 = vadd.f32 %v1806_v36, %v576_v58 }
  0xdf   :  { %v1964_v37 = vadd.f32 %v1806_v36, %v499_v34  ;;  %v1967_v38 = vadd.f32 %v1806_v36, %v539_v35  ;;  %v1229_v34 = vadd.f32 %v1228_v27, %v1915_v22 }
  0xe0   :  { %941 = vst [vmem:[%s2409_s3 + $0x138] sm:$0xff] %v2024_v60 }
  0xe1   :  { %910 = vst [vmem:[%s2409_s3 + $0x40] sm:$0xff] %v1964_v37  ;;  %v1230_v22 = vadd.f32 %v1229_v34, %v1936_v28  ;;  %v1301_v49 = vmul.f32 %v1964_v37, %v1964_v37 }
  0xe2   :  { %926 = vst [vmem:[%s2409_s3 + $0xc0] sm:$0xff] %v1967_v38 }
  0xe3   :  { %v1364_v58 = vadd.f32 %v1363_v50, %v1301_v49 }
  0xe5   :  { %v579_v4 = vpop.f32.mrf.mxu2 }
  0xe6   :  { %v501_v44 = vpop.f32.mrf.mxu0  ;;  %v541_v45 = vpop.f32.mrf.mxu1  ;;  %v2060_v14 = vadd.f32 %v1806_v36, %v579_v4 }
  0xe7   :  { %v1992_v47 = vadd.f32 %v1806_v36, %v501_v44  ;;  %v1995_v48 = vadd.f32 %v1806_v36, %v541_v45  ;;  %v614_v45 = vpop.f32.mrf.mxu3 }
  0xe8   :  { %942 = vst [vmem:[%s2409_s3 + $0x140] sm:$0xff] %v2060_v14  ;;  %v2130_v27 = vadd.f32 %v1806_v36, %v614_v45 }
  0xe9   :  { %911 = vst [vmem:[%s2409_s3 + $0x48] sm:$0xff] %v1992_v47 }
  0xea   :  { %927 = vst [vmem:[%s2409_s3 + $0xc8] sm:$0xff] %v1995_v48 }
  0xeb   :  { %956 = vst [vmem:[%s2409_s3 + $0x1b0] sm:$0xff] %v2130_v27 }
  0xed   :  { %v581_v15 = vpop.f32.mrf.mxu2 }
  0xee   :  { %v504_v53 = vpop.f32.mrf.mxu0  ;;  %v544_v55 = vpop.f32.mrf.mxu1  ;;  %v2069_v21 = vadd.f32 %v1806_v36, %v581_v15 }
  0xef   :  { %v848_v56 = vadd.f32 %v1806_v36, %v504_v53  ;;  %v2021_v57 = vadd.f32 %v1806_v36, %v544_v55  ;;  %v1231_v53 = vadd.f32 %v1230_v22, %v1964_v37  ;;  %v1302_v55 = vmul.f32 %v1992_v47, %v1992_v47  ;;  %v616_v24 = vpop.f32.mrf.mxu3 }
  0xf0   :  { %943 = vst [vmem:[%s2409_s3 + $0x148] sm:$0xff] %v2069_v21  ;;  %v2143_v34 = vadd.f32 %v1806_v36, %v616_v24 }
  0xf1   :  { %912 = vst [vmem:[%s2409_s3 + $0x50] sm:$0xff] %v848_v56  ;;  %v1232_v28 = vadd.f32 %v1231_v53, %v1992_v47  ;;  %v1303_v59 = vmul.f32 %v848_v56, %v848_v56 }
  0xf2   :  { %928 = vst [vmem:[%s2409_s3 + $0xd0] sm:$0xff] %v2021_v57 }
  0xf3   :  { %957 = vst [vmem:[%s2409_s3 + $0x1b8] sm:$0xff] %v2143_v34 }
  0xf5   :  { %v584_v44 = vpop.f32.mrf.mxu2 }
  0xf6   :  { %v506_v63 = vpop.f32.mrf.mxu0  ;;  %v546_v0 = vpop.f32.mrf.mxu1  ;;  %v2127_v15 = vadd.f32 %v1806_v36, %v584_v44 }
  0xf7   :  { %v849_v1 = vadd.f32 %v1806_v36, %v506_v63  ;;  %v2046_v2 = vadd.f32 %v1806_v36, %v546_v0  ;;  %v1365_v63 = vadd.f32 %v1364_v58, %v1302_v55  ;;  %v1233_v0 = vadd.f32 %v1232_v28, %v848_v56  ;;  %v619_v55 = vpop.f32.mrf.mxu3 }
  0xf8   :  { %944 = vst [vmem:[%s2409_s3 + $0x150] sm:$0xff] %v2127_v15 }
  0xf9   :  { %913 = vst [vmem:[%s2409_s3 + $0x58] sm:$0xff] %v849_v1  ;;  %v1366_v47 = vadd.f32 %v1365_v63, %v1303_v59  ;;  %v1234_v30 = vadd.f32 %v1233_v0, %v849_v1  ;;  %v1309_v63 = vmul.f32 %v1810_v40, %v1810_v40 }
  0xfa   :  { %929 = vst [vmem:[%s2409_s3 + $0xd8] sm:$0xff] %v2046_v2 }
  0xfd   :  { %v586_v18 = vpop.f32.mrf.mxu2 }
  0xfe   :  { %v509_v6 = vpop.f32.mrf.mxu0  ;;  %v549_v8 = vpop.f32.mrf.mxu1  ;;  %v2136_v56 = vadd.f32 %v1806_v36, %v586_v18  ;;  %v1311_v18 = vmul.f32 %v1838_v54, %v1838_v54 }
  0xff   :  { %v850_v11 = vadd.f32 %v1806_v36, %v509_v6  ;;  %v2057_v12 = vadd.f32 %v1806_v36, %v549_v8  ;;  %v1304_v6 = vmul.f32 %v849_v1, %v849_v1 }
 0x100   :  { %945 = vst [vmem:[%s2409_s3 + $0x158] sm:$0xff] %v2136_v56 }
 0x101   :  { %914 = vst [vmem:[%s2409_s3 + $0x60] sm:$0xff] %v850_v11  ;;  %v1305_v31 = vmul.f32 %v850_v11, %v850_v11  ;;  %v1367_v10 = vadd.f32 %v1366_v47, %v1304_v6 }
 0x102   :  { %930 = vst [vmem:[%s2409_s3 + $0xe0] sm:$0xff] %v2057_v12 }
 0x103   :  { %v1368_v1 = vadd.f32 %v1367_v10, %v1305_v31  ;;  %v2185_v31 = vadd.f32 %v1806_v36, %v619_v55  ;;  %v621_v10 = vpop.f32.mrf.mxu3 }
 0x105   :  { %958 = vst [vmem:[%s2409_s3 + $0x1c0] sm:$0xff] %v2185_v31 }
 0x106   :  { %v511_v16 = vpop.f32.mrf.mxu0  ;;  %v551_v35 = vpop.f32.mrf.mxu1 }
 0x107   :  { %v851_v39 = vadd.f32 %v1806_v36, %v511_v16  ;;  %v2106_v41 = vadd.f32 %v1806_v36, %v551_v35  ;;  %v1235_v16 = vadd.f32 %v1234_v30, %v850_v11 }
 0x109   :  { %915 = vst [vmem:[%s2409_s3 + $0x68] sm:$0xff] %v851_v39  ;;  %v1306_v35 = vmul.f32 %v851_v39, %v851_v39  ;;  %v1236_v44 = vadd.f32 %v1235_v16, %v851_v39  ;;  %v589_v39 = vpop.f32.mrf.mxu2 }
 0x10a   :  { %931 = vst [vmem:[%s2409_s3 + $0xe8] sm:$0xff] %v2106_v41  ;;  %v2182_v30 = vadd.f32 %v1806_v36, %v589_v39 }
 0x10b   :  { %v1369_v22 = vadd.f32 %v1368_v1, %v1306_v35  ;;  %v1312_v35 = vmul.f32 %v1852_v62, %v1852_v62  ;;  %v624_v55 = vpop.f32.mrf.mxu3 }
 0x10c   :  { %946 = vst [vmem:[%s2409_s3 + $0x160] sm:$0xff] %v2182_v30 }
 0x10e   :  { %v514_v4 = vpop.f32.mrf.mxu0  ;;  %v554_v5 = vpop.f32.mrf.mxu1 }
 0x10f   :  { %v852_v8 = vadd.f32 %v1806_v36, %v514_v4  ;;  %v2124_v37 = vadd.f32 %v1806_v36, %v554_v5  ;;  %v1310_v5 = vmul.f32 %v1827_v46, %v1827_v46 }
 0x111   :  { %916 = vst [vmem:[%s2409_s3 + $0x70] sm:$0xff] %v852_v8  ;;  %v1307_v45 = vmul.f32 %v852_v8, %v852_v8  ;;  %v1237_v49 = vadd.f32 %v1236_v44, %v852_v8  ;;  %v1313_v44 = vmul.f32 %v1870_v7, %v1870_v7 }
 0x112   :  { %932 = vst [vmem:[%s2409_s3 + $0xf0] sm:$0xff] %v2124_v37 }
 0x113   :  { %v1370_v58 = vadd.f32 %v1369_v22, %v1307_v45 }
 0x116   :  { %v516_v11 = vpop.f32.mrf.mxu0  ;;  %v556_v13 = vpop.f32.mrf.mxu1 }
 0x117   :  { %v853_v50 = vadd.f32 %v1806_v36, %v516_v11  ;;  %v2163_v53 = vadd.f32 %v1806_v36, %v556_v13 }
 0x119   :  { %917 = vst [vmem:[%s2409_s3 + $0x78] sm:$0xff] %v853_v50  ;;  %v1238_v28 = vadd.f32 %v1237_v49, %v853_v50  ;;  %v1308_v59 = vmul.f32 %v853_v50, %v853_v50 }
 0x11a   :  { %933 = vst [vmem:[%s2409_s3 + $0xf8] sm:$0xff] %v2163_v53 }
 0x11b   :  { %v1239_v0 = vadd.f32 %v1238_v28, %v1810_v40  ;;  %v1371_v4 = vadd.f32 %v1370_v58, %v1308_v59  ;;  %v591_v40 = vpop.f32.mrf.mxu2  ;;  %v1316_v58 = vmul.f32 %v1939_v29, %v1939_v29 }
 0x11c   :  { %v2188_v16 = vadd.f32 %v1806_v36, %v591_v40 }
 0x11d   :  { %v1240_v6 = vadd.f32 %v1239_v0, %v1827_v46  ;;  %v1372_v8 = vadd.f32 %v1371_v4, %v1309_v63  ;;  %v2191_v46 = vadd.f32 %v1806_v36, %v621_v10  ;;  %v1317_v63 = vmul.f32 %v1967_v38, %v1967_v38 }
 0x11e   :  { %947 = vst [vmem:[%s2409_s3 + $0x168] sm:$0xff] %v2188_v16  ;;  %v1318_v4 = vmul.f32 %v1995_v48, %v1995_v48  ;;  %v1320_v10 = vmul.f32 %v2046_v2, %v2046_v2 }
 0x11f   :  { %v1241_v24 = vadd.f32 %v1240_v6, %v1838_v54  ;;  %v1373_v47 = vadd.f32 %v1372_v8, %v1310_v5  ;;  %959 = vst [vmem:[%s2409_s3 + $0x1c8] sm:$0xff] %v2191_v46  ;;  %v1319_v6 = vmul.f32 %v2021_v57, %v2021_v57 }
 0x121   :  { %v1242_v54 = vadd.f32 %v1241_v24, %v1852_v62  ;;  %v1374_v1 = vadd.f32 %v1373_v47, %v1311_v18  ;;  %v1314_v62 = vmul.f32 %v1897_v17, %v1897_v17  ;;  %v2237_v24 = vadd.f32 %v1806_v36, %v624_v55  ;;  %v626_v47 = vpop.f32.mrf.mxu3 }
 0x123   :  { %v1243_v45 = vadd.f32 %v1242_v54, %v1870_v7  ;;  %v1375_v11 = vadd.f32 %v1374_v1, %v1312_v35  ;;  %v1315_v7 = vmul.f32 %v1918_v23, %v1918_v23  ;;  %v594_v39 = vpop.f32.mrf.mxu2  ;;  %960 = vst [vmem:[%s2409_s3 + $0x1d0] sm:$0xff] %v2237_v24  ;;  %v1321_v1 = vmul.f32 %v2057_v12, %v2057_v12 }
 0x125   :  { %v1244_v13 = vadd.f32 %v1243_v45, %v1897_v17  ;;  %v1376_v22 = vadd.f32 %v1375_v11, %v1313_v44  ;;  %v1322_v11 = vmul.f32 %v2106_v41, %v2106_v41 }
 0x127   :  { %v1377_v49 = vadd.f32 %v1376_v22, %v1314_v62  ;;  %v1245_v50 = vadd.f32 %v1244_v13, %v1918_v23  ;;  %v1323_v13 = vmul.f32 %v2124_v37, %v2124_v37 }
 0x129   :  { %v1246_v28 = vadd.f32 %v1245_v50, %v1939_v29  ;;  %v1378_v59 = vadd.f32 %v1377_v49, %v1315_v7  ;;  %v2234_v29 = vadd.f32 %v1806_v36, %v594_v39  ;;  %v629_v22 = vpop.f32.mrf.mxu3  ;;  %v1324_v50 = vmul.f32 %v2163_v53, %v2163_v53 }
 0x12a   :  { %v1325_v39 = vmul.f32 %v1862_v3, %v1862_v3 }
 0x12b   :  { %v1247_v17 = vadd.f32 %v1246_v28, %v1967_v38  ;;  %v1379_v0 = vadd.f32 %v1378_v59, %v1316_v58  ;;  %v596_v38 = vpop.f32.mrf.mxu2  ;;  %948 = vst [vmem:[%s2409_s3 + $0x170] sm:$0xff] %v2234_v29 }
 0x12c   :  { %v2240_v40 = vadd.f32 %v1806_v36, %v596_v38  ;;  %v1331_v38 = vmul.f32 %v2006_v51, %v2006_v51 }
 0x12d   :  { %v1248_v5 = vadd.f32 %v1247_v17, %v1995_v48  ;;  %v1380_v23 = vadd.f32 %v1379_v0, %v1317_v63  ;;  %v2243_v48 = vadd.f32 %v1806_v36, %v626_v47 }
 0x12e   :  { %949 = vst [vmem:[%s2409_s3 + $0x178] sm:$0xff] %v2240_v40 }
 0x12f   :  { %v1249_v8 = vadd.f32 %v1248_v5, %v2021_v57  ;;  %v1381_v18 = vadd.f32 %v1380_v23, %v1318_v4  ;;  %961 = vst [vmem:[%s2409_s3 + $0x1d8] sm:$0xff] %v2243_v48 }
 0x131   :  { %v1250_v57 = vadd.f32 %v1249_v8, %v2046_v2  ;;  %v1382_v35 = vadd.f32 %v1381_v18, %v1319_v6  ;;  %v631_v0 = vpop.f32.mrf.mxu3 }
 0x132   :  { %v2289_v4 = vadd.f32 %v1806_v36, %v631_v0 }
 0x133   :  { %v1251_v54 = vadd.f32 %v1250_v57, %v2057_v12  ;;  %v1383_v44 = vadd.f32 %v1382_v35, %v1320_v10  ;;  %v1332_v35 = vmul.f32 %v2024_v60, %v2024_v60 }
 0x134   :  { %963 = vst [vmem:[%s2409_s3 + $0x1e8] sm:$0xff] %v2289_v4 }
 0x135   :  { %v1384_v2 = vadd.f32 %v1383_v44, %v1321_v1  ;;  %v1252_v45 = vadd.f32 %v1251_v54, %v2106_v41  ;;  %v1326_v41 = vmul.f32 %v1873_v9, %v1873_v9  ;;  %v1333_v1 = vmul.f32 %v2060_v14, %v2060_v14 }
 0x137   :  { %v1385_v62 = vadd.f32 %v1384_v2, %v1322_v11  ;;  %v1253_v12 = vadd.f32 %v1252_v45, %v2124_v37  ;;  %v1327_v37 = vmul.f32 %v1908_v19, %v1908_v19  ;;  %v1335_v11 = vmul.f32 %v2127_v15, %v2127_v15 }
 0x139   :  { %v1386_v7 = vadd.f32 %v1385_v62, %v1323_v13  ;;  %v1254_v49 = vadd.f32 %v1253_v12, %v2163_v53  ;;  %v2286_v53 = vadd.f32 %v1806_v36, %v629_v22  ;;  %v634_v57 = vpop.f32.mrf.mxu3 }
 0x13b   :  { %v1255_v55 = vadd.f32 %v1254_v49, %v1862_v3  ;;  %v1387_v58 = vadd.f32 %v1386_v7, %v1324_v50  ;;  %v1328_v3 = vmul.f32 %v1921_v25, %v1921_v25  ;;  %962 = vst [vmem:[%s2409_s3 + $0x1e0] sm:$0xff] %v2286_v53  ;;  %v1336_v7 = vmul.f32 %v2136_v56, %v2136_v56 }
 0x13c   :  { %v1337_v49 = vmul.f32 %v2182_v30, %v2182_v30 }
 0x13d   :  { %v1256_v28 = vadd.f32 %v1255_v55, %v1873_v9  ;;  %v1388_v59 = vadd.f32 %v1387_v58, %v1325_v39  ;;  %v1338_v39 = vmul.f32 %v2188_v16, %v2188_v16 }
 0x13f   :  { %v1257_v63 = vadd.f32 %v1256_v28, %v1908_v19  ;;  %v1389_v17 = vadd.f32 %v1388_v59, %v1326_v41  ;;  %v1329_v19 = vmul.f32 %v1950_v32, %v1950_v32  ;;  %v1339_v41 = vmul.f32 %v2234_v29, %v2234_v29 }
 0x141   :  { %v1258_v5 = vadd.f32 %v1257_v63, %v1921_v25  ;;  %v1390_v9 = vadd.f32 %v1389_v17, %v1327_v37  ;;  %v1330_v25 = vmul.f32 %v1970_v42, %v1970_v42  ;;  %v636_v13 = vpop.f32.mrf.mxu3  ;;  %v1340_v37 = vmul.f32 %v2240_v40, %v2240_v40 }
 0x142   :  { %v2327_v22 = vadd.f32 %v1806_v36, %v636_v13 }
 0x143   :  { %v1259_v23 = vadd.f32 %v1258_v5, %v1950_v32  ;;  %v1391_v6 = vadd.f32 %v1390_v9, %v1328_v3 }
 0x144   :  { %965 = vst [vmem:[%s2409_s3 + $0x1f8] sm:$0xff] %v2327_v22 }
 0x145   :  { %v1392_v8 = vadd.f32 %v1391_v6, %v1329_v19  ;;  %v1260_v18 = vadd.f32 %v1259_v23, %v1970_v42  ;;  %v1334_v42 = vmul.f32 %v2069_v21, %v2069_v21 }
 0x147   :  { %v1261_v47 = vadd.f32 %v1260_v18, %v2006_v51  ;;  %v1393_v10 = vadd.f32 %v1392_v8, %v1330_v25 }
 0x149   :  { %v1262_v54 = vadd.f32 %v1261_v47, %v2024_v60  ;;  %v1394_v32 = vadd.f32 %v1393_v10, %v1331_v38  ;;  %v2324_v60 = vadd.f32 %v1806_v36, %v634_v57 }
 0x14b   :  { %v1263_v44 = vadd.f32 %v1262_v54, %v2060_v14  ;;  %v1395_v2 = vadd.f32 %v1394_v32, %v1332_v35  ;;  %964 = vst [vmem:[%s2409_s3 + $0x1f0] sm:$0xff] %v2324_v60 }
 0x14d   :  { %v1264_v45 = vadd.f32 %v1263_v44, %v2069_v21  ;;  %v1396_v51 = vadd.f32 %v1395_v2, %v1333_v1 }
 0x14f   :  { %v1265_v62 = vadd.f32 %v1264_v45, %v2127_v15  ;;  %v1397_v12 = vadd.f32 %v1396_v51, %v1334_v42  ;;  %v1352_v42 = vmul.f32 %v2243_v48, %v2243_v48 }
 0x151   :  { %v1266_v14 = vadd.f32 %v1265_v62, %v2136_v56  ;;  %v1398_v21 = vadd.f32 %v1397_v12, %v1335_v11  ;;  %v1353_v11 = vmul.f32 %v2286_v53, %v2286_v53  ;;  %v1354_v12 = vmul.f32 %v2289_v4, %v2289_v4 }
 0x153   :  { %v1399_v15 = vadd.f32 %v1398_v21, %v1336_v7  ;;  %v1267_v36 = vadd.f32 %v1266_v14, %v2182_v30  ;;  %v1341_v30 = vmul.f32 %v1953_v33, %v1953_v33  ;;  %v1355_v14 = vmul.f32 %v2324_v60, %v2324_v60 }
 0x154   :  { %v1356_v21 = vmul.f32 %v2327_v22, %v2327_v22 }
 0x155   :  { %v1400_v50 = vadd.f32 %v1399_v15, %v1337_v49  ;;  %v1268_v56 = vadd.f32 %v1267_v36, %v2188_v16  ;;  %v1342_v16 = vmul.f32 %v1973_v43, %v1973_v43 }
 0x157   :  { %v1401_v55 = vadd.f32 %v1400_v50, %v1338_v39  ;;  %v1269_v58 = vadd.f32 %v1268_v56, %v2234_v29  ;;  %v1343_v29 = vmul.f32 %v2009_v52, %v2009_v52 }
 0x159   :  { %v1402_v28 = vadd.f32 %v1401_v55, %v1339_v41  ;;  %v1270_v59 = vadd.f32 %v1269_v58, %v2240_v40  ;;  %v1344_v40 = vmul.f32 %v2027_v61, %v2027_v61 }
 0x15b   :  { %v1271_v63 = vadd.f32 %v1270_v59, %v1953_v33  ;;  %v1403_v17 = vadd.f32 %v1402_v28, %v1340_v37  ;;  %v1345_v33 = vmul.f32 %v2063_v20, %v2063_v20 }
 0x15d   :  { %v1272_v0 = vadd.f32 %v1271_v63, %v1973_v43  ;;  %v1404_v3 = vadd.f32 %v1403_v17, %v1341_v30  ;;  %v1346_v43 = vmul.f32 %v2078_v26, %v2078_v26 }
 0x15f   :  { %v1273_v5 = vadd.f32 %v1272_v0, %v2009_v52  ;;  %v1405_v9 = vadd.f32 %v1404_v3, %v1342_v16  ;;  %v1347_v52 = vmul.f32 %v2130_v27, %v2130_v27 }
 0x161   :  { %v1274_v19 = vadd.f32 %v1273_v5, %v2027_v61  ;;  %v1406_v23 = vadd.f32 %v1405_v9, %v1343_v29  ;;  %v1348_v61 = vmul.f32 %v2143_v34, %v2143_v34 }
 0x163   :  { %v1275_v6 = vadd.f32 %v1274_v19, %v2063_v20  ;;  %v1407_v25 = vadd.f32 %v1406_v23, %v1344_v40  ;;  %v1349_v20 = vmul.f32 %v2185_v31, %v2185_v31 }
 0x165   :  { %v1408_v8 = vadd.f32 %v1407_v25, %v1345_v33  ;;  %v1276_v18 = vadd.f32 %v1275_v6, %v2078_v26  ;;  %v1350_v26 = vmul.f32 %v2191_v46, %v2191_v46 }
 0x167   :  { %v1277_v38 = vadd.f32 %v1276_v18, %v2130_v27  ;;  %v1409_v47 = vadd.f32 %v1408_v8, %v1346_v43  ;;  %v1351_v27 = vmul.f32 %v2237_v24, %v2237_v24 }
 0x169   :  { %v1278_v10 = vadd.f32 %v1277_v38, %v2143_v34  ;;  %v1410_v57 = vadd.f32 %v1409_v47, %v1347_v52 }
 0x16b   :  { %v1279_v35 = vadd.f32 %v1278_v10, %v2185_v31  ;;  %v1411_v54 = vadd.f32 %v1410_v57, %v1348_v61 }
 0x16d   :  { %v1280_v32 = vadd.f32 %v1279_v35, %v2191_v46  ;;  %v1412_v1 = vadd.f32 %v1411_v54, %v1349_v20 }
 0x16f   :  { %v1281_v44 = vadd.f32 %v1280_v32, %v2237_v24  ;;  %v1413_v2 = vadd.f32 %v1412_v1, %v1350_v26 }
 0x171   :  { %v1282_v34 = vadd.f32 %v1281_v44, %v2243_v48  ;;  %v1414_v45 = vadd.f32 %v1413_v2, %v1351_v27 }
 0x173   :  { %v1415_v31 = vadd.f32 %v1414_v45, %v1352_v42  ;;  %v1283_v51 = vadd.f32 %v1282_v34, %v2286_v53 }
 0x175   :  { %v1416_v46 = vadd.f32 %v1415_v31, %v1353_v11  ;;  %v1284_v62 = vadd.f32 %v1283_v51, %v2289_v4 }
 0x177   :  { %v1417_v24 = vadd.f32 %v1416_v46, %v1354_v12  ;;  %v1285_v13 = vadd.f32 %v1284_v62, %v2324_v60 }
 0x179   :  { %v1418_v48 = vadd.f32 %v1417_v24, %v1355_v14  ;;  %v1286_v7 = vadd.f32 %v1285_v13, %v2327_v22 }
 0x17b   :  { %v1287_v15 = vrot.slane %v1286_v7, 4  ;;  %v1419_v53 = vadd.f32 %v1418_v48, %v1356_v21 }
 0x17d   :  { %v1288_v36 = vadd.f32 %v1287_v15, %v1286_v7  ;;  %v1420_v49 = vrot.slane %v1419_v53, 4 }
 0x17f   :  { %v1289_v50 = vrot.slane %v1288_v36, 2  ;;  %v1421_v56 = vadd.f32 %v1420_v49, %v1419_v53 }
 0x181   :  { %v1290_v39 = vadd.f32 %v1289_v50, %v1288_v36  ;;  %v1422_v4 = vrot.slane %v1421_v56, 2 }
 0x183   :  { %v1291_v55 = vrot.slane %v1290_v39, 1  ;;  %v1423_v58 = vadd.f32 %v1422_v4, %v1421_v56 }
 0x185   :  { %v1292_v41 = vadd.f32 %v1291_v55, %v1290_v39  ;;  %v1424_v28 = vrot.slane %v1423_v58, 1 }
 0x187   :  { %v1425_v59 = vadd.f32 %v1424_v28, %v1423_v58  ;;  %1426 = vst [vmem:[%s2410_s4] sm:$0x1] %v1292_v41 }
 0x189   :  { %1427 = vst [vmem:[%s2411_s5] sm:$0x1] %v1425_v59 }

</bundles_post_ra>
